<compile_context>
chip_gen: v7x
topology: tpu7x:2x2x1
jax: 0.10.0
libtpu: 0.0.40
codegen_flags: <defaults>
</compile_context>

<pallas_src>
import functools

import jax
import jax.numpy as jnp
from jax import lax
from jax.experimental import pallas as pl
from jax.experimental.pallas import tpu as pltpu


def _conv3x3_act_kernel(x_ref, w_ref, b_ref, o_ref, *, TH, W, C_in, C_out, neg_slope):
    """One (batch, row-tile) step of 3x3 SAME conv + bias + LeakyReLU.

    x_ref: (1, TH+2, W+2, C_in)  zero-padded NHWC halo window (compute dtype)
    w_ref: (3, 3*C_in, C_out)    weights packed per dy, k = dx*C_in + ci
    b_ref: (1, C_out)            bias (f32)
    o_ref: (1, TH, W*C_out)      lane-dense output rows for this tile
    """
    acc = jnp.zeros((TH * W, C_out), jnp.float32)

    # One fused matmul per kernel row dy: the 3 dx taps are concatenated along
    # the channel/lane axis so each matmul has K = 3*C_in instead of C_in.
    for dy in range(3):
        taps = [x_ref[0, dy:dy + TH, dx:dx + W, :] for dx in range(3)]  # 3 x (TH, W, C_in)
        op = jnp.concatenate(taps, axis=-1)                             # (TH, W, 3*C_in)
        op = op.reshape(TH * W, 3 * C_in)                               # leading collapse (W % 8 == 0)
        acc = acc + jnp.dot(op, w_ref[dy], preferred_element_type=jnp.float32)

    acc = acc + b_ref[...].astype(jnp.float32)                          # bias
    acc = jnp.where(acc >= 0, acc, acc * neg_slope)                     # LeakyReLU(0.01)

    # Lane-dense store: o_ref's last dim is W*C_out, so the VMEM block is fully
    # packed and the HBM writeback DMA is contiguous.  Assemble the (TH, W*C_out)
    # rows with W static lane-slice stores (token w -> lanes [w*C_out, (w+1)*C_out)).
    y = acc.reshape(TH, W, C_out).astype(o_ref.dtype)
    for wi in range(W):
        o_ref[0, :, wi * C_out:(wi + 1) * C_out] = y[:, wi, :]


def _pick_row_tile(B, H, W):
    """Row tile so TH*W ~ 256 (MXU fill + step-overhead amortization)."""
    target_rows = max(8, 256 // max(W, 1))
    if H <= target_rows:
        TH = H
    else:
        cands = [t for t in range(8, H + 1, 8) if H % t == 0 and t <= target_rows]
        TH = max(cands) if cands else H
    # v7x: keep >= 2 grid steps when B == 1 so both TensorCores get work.
    if B == 1 and TH == H and H % 16 == 0:
        TH = H // 2
    return TH


def input_proj_forward(x_nchw, w_hwio, bias, *, neg_slope=0.01, row_tile=None,
                       compute_dtype=jnp.bfloat16, out_dtype=None):
    """Pallas forward of InputProj.  x_nchw: (B, C_in, H, W) -> (B, H*W, C_out)."""
    B, C_in, H, W = x_nchw.shape
    KH, KW, wcin, C_out = w_hwio.shape
    assert (KH, KW) == (3, 3) and wcin == C_in
    assert W % 8 == 0, "W must be a multiple of 8 (sublane-exact in-kernel reshapes)"
    if out_dtype is None:
        out_dtype = x_nchw.dtype

    TH = _pick_row_tile(B, H, W) if row_tile is None else min(row_tile, H)
    assert H % TH == 0, "H must be divisible by the row tile"
    assert TH == H or TH % 8 == 0, "row tile must be a multiple of 8 (or the full H)"
    n_rb = H // TH

    # TODO(synk): if the surrounding JAX model keeps activations NHWC, drop this
    # transpose (and fold the halo pad into the same copy) to remove the only
    # pre-kernel HBM round-trip.
    x_nhwc = jnp.transpose(x_nchw, (0, 2, 3, 1)).astype(compute_dtype)
    xp = jnp.pad(x_nhwc, ((0, 0), (1, 1), (1, 1), (0, 0)))   # SAME halo (fused with the transpose copy)

    # Pack weights once in the wrapper: (3,3,C_in,C_out) -> (3, 3*C_in, C_out),
    # k = dx*C_in + ci, matching the kernel's lane-concatenation order.
    w_packed = w_hwio.astype(compute_dtype).reshape(KH, KW * C_in, C_out)
    b2 = bias.reshape(1, C_out).astype(jnp.float32)

    if n_rb == 1:
        # Whole (tiny) padded image per batch, resident across the (single) row step.
        x_spec = pl.BlockSpec((1, H + 2, W + 2, C_in), lambda b, i: (b, 0, 0, 0))
    else:
        # Row-halo tiling: overlapping (TH+2)-row windows at element offset i*TH,
        # keeping input VMEM at O(TH) rows instead of O(H) (v7x budget).
        x_spec = pl.BlockSpec((1, pl.Element(TH + 2), W + 2, C_in),
                              lambda b, i: (b, i * TH, 0, 0))

    kern = functools.partial(_conv3x3_act_kernel, TH=TH, W=W, C_in=C_in,
                             C_out=C_out, neg_slope=neg_slope)
    y = pl.pallas_call(
        kern,
        out_shape=jax.ShapeDtypeStruct((B, H, W * C_out), out_dtype),
        grid=(B, n_rb),
        in_specs=[
            x_spec,
            pl.BlockSpec((KH, KW * C_in, C_out), lambda b, i: (0, 0, 0)),  # resident weights
            pl.BlockSpec((1, C_out), lambda b, i: (0, 0)),                 # resident bias
        ],
        out_specs=pl.BlockSpec((1, TH, W * C_out), lambda b, i: (b, i, 0)),
        compiler_params=pltpu.CompilerParams(
            dimension_semantics=("parallel", "parallel")),
    )(xp, w_packed, b2)

    # Free row-major view: (B, H, W*C_out) -> (B, H*W, C_out).
    return y.reshape(B, H * W, C_out)


def input_proj_reference(x_nchw, w_hwio, bias, *, neg_slope=0.01):
    """Pure-JAX/XLA reference (matches the PyTorch module in eval mode)."""
    x_nhwc = jnp.transpose(x_nchw, (0, 2, 3, 1))
    y = lax.conv_general_dilated(
        x_nhwc, w_hwio, window_strides=(1, 1), padding="SAME",
        dimension_numbers=("NHWC", "HWIO", "NHWC"),
        precision=lax.Precision.HIGHEST,
    )
    y = y + bias
    y = jnp.where(y >= 0, y, y * neg_slope)
    B, H, W, C = y.shape
    return y.reshape(B, H * W, C)


if __name__ == "__main__":
    # Module defaults: in_channel=34, out_channel=48, kernel=3, stride=1.
    B, C_in, H, W = 2, 34, 16, 16
    C_out = 48

    key = jax.random.PRNGKey(0)
    kx, kw, kb = jax.random.split(key, 3)
    x = jax.random.normal(kx, (B, C_in, H, W), dtype=jnp.float32)
    w = (jax.random.normal(kw, (3, 3, C_in, C_out), dtype=jnp.float32) * 0.05)
    b = (jax.random.normal(kb, (C_out,), dtype=jnp.float32) * 0.05)

    ref = jax.block_until_ready(input_proj_reference(x, w, b))

    # Fast path: bf16 operands, f32 accumulation/epilogue, f32 output.
    out = jax.block_until_ready(jax.jit(input_proj_forward)(x, w, b))
    assert out.shape == (B, H * W, C_out)
    assert jnp.allclose(out, ref, atol=7e-2, rtol=5e-2), (
        f"bf16 path mismatch, max abs err {jnp.max(jnp.abs(out - ref))}")

    # Exact path: same kernel with f32 compute, tight tolerance vs the reference.
    out32 = jax.block_until_ready(
        jax.jit(functools.partial(input_proj_forward, compute_dtype=jnp.float32))(x, w, b))
    assert jnp.allclose(out32, ref, atol=1e-3, rtol=1e-3), (
        f"f32 path mismatch, max abs err {jnp.max(jnp.abs(out32 - ref))}")

    print("KERNEL_OK")
</pallas_src>

<mosaic_0001>
module attributes {stable_mosaic.version = 11 : i64} {
  func.func @_conv3x3_act_kernel(%arg0: i32, %arg1: i32, %arg2: memref<1x18x18x34xbf16, #tpu.memory_space<vmem>>, %arg3: memref<3x102x48xbf16, #tpu.memory_space<vmem>>, %arg4: memref<1x48xf32, #tpu.memory_space<vmem>>, %arg5: memref<1x16x768xf32, #tpu.memory_space<vmem>>) attributes {dimension_semantics = [#tpu.dimension_semantics<parallel>, #tpu.dimension_semantics<parallel>], iteration_bounds = array<i64: 2, 1>, scalar_prefetch = 0 : i64, scratch_operands = 0 : i64, tpu.core_type = #tpu.core_type<tc>, window_params = [{transform_indices = @transform_0, window_bounds = array<i64: 1, 18, 18, 34>}, {pipeline_mode = #tpu.pipeline_mode<synchronous>, transform_indices = @transform_1, window_bounds = array<i64: 3, 102, 48>}, {pipeline_mode = #tpu.pipeline_mode<synchronous>, transform_indices = @transform_2, window_bounds = array<i64: 1, 48>}, {transform_indices = @transform_3, window_bounds = array<i64: 1, 16, 768>}]} {
    %cst = arith.constant 0.000000e+00 : f32
    %0 = vector.broadcast %cst : f32 to vector<256x48xf32>
    %c0 = arith.constant 0 : index
    %c0_0 = arith.constant 0 : index
    %c0_1 = arith.constant 0 : index
    %c0_2 = arith.constant 0 : index
    %1 = vector.load %arg2[%c0, %c0_0, %c0_1, %c0_2] : memref<1x18x18x34xbf16, #tpu.memory_space<vmem>>, vector<1x16x16x34xbf16>
    %2 = vector.shape_cast %1 : vector<1x16x16x34xbf16> to vector<16x16x34xbf16>
    %c0_3 = arith.constant 0 : index
    %c0_4 = arith.constant 0 : index
    %c1 = arith.constant 1 : index
    %c0_5 = arith.constant 0 : index
    %3 = vector.load %arg2[%c0_3, %c0_4, %c1, %c0_5] : memref<1x18x18x34xbf16, #tpu.memory_space<vmem>>, vector<1x16x16x34xbf16>
    %4 = vector.shape_cast %3 : vector<1x16x16x34xbf16> to vector<16x16x34xbf16>
    %c0_6 = arith.constant 0 : index
    %c0_7 = arith.constant 0 : index
    %c2 = arith.constant 2 : index
    %c0_8 = arith.constant 0 : index
    %5 = vector.load %arg2[%c0_6, %c0_7, %c2, %c0_8] : memref<1x18x18x34xbf16, #tpu.memory_space<vmem>>, vector<1x16x16x34xbf16>
    %6 = vector.shape_cast %5 : vector<1x16x16x34xbf16> to vector<16x16x34xbf16>
    %7 = tpu.concatenate %2, %4, %6 in 2 : vector<16x16x34xbf16>, vector<16x16x34xbf16>, vector<16x16x34xbf16> -> vector<16x16x102xbf16>
    %8 = vector.shape_cast %7 : vector<16x16x102xbf16> to vector<256x102xbf16>
    %c0_9 = arith.constant 0 : index
    %c0_10 = arith.constant 0 : index
    %c0_11 = arith.constant 0 : index
    %9 = vector.load %arg3[%c0_9, %c0_10, %c0_11] : memref<3x102x48xbf16, #tpu.memory_space<vmem>>, vector<1x102x48xbf16>
    %10 = vector.shape_cast %9 : vector<1x102x48xbf16> to vector<102x48xbf16>
    %cst_12 = arith.constant dense<0.000000e+00> : vector<256x48xf32>
    %11 = tpu.matmul %8, %10, %cst_12 {dimension_numbers = #tpu.dot_dimension_numbers<[1], [0], [0], [1], [0, 0, 1, 1], [], []>} : vector<256x102xbf16>, vector<102x48xbf16>, vector<256x48xf32> -> vector<256x48xf32>
    %12 = arith.addf %0, %11 : vector<256x48xf32>
    %c0_13 = arith.constant 0 : index
    %c1_14 = arith.constant 1 : index
    %c0_15 = arith.constant 0 : index
    %c0_16 = arith.constant 0 : index
    %13 = vector.load %arg2[%c0_13, %c1_14, %c0_15, %c0_16] : memref<1x18x18x34xbf16, #tpu.memory_space<vmem>>, vector<1x16x16x34xbf16>
    %14 = vector.shape_cast %13 : vector<1x16x16x34xbf16> to vector<16x16x34xbf16>
    %c0_17 = arith.constant 0 : index
    %c1_18 = arith.constant 1 : index
    %c1_19 = arith.constant 1 : index
    %c0_20 = arith.constant 0 : index
    %15 = vector.load %arg2[%c0_17, %c1_18, %c1_19, %c0_20] : memref<1x18x18x34xbf16, #tpu.memory_space<vmem>>, vector<1x16x16x34xbf16>
    %16 = vector.shape_cast %15 : vector<1x16x16x34xbf16> to vector<16x16x34xbf16>
    %c0_21 = arith.constant 0 : index
    %c1_22 = arith.constant 1 : index
    %c2_23 = arith.constant 2 : index
    %c0_24 = arith.constant 0 : index
    %17 = vector.load %arg2[%c0_21, %c1_22, %c2_23, %c0_24] : memref<1x18x18x34xbf16, #tpu.memory_space<vmem>>, vector<1x16x16x34xbf16>
    %18 = vector.shape_cast %17 : vector<1x16x16x34xbf16> to vector<16x16x34xbf16>
    %19 = tpu.concatenate %14, %16, %18 in 2 : vector<16x16x34xbf16>, vector<16x16x34xbf16>, vector<16x16x34xbf16> -> vector<16x16x102xbf16>
    %20 = vector.shape_cast %19 : vector<16x16x102xbf16> to vector<256x102xbf16>
    %c1_25 = arith.constant 1 : index
    %c0_26 = arith.constant 0 : index
    %c0_27 = arith.constant 0 : index
    %21 = vector.load %arg3[%c1_25, %c0_26, %c0_27] : memref<3x102x48xbf16, #tpu.memory_space<vmem>>, vector<1x102x48xbf16>
    %22 = vector.shape_cast %21 : vector<1x102x48xbf16> to vector<102x48xbf16>
    %cst_28 = arith.constant dense<0.000000e+00> : vector<256x48xf32>
    %23 = tpu.matmul %20, %22, %cst_28 {dimension_numbers = #tpu.dot_dimension_numbers<[1], [0], [0], [1], [0, 0, 1, 1], [], []>} : vector<256x102xbf16>, vector<102x48xbf16>, vector<256x48xf32> -> vector<256x48xf32>
    %24 = arith.addf %12, %23 : vector<256x48xf32>
    %c0_29 = arith.constant 0 : index
    %c2_30 = arith.constant 2 : index
    %c0_31 = arith.constant 0 : index
    %c0_32 = arith.constant 0 : index
    %25 = vector.load %arg2[%c0_29, %c2_30, %c0_31, %c0_32] : memref<1x18x18x34xbf16, #tpu.memory_space<vmem>>, vector<1x16x16x34xbf16>
    %26 = vector.shape_cast %25 : vector<1x16x16x34xbf16> to vector<16x16x34xbf16>
    %c0_33 = arith.constant 0 : index
    %c2_34 = arith.constant 2 : index
    %c1_35 = arith.constant 1 : index
    %c0_36 = arith.constant 0 : index
    %27 = vector.load %arg2[%c0_33, %c2_34, %c1_35, %c0_36] : memref<1x18x18x34xbf16, #tpu.memory_space<vmem>>, vector<1x16x16x34xbf16>
    %28 = vector.shape_cast %27 : vector<1x16x16x34xbf16> to vector<16x16x34xbf16>
    %c0_37 = arith.constant 0 : index
    %c2_38 = arith.constant 2 : index
    %c2_39 = arith.constant 2 : index
    %c0_40 = arith.constant 0 : index
    %29 = vector.load %arg2[%c0_37, %c2_38, %c2_39, %c0_40] : memref<1x18x18x34xbf16, #tpu.memory_space<vmem>>, vector<1x16x16x34xbf16>
    %30 = vector.shape_cast %29 : vector<1x16x16x34xbf16> to vector<16x16x34xbf16>
    %31 = tpu.concatenate %26, %28, %30 in 2 : vector<16x16x34xbf16>, vector<16x16x34xbf16>, vector<16x16x34xbf16> -> vector<16x16x102xbf16>
    %32 = vector.shape_cast %31 : vector<16x16x102xbf16> to vector<256x102xbf16>
    %c2_41 = arith.constant 2 : index
    %c0_42 = arith.constant 0 : index
    %c0_43 = arith.constant 0 : index
    %33 = vector.load %arg3[%c2_41, %c0_42, %c0_43] : memref<3x102x48xbf16, #tpu.memory_space<vmem>>, vector<1x102x48xbf16>
    %34 = vector.shape_cast %33 : vector<1x102x48xbf16> to vector<102x48xbf16>
    %cst_44 = arith.constant dense<0.000000e+00> : vector<256x48xf32>
    %35 = tpu.matmul %32, %34, %cst_44 {dimension_numbers = #tpu.dot_dimension_numbers<[1], [0], [0], [1], [0, 0, 1, 1], [], []>} : vector<256x102xbf16>, vector<102x48xbf16>, vector<256x48xf32> -> vector<256x48xf32>
    %36 = arith.addf %24, %35 : vector<256x48xf32>
    %c0_45 = arith.constant 0 : index
    %c0_46 = arith.constant 0 : index
    %37 = vector.load %arg4[%c0_45, %c0_46] : memref<1x48xf32, #tpu.memory_space<vmem>>, vector<1x48xf32>
    %38 = vector.broadcast %37 : vector<1x48xf32> to vector<256x48xf32>
    %39 = arith.addf %36, %38 : vector<256x48xf32>
    %cst_47 = arith.constant 0.000000e+00 : f32
    %40 = vector.broadcast %cst_47 : f32 to vector<256x48xf32>
    %41 = arith.cmpf oge, %39, %40 : vector<256x48xf32>
    %cst_48 = arith.constant 0.00999999977 : f32
    %42 = vector.broadcast %cst_48 : f32 to vector<256x48xf32>
    %43 = arith.mulf %39, %42 : vector<256x48xf32>
    %44 = arith.select %41, %39, %43 : vector<256x48xi1>, vector<256x48xf32>
    %45 = vector.shape_cast %44 : vector<256x48xf32> to vector<16x16x48xf32>
    %46 = vector.extract_strided_slice %45 {offsets = [0, 0, 0], sizes = [16, 1, 48], strides = [1, 1, 1]} : vector<16x16x48xf32> to vector<16x1x48xf32>
    %47 = vector.shape_cast %46 : vector<16x1x48xf32> to vector<16x48xf32>
    %c0_49 = arith.constant 0 : index
    %c0_50 = arith.constant 0 : index
    %c0_51 = arith.constant 0 : index
    %48 = vector.load %arg5[%c0_49, %c0_50, %c0_51] : memref<1x16x768xf32, #tpu.memory_space<vmem>>, vector<1x16x48xf32>
    %49 = vector.shape_cast %48 : vector<1x16x48xf32> to vector<16x48xf32>
    %50 = vector.shape_cast %47 : vector<16x48xf32> to vector<1x16x48xf32>
    tpu.vector_store %arg5[%c0_49, %c0_50, %c0_51], %50 {strides = array<i32>} : memref<1x16x768xf32, #tpu.memory_space<vmem>>, vector<1x16x48xf32>,
    %51 = vector.extract_strided_slice %45 {offsets = [0, 1, 0], sizes = [16, 1, 48], strides = [1, 1, 1]} : vector<16x16x48xf32> to vector<16x1x48xf32>
    %52 = vector.shape_cast %51 : vector<16x1x48xf32> to vector<16x48xf32>
    %c0_52 = arith.constant 0 : index
    %c0_53 = arith.constant 0 : index
    %c48 = arith.constant 48 : index
    %53 = vector.load %arg5[%c0_52, %c0_53, %c48] : memref<1x16x768xf32, #tpu.memory_space<vmem>>, vector<1x16x48xf32>
    %54 = vector.shape_cast %53 : vector<1x16x48xf32> to vector<16x48xf32>
    %55 = vector.shape_cast %52 : vector<16x48xf32> to vector<1x16x48xf32>
    tpu.vector_store %arg5[%c0_52, %c0_53, %c48], %55 {strides = array<i32>} : memref<1x16x768xf32, #tpu.memory_space<vmem>>, vector<1x16x48xf32>,
    %56 = vector.extract_strided_slice %45 {offsets = [0, 2, 0], sizes = [16, 1, 48], strides = [1, 1, 1]} : vector<16x16x48xf32> to vector<16x1x48xf32>
    %57 = vector.shape_cast %56 : vector<16x1x48xf32> to vector<16x48xf32>
    %c0_54 = arith.constant 0 : index
    %c0_55 = arith.constant 0 : index
    %c96 = arith.constant 96 : index
    %58 = vector.load %arg5[%c0_54, %c0_55, %c96] : memref<1x16x768xf32, #tpu.memory_space<vmem>>, vector<1x16x48xf32>
    %59 = vector.shape_cast %58 : vector<1x16x48xf32> to vector<16x48xf32>
    %60 = vector.shape_cast %57 : vector<16x48xf32> to vector<1x16x48xf32>
    tpu.vector_store %arg5[%c0_54, %c0_55, %c96], %60 {strides = array<i32>} : memref<1x16x768xf32, #tpu.memory_space<vmem>>, vector<1x16x48xf32>,
    %61 = vector.extract_strided_slice %45 {offsets = [0, 3, 0], sizes = [16, 1, 48], strides = [1, 1, 1]} : vector<16x16x48xf32> to vector<16x1x48xf32>
    %62 = vector.shape_cast %61 : vector<16x1x48xf32> to vector<16x48xf32>
    %c0_56 = arith.constant 0 : index
    %c0_57 = arith.constant 0 : index
    %c144 = arith.constant 144 : index
    %63 = vector.load %arg5[%c0_56, %c0_57, %c144] : memref<1x16x768xf32, #tpu.memory_space<vmem>>, vector<1x16x48xf32>
    %64 = vector.shape_cast %63 : vector<1x16x48xf32> to vector<16x48xf32>
    %65 = vector.shape_cast %62 : vector<16x48xf32> to vector<1x16x48xf32>
    tpu.vector_store %arg5[%c0_56, %c0_57, %c144], %65 {strides = array<i32>} : memref<1x16x768xf32, #tpu.memory_space<vmem>>, vector<1x16x48xf32>,
    %66 = vector.extract_strided_slice %45 {offsets = [0, 4, 0], sizes = [16, 1, 48], strides = [1, 1, 1]} : vector<16x16x48xf32> to vector<16x1x48xf32>
    %67 = vector.shape_cast %66 : vector<16x1x48xf32> to vector<16x48xf32>
    %c0_58 = arith.constant 0 : index
    %c0_59 = arith.constant 0 : index
    %c192 = arith.constant 192 : index
    %68 = vector.load %arg5[%c0_58, %c0_59, %c192] : memref<1x16x768xf32, #tpu.memory_space<vmem>>, vector<1x16x48xf32>
    %69 = vector.shape_cast %68 : vector<1x16x48xf32> to vector<16x48xf32>
    %70 = vector.shape_cast %67 : vector<16x48xf32> to vector<1x16x48xf32>
    tpu.vector_store %arg5[%c0_58, %c0_59, %c192], %70 {strides = array<i32>} : memref<1x16x768xf32, #tpu.memory_space<vmem>>, vector<1x16x48xf32>,
    %71 = vector.extract_strided_slice %45 {offsets = [0, 5, 0], sizes = [16, 1, 48], strides = [1, 1, 1]} : vector<16x16x48xf32> to vector<16x1x48xf32>
    %72 = vector.shape_cast %71 : vector<16x1x48xf32> to vector<16x48xf32>
    %c0_60 = arith.constant 0 : index
    %c0_61 = arith.constant 0 : index
    %c240 = arith.constant 240 : index
    %73 = vector.load %arg5[%c0_60, %c0_61, %c240] : memref<1x16x768xf32, #tpu.memory_space<vmem>>, vector<1x16x48xf32>
    %74 = vector.shape_cast %73 : vector<1x16x48xf32> to vector<16x48xf32>
    %75 = vector.shape_cast %72 : vector<16x48xf32> to vector<1x16x48xf32>
    tpu.vector_store %arg5[%c0_60, %c0_61, %c240], %75 {strides = array<i32>} : memref<1x16x768xf32, #tpu.memory_space<vmem>>, vector<1x16x48xf32>,
    %76 = vector.extract_strided_slice %45 {offsets = [0, 6, 0], sizes = [16, 1, 48], strides = [1, 1, 1]} : vector<16x16x48xf32> to vector<16x1x48xf32>
    %77 = vector.shape_cast %76 : vector<16x1x48xf32> to vector<16x48xf32>
    %c0_62 = arith.constant 0 : index
    %c0_63 = arith.constant 0 : index
    %c288 = arith.constant 288 : index
    %78 = vector.load %arg5[%c0_62, %c0_63, %c288] : memref<1x16x768xf32, #tpu.memory_space<vmem>>, vector<1x16x48xf32>
    %79 = vector.shape_cast %78 : vector<1x16x48xf32> to vector<16x48xf32>
    %80 = vector.shape_cast %77 : vector<16x48xf32> to vector<1x16x48xf32>
    tpu.vector_store %arg5[%c0_62, %c0_63, %c288], %80 {strides = array<i32>} : memref<1x16x768xf32, #tpu.memory_space<vmem>>, vector<1x16x48xf32>,
    %81 = vector.extract_strided_slice %45 {offsets = [0, 7, 0], sizes = [16, 1, 48], strides = [1, 1, 1]} : vector<16x16x48xf32> to vector<16x1x48xf32>
    %82 = vector.shape_cast %81 : vector<16x1x48xf32> to vector<16x48xf32>
    %c0_64 = arith.constant 0 : index
    %c0_65 = arith.constant 0 : index
    %c336 = arith.constant 336 : index
    %83 = vector.load %arg5[%c0_64, %c0_65, %c336] : memref<1x16x768xf32, #tpu.memory_space<vmem>>, vector<1x16x48xf32>
    %84 = vector.shape_cast %83 : vector<1x16x48xf32> to vector<16x48xf32>
    %85 = vector.shape_cast %82 : vector<16x48xf32> to vector<1x16x48xf32>
    tpu.vector_store %arg5[%c0_64, %c0_65, %c336], %85 {strides = array<i32>} : memref<1x16x768xf32, #tpu.memory_space<vmem>>, vector<1x16x48xf32>,
    %86 = vector.extract_strided_slice %45 {offsets = [0, 8, 0], sizes = [16, 1, 48], strides = [1, 1, 1]} : vector<16x16x48xf32> to vector<16x1x48xf32>
    %87 = vector.shape_cast %86 : vector<16x1x48xf32> to vector<16x48xf32>
    %c0_66 = arith.constant 0 : index
    %c0_67 = arith.constant 0 : index
    %c384 = arith.constant 384 : index
    %88 = vector.load %arg5[%c0_66, %c0_67, %c384] : memref<1x16x768xf32, #tpu.memory_space<vmem>>, vector<1x16x48xf32>
    %89 = vector.shape_cast %88 : vector<1x16x48xf32> to vector<16x48xf32>
    %90 = vector.shape_cast %87 : vector<16x48xf32> to vector<1x16x48xf32>
    tpu.vector_store %arg5[%c0_66, %c0_67, %c384], %90 {strides = array<i32>} : memref<1x16x768xf32, #tpu.memory_space<vmem>>, vector<1x16x48xf32>,
    %91 = vector.extract_strided_slice %45 {offsets = [0, 9, 0], sizes = [16, 1, 48], strides = [1, 1, 1]} : vector<16x16x48xf32> to vector<16x1x48xf32>
    %92 = vector.shape_cast %91 : vector<16x1x48xf32> to vector<16x48xf32>
    %c0_68 = arith.constant 0 : index
    %c0_69 = arith.constant 0 : index
    %c432 = arith.constant 432 : index
    %93 = vector.load %arg5[%c0_68, %c0_69, %c432] : memref<1x16x768xf32, #tpu.memory_space<vmem>>, vector<1x16x48xf32>
    %94 = vector.shape_cast %93 : vector<1x16x48xf32> to vector<16x48xf32>
    %95 = vector.shape_cast %92 : vector<16x48xf32> to vector<1x16x48xf32>
    tpu.vector_store %arg5[%c0_68, %c0_69, %c432], %95 {strides = array<i32>} : memref<1x16x768xf32, #tpu.memory_space<vmem>>, vector<1x16x48xf32>,
    %96 = vector.extract_strided_slice %45 {offsets = [0, 10, 0], sizes = [16, 1, 48], strides = [1, 1, 1]} : vector<16x16x48xf32> to vector<16x1x48xf32>
    %97 = vector.shape_cast %96 : vector<16x1x48xf32> to vector<16x48xf32>
    %c0_70 = arith.constant 0 : index
    %c0_71 = arith.constant 0 : index
    %c480 = arith.constant 480 : index
    %98 = vector.load %arg5[%c0_70, %c0_71, %c480] : memref<1x16x768xf32, #tpu.memory_space<vmem>>, vector<1x16x48xf32>
    %99 = vector.shape_cast %98 : vector<1x16x48xf32> to vector<16x48xf32>
    %100 = vector.shape_cast %97 : vector<16x48xf32> to vector<1x16x48xf32>
    tpu.vector_store %arg5[%c0_70, %c0_71, %c480], %100 {strides = array<i32>} : memref<1x16x768xf32, #tpu.memory_space<vmem>>, vector<1x16x48xf32>,
    %101 = vector.extract_strided_slice %45 {offsets = [0, 11, 0], sizes = [16, 1, 48], strides = [1, 1, 1]} : vector<16x16x48xf32> to vector<16x1x48xf32>
    %102 = vector.shape_cast %101 : vector<16x1x48xf32> to vector<16x48xf32>
    %c0_72 = arith.constant 0 : index
    %c0_73 = arith.constant 0 : index
    %c528 = arith.constant 528 : index
    %103 = vector.load %arg5[%c0_72, %c0_73, %c528] : memref<1x16x768xf32, #tpu.memory_space<vmem>>, vector<1x16x48xf32>
    %104 = vector.shape_cast %103 : vector<1x16x48xf32> to vector<16x48xf32>
    %105 = vector.shape_cast %102 : vector<16x48xf32> to vector<1x16x48xf32>
    tpu.vector_store %arg5[%c0_72, %c0_73, %c528], %105 {strides = array<i32>} : memref<1x16x768xf32, #tpu.memory_space<vmem>>, vector<1x16x48xf32>,
    %106 = vector.extract_strided_slice %45 {offsets = [0, 12, 0], sizes = [16, 1, 48], strides = [1, 1, 1]} : vector<16x16x48xf32> to vector<16x1x48xf32>
    %107 = vector.shape_cast %106 : vector<16x1x48xf32> to vector<16x48xf32>
    %c0_74 = arith.constant 0 : index
    %c0_75 = arith.constant 0 : index
    %c576 = arith.constant 576 : index
    %108 = vector.load %arg5[%c0_74, %c0_75, %c576] : memref<1x16x768xf32, #tpu.memory_space<vmem>>, vector<1x16x48xf32>
    %109 = vector.shape_cast %108 : vector<1x16x48xf32> to vector<16x48xf32>
    %110 = vector.shape_cast %107 : vector<16x48xf32> to vector<1x16x48xf32>
    tpu.vector_store %arg5[%c0_74, %c0_75, %c576], %110 {strides = array<i32>} : memref<1x16x768xf32, #tpu.memory_space<vmem>>, vector<1x16x48xf32>,
    %111 = vector.extract_strided_slice %45 {offsets = [0, 13, 0], sizes = [16, 1, 48], strides = [1, 1, 1]} : vector<16x16x48xf32> to vector<16x1x48xf32>
    %112 = vector.shape_cast %111 : vector<16x1x48xf32> to vector<16x48xf32>
    %c0_76 = arith.constant 0 : index
    %c0_77 = arith.constant 0 : index
    %c624 = arith.constant 624 : index
    %113 = vector.load %arg5[%c0_76, %c0_77, %c624] : memref<1x16x768xf32, #tpu.memory_space<vmem>>, vector<1x16x48xf32>
    %114 = vector.shape_cast %113 : vector<1x16x48xf32> to vector<16x48xf32>
    %115 = vector.shape_cast %112 : vector<16x48xf32> to vector<1x16x48xf32>
    tpu.vector_store %arg5[%c0_76, %c0_77, %c624], %115 {strides = array<i32>} : memref<1x16x768xf32, #tpu.memory_space<vmem>>, vector<1x16x48xf32>,
    %116 = vector.extract_strided_slice %45 {offsets = [0, 14, 0], sizes = [16, 1, 48], strides = [1, 1, 1]} : vector<16x16x48xf32> to vector<16x1x48xf32>
    %117 = vector.shape_cast %116 : vector<16x1x48xf32> to vector<16x48xf32>
    %c0_78 = arith.constant 0 : index
    %c0_79 = arith.constant 0 : index
    %c672 = arith.constant 672 : index
    %118 = vector.load %arg5[%c0_78, %c0_79, %c672] : memref<1x16x768xf32, #tpu.memory_space<vmem>>, vector<1x16x48xf32>
    %119 = vector.shape_cast %118 : vector<1x16x48xf32> to vector<16x48xf32>
    %120 = vector.shape_cast %117 : vector<16x48xf32> to vector<1x16x48xf32>
    tpu.vector_store %arg5[%c0_78, %c0_79, %c672], %120 {strides = array<i32>} : memref<1x16x768xf32, #tpu.memory_space<vmem>>, vector<1x16x48xf32>,
    %121 = vector.extract_strided_slice %45 {offsets = [0, 15, 0], sizes = [16, 1, 48], strides = [1, 1, 1]} : vector<16x16x48xf32> to vector<16x1x48xf32>
    %122 = vector.shape_cast %121 : vector<16x1x48xf32> to vector<16x48xf32>
    %c0_80 = arith.constant 0 : index
    %c0_81 = arith.constant 0 : index
    %c720 = arith.constant 720 : index
    %123 = vector.load %arg5[%c0_80, %c0_81, %c720] : memref<1x16x768xf32, #tpu.memory_space<vmem>>, vector<1x16x48xf32>
    %124 = vector.shape_cast %123 : vector<1x16x48xf32> to vector<16x48xf32>
    %125 = vector.shape_cast %122 : vector<16x48xf32> to vector<1x16x48xf32>
    tpu.vector_store %arg5[%c0_80, %c0_81, %c720], %125 {strides = array<i32>} : memref<1x16x768xf32, #tpu.memory_space<vmem>>, vector<1x16x48xf32>,
    return
  }
  func.func @transform_0(%arg0: i32, %arg1: i32) -> (i32, i32, i32, i32) {
    %c0_i32 = arith.constant 0 : i32
    %c0_i32_0 = arith.constant 0 : i32
    %c0_i32_1 = arith.constant 0 : i32
    %c0_i32_2 = arith.constant 0 : i32
    return %arg0, %c0_i32, %c0_i32_0, %c0_i32_1 : i32, i32, i32, i32
  }
  func.func @transform_1(%arg0: i32, %arg1: i32) -> (i32, i32, i32) {
    %c0_i32 = arith.constant 0 : i32
    %c0_i32_0 = arith.constant 0 : i32
    %c0_i32_1 = arith.constant 0 : i32
    %c0_i32_2 = arith.constant 0 : i32
    return %c0_i32, %c0_i32_0, %c0_i32_1 : i32, i32, i32
  }
  func.func @transform_2(%arg0: i32, %arg1: i32) -> (i32, i32) {
    %c0_i32 = arith.constant 0 : i32
    %c0_i32_0 = arith.constant 0 : i32
    %c0_i32_1 = arith.constant 0 : i32
    return %c0_i32, %c0_i32_0 : i32, i32
  }
  func.func @transform_3(%arg0: i32, %arg1: i32) -> (i32, i32, i32) {
    %c0_i32 = arith.constant 0 : i32
    %c0_i32_0 = arith.constant 0 : i32
    return %arg0, %arg1, %c0_i32 : i32, i32, i32
  }
}

</mosaic_0001>

<bundles_post_ra>
// kernel: input_proj_forward.1
= control target key start
LH: loop header
LB: loop body
LE: loop exit
PB: predicated region body
PF: predicated region fallthrough
CT: control target
= control target key end

     0   :  { %s4580_s12 = smov 0   ;;  %s4582_s13 = smov 0   ;;  %s6690_s0 = inlined_call_operand.vmem [shape: bf16[2,18,18,34], index: 0, kind: input, shape index: {}]   ;;  %s6691_s1 = inlined_call_operand.vmem [shape: bf16[3,102,48], index: 1, kind: input, shape index: {}]   ;;  %s6692_s2 = inlined_call_operand.vmem [shape: f32[1,48], index: 2, kind: input, shape index: {}]   ;;  %s6693_s3 = inlined_call_operand.vmem [shape: f32[2,16,768], index: 3, kind: output, shape index: {}]  }
   0x1   :  { %s4584_s14 = smov 0  }
   0x2 LB: > { %s25_s15 = sadd.s32 1, %s4545_s13  ;;  %p3658_p0 = scmp.ge.s32.totalorder %s4549_s14, 1  ;;  %s4549_s14 = sphi %s4584_s14, %s13_s14   ;;  %s4545_s13 = sphi %s4582_s13, %s6734_s13   ;;  %s4541_s12 = sphi %s4580_s12, %s6733_s12  }
   0x3   : > { %p27_p1 = scmp.ge.s32.totalorder %s25_s15, 2  ;;  %p151_p2 = scmp.lt.s32.totalorder %s4549_s14, 3 }
   0x5   : > { %s6736_s15 = smov (%p27_p1, %s25_s15), 0  ;;  %p152_p3 = pnand %p3658_p0, %p151_p2 }
   0x7   : > { %155 = sbr.rel (%p152_p3) target bundleno = 723 (0x2d3), region = 32 }
   0xe   : > { %p180_p4 = scmp.lt.s32.totalorder %s4541_s12, 1  ;;  %v4434_v0 = vld [vmem:[%s6691_s1 + $0x34] sm:$0xff]   ;;  %vm662_vm0 = vcmask 1046528   ;;  %v4435_v1 = vld [vmem:[%s6691_s1] sm:$0xff]   ;;  %v4440_v3 = vld [vmem:[%s6691_s1 + $0x8] sm:$0xff]   ;;  %s4551_s7 = smov 68  }
   0xf   : > { %4100 = vmatprep.subr.bf16.mxu1 %v4434_v0  ;;  %v4439_v2 = vld [vmem:[%s6691_s1 + $0x3c] sm:$0xff]   ;;  %4146 = vmatprep.subr.bf16.mxu0 %v4435_v1  ;;  %v4443_v4 = vld [vmem:[%s6691_s1 + $0x44] sm:$0xff]   ;;  %v4444_v5 = vld [vmem:[%s6691_s1 + $0x10] sm:$0xff]   ;;  %vm389_vm1 = vsmask.f32 7424  ;;  %s4552_s18 = smov 34  }
  0x10   : > { %s6738_s12 = smov (!%p180_p4, %s4541_s12), 1  ;;  %4101 = vmatpush3.bf16.msra.mxu1 %v4434_v0  ;;  %4147 = vmatpush3.bf16.msra.mxu0 %v4435_v1  ;;  %v4449_v11 = vld [vmem:[%s6691_s1 + $0x4c] sm:$0xff]   ;;  %v4450_v42 = vld [vmem:[%s6691_s1 + $0x18] sm:$0xff]   ;;  %v4455_v59 = vld [vmem:[%s6691_s1 + $0x20] sm:$0xff]   ;;  %vm1517_vm2 = vcmask 1042432   ;;  %vm743_vm3 = vcmask 277504  }
  0x11   : > { %s4320_s22 = smul.u32 216, %s6738_s12  ;;  %4102 = vmatprep.subr.bf16.mxu1 %v4439_v2  ;;  %4148 = vmatprep.subr.bf16.mxu0 %v4440_v3  ;;  %v4454_v53 = vld [vmem:[%s6691_s1 + $0x54] sm:$0xff]   ;;  %vm776_vm4 = vcmask 556032   ;;  %vm1484_vm5 = vcmask 834560   ;;  %vm2959_vm8 = vcmask 1041409   ;;  %vm2962_vm14 = vcmask 1042434  }
  0x12   : > { %s4554_s8 = smov 96   ;;  %s4555_s9 = smov 16  }
  0x13   : > { %s4619_s29 = scalar_lea.vmem %s6690_s0, %s4320_s22  ;;  %s4556_s10 = smov 112  }
  0x14   : > { %v200_v6 = vld [vmem:[%s4619_s29 + $0x10] sm:$0xf]  ;;  %v246_v7 = vld [vmem:[%s4619_s29 + $0xc] sm:$0xe]  ;;  %4103 = vmatpush3.bf16.msra.mxu1 %v4439_v2  ;;  %4149 = vmatpush3.bf16.msra.mxu0 %v4440_v3  ;;  %v198_v12 = vld [vmem:[%s4619_s29 + $0x4] sm:$0xf] }
  0x15   : > { %v4627_v8 = vld [vmem:[%s4619_s29 + $0x14] ss:$0 sps:$4 sm:$0x11]   ;;  %v3694_v9 = vcombine.low %v246_v7, %v200_v6  ;;  %v199_v10 = vld [vmem:[%s4619_s29 + $0xc] sm:$0xf]  ;;  %4104 = vmatprep.subr.bf16.mxu1 %v4443_v4  ;;  %4150 = vmatprep.subr.bf16.mxu0 %v4444_v5  ;;  %s4557_s11 = smov 48  }
  0x16   : > { %v245_v13 = vld [vmem:[%s4619_s29] sm:$0xe]  ;;  %v667_v15 = vrot.slane %v4627_v8, 1  ;;  %v4358_v16 = vld [vmem:[%s4619_s29 + $0x8] ss:$0 sps:$4 sm:$0x11]   ;;  %v4646_v27 = vcombine.low %v199_v10, %v200_v6 }
  0x17   : > { %v666_v14 = vrot.slane %v3694_v9, 1  ;;  %v3693_v17 = vcombine.low %v245_v13, %v198_v12  ;;  %v410_v18 = vshll.u32 %v4627_v8, 16  ;;  %v197_v19 = vld [vmem:[%s4619_s29] sm:$0xf]  ;;  %v3709_v20 = vld [vmem:[%s4619_s29 + $0xc] sm:$0xf] }
  0x18   : > { %v3710_v21 = vld [vmem:[%s4619_s29 + $0x10] sm:$0xf]  ;;  %4105 = vmatpush3.bf16.msra.mxu1 %v4443_v4  ;;  %v664_v24 = vrot.slane %v4358_v16, 1  ;;  %v4642_v25 = vcombine.low %v197_v19, %v198_v12  ;;  %v3757_v26 = vld [vmem:[%s4619_s29 + $0xc] sm:$0xe]  ;;  %4151 = vmatpush3.bf16.msra.mxu0 %v4444_v5  ;;  %v398_v31 = vshll.u32 %v4358_v16, 16 }
  0x19   : > { %v668_v22 = vsel %vm662_vm0, %v666_v14, %v667_v15  ;;  %v663_v23 = vrot.slane %v3693_v17, 1  ;;  %4106 = vmatprep.subr.bf16.mxu1 %v4449_v11  ;;  %v4648_v28 = vcombine.low %v3709_v20, %v3710_v21  ;;  %v4362_v29 = vld [vmem:[%s4619_s29 + $0x14] ss:$0 sps:$4 sm:$0x11]   ;;  %v3805_v30 = vcombine.low %v3757_v26, %v3710_v21  ;;  %v3711_v32 = vld [vmem:[%s4619_s29 + $0x18] sm:$0xf]  ;;  %4152 = vmatprep.subr.bf16.mxu0 %v4450_v42 }
  0x1a   : > { %713 = vrot.lane.b32.xlu0 %v668_v22, %s4551_s7  ;;  %v391_v34 = vshrl.u32 %v4642_v25, 16  ;;  %v393_v35 = vshll.u32 %v4642_v25, 16  ;;  %v3712_v36 = vld [vmem:[%s4619_s29 + $0x1c] sm:$0xf]  ;;  %v1288_v38 = vrot.slane %v4362_v29, 1  ;;  %v400_v39 = vrot.slane %v398_v31, 1 }
  0x1b   : > { %v665_v33 = vsel %vm662_vm0, %v663_v23, %v664_v24  ;;  %v1287_v37 = vrot.slane %v3805_v30, 1  ;;  %v3758_v40 = vld [vmem:[%s4619_s29 + $0x18] sm:$0xe]  ;;  %v4658_v41 = vcombine.low %v3711_v32, %v3712_v36  ;;  %v4365_v44 = vld [vmem:[%s4619_s29 + $0x20] ss:$0 sps:$4 sm:$0x11]  }
  0x1c   : > { %711 = vrot.lane.b32.xlu1 %v665_v33, %s4551_s7  ;;  %4107 = vmatpush3.bf16.msra.mxu1 %v4449_v11  ;;  %v395_v43 = vrot.slane %v393_v35, 1  ;;  %v3806_v45 = vcombine.low %v3758_v40, %v3712_v36  ;;  %v1016_v46 = vshrl.u32 %v4648_v28, 16  ;;  %v1018_v47 = vshll.u32 %v4648_v28, 16  ;;  %v3713_v52 = vld [vmem:[%s4619_s29 + $0x24] sm:$0xf]  ;;  %v4459_v10 = vld [vmem:[%s6691_s1 + $0x5c] sm:$0xff]  }
  0x1d   : > { %v1289_v48 = vsel %vm662_vm0, %v1287_v37, %v1288_v38  ;;  %v1023_v49 = vshll.u32 %v4362_v29, 16  ;;  %v403_v50 = vshrl.u32 %v4646_v27, 16  ;;  %v405_v51 = vshll.u32 %v4646_v27, 16  ;;  %v4674_v58 = vld [vmem:[%s4619_s29 + $0x28] sm:$0xf]  ;;  %4153 = vmatpush3.bf16.msra.mxu0 %v4450_v42  ;;  %4108 = vmatprep.subr.bf16.mxu1 %v4454_v53  ;;  %s4558_s16 = smov 64  }
  0x1e   : > { %v396_v54 = vor.u32 %v395_v43, %v391_v34  ;;  %v1290_v55 = vrot.slane %v3806_v45, 1  ;;  %v1291_v56 = vrot.slane %v4365_v44, 1  ;;  %v1020_v57 = vrot.slane %v1018_v47, 1  ;;  %v4685_v4 = vld [vmem:[%s4619_s29 + $0x2c] ss:$0 sps:$4 sm:$0x11]   ;;  %4154 = vmatprep.subr.bf16.mxu0 %v4455_v59 }
  0x1f   : > { %v1025_v60 = vrot.slane %v1023_v49, 1  ;;  %v407_v61 = vrot.slane %v405_v51, 1  ;;  %v412_v62 = vrot.slane %v410_v18, 1  ;;  %v1028_v63 = vshrl.u32 %v4658_v41, 16  ;;  %v201_v5 = vld [vmem:[%s4619_s29 + $0x18] sm:$0xf] }
  0x20   : > { %1335 = vrot.lane.b32.xlu1 %v1289_v48, %s4551_s7  ;;  %v401_v0 = vsel %vm389_vm1, %v396_v54, %v400_v39  ;;  %v1292_v1 = vsel %vm662_vm0, %v1290_v55, %v1291_v56  ;;  %v1021_v2 = vor.u32 %v1020_v57, %v1016_v46  ;;  %v1030_v3 = vshll.u32 %v4658_v41, 16  ;;  %4109 = vmatpush3.bf16.msra.mxu1 %v4454_v53  ;;  %v202_v9 = vld [vmem:[%s4619_s29 + $0x1c] sm:$0xf]  ;;  %v4370_v15 = vld [vmem:[%s4619_s29 + $0x20] ss:$0 sps:$4 sm:$0x11]  }
  0x21   : > { %582 = vrot.lane.b32.xlu0 %v401_v0, %s4552_s18  ;;  %v408_v6 = vor.u32 %v407_v61, %v403_v50  ;;  %v1035_v7 = vshll.u32 %v4365_v44, 16  ;;  %v4690_v8 = vcombine.low %v3713_v52, %v4674_v58  ;;  %v1047_v13 = vshll.u32 %v4685_v4, 16  ;;  %4155 = vmatpush3.bf16.msra.mxu0 %v4455_v59  ;;  %v4460_v16 = vld [vmem:[%s6691_s1 + $0x28] sm:$0xff]   ;;  %v247_v20 = vld [vmem:[%s4619_s29 + $0x18] sm:$0xe]  ;;  %s4559_s17 = smov 80  }
  0x22   : > { %v1026_v11 = vsel %vm389_vm1, %v1021_v2, %v1025_v60  ;;  %v1032_v12 = vrot.slane %v1030_v3, 1  ;;  %v4698_v14 = vcombine.low %v201_v5, %v202_v9  ;;  %4110 = vmatprep.subr.bf16.mxu1 %v4459_v10  ;;  %v203_v26 = vld [vmem:[%s4619_s29 + $0x24] sm:$0xf]  ;;  %4156 = vmatprep.subr.bf16.mxu0 %v4460_v16  ;;  %v422_v31 = vshll.u32 %v4370_v15, 16  ;;  %v204_v33 = vld [vmem:[%s4619_s29 + $0x28] sm:$0xf] }
  0x23   : > { %v1037_v17 = vrot.slane %v1035_v7, 1  ;;  %v1040_v18 = vshrl.u32 %v4690_v8, 16  ;;  %v1042_v19 = vshll.u32 %v4690_v8, 16  ;;  %v413_v21 = vsel %vm389_vm1, %v408_v6, %v412_v62  ;;  %v4718_v37 = vld [vmem:[%s4619_s29 + $0x2c] ss:$0 sps:$4 sm:$0x11]  }
  0x24   : > { %1337 = vrot.lane.b32.xlu1 %v1292_v1, %s4551_s7  ;;  %v1033_v22 = vor.u32 %v1032_v12, %v1028_v63  ;;  %v415_v23 = vshrl.u32 %v4698_v14, 16  ;;  %v417_v24 = vshll.u32 %v4698_v14, 16  ;;  %4111 = vmatpush3.bf16.msra.mxu1 %v4459_v10  ;;  %v1049_v30 = vrot.slane %v1047_v13, 1  ;;  %v3759_v43 = vld [vmem:[%s4619_s29 + $0x24] sm:$0xe]  ;;  %s4321_s21 = smul.u32 96, %s6738_s12 }
  0x25   : > { %1207 = vrot.lane.b32.xlu0 %v1026_v11, %s4552_s18  ;;  %v1044_v29 = vrot.slane %v1042_v19, 1  ;;  %v3695_v32 = vcombine.low %v247_v20, %v202_v9  ;;  %v4715_v36 = vcombine.low %v203_v26, %v204_v33  ;;  %4157 = vmatpush3.bf16.msra.mxu0 %v4460_v16  ;;  %v424_v39 = vrot.slane %v422_v31, 1  ;;  %v3715_v48 = vld [vmem:[%s4619_s29 + $0x30] sm:$0xf]  ;;  %v3716_v51 = vld [vmem:[%s4619_s29 + $0x34] sm:$0xf] }
  0x26   : > { %v1038_v34 = vsel %vm389_vm1, %v1033_v22, %v1037_v17  ;;  %v419_v35 = vrot.slane %v417_v24, 1  ;;  %v670_v42 = vrot.slane %v4370_v15, 1  ;;  %v434_v47 = vshll.u32 %v4718_v37, 16  ;;  %v3760_v52 = vld [vmem:[%s4619_s29 + $0x30] sm:$0xe]  ;;  %s6550_s23 = scalar_lea.vmem %s6693_s3, %s4321_s21 }
  0x27   : > { %v1045_v38 = vor.u32 %v1044_v29, %v1040_v18  ;;  %v669_v40 = vrot.slane %v3695_v32, 1  ;;  %v427_v45 = vshrl.u32 %v4715_v36, 16  ;;  %v429_v46 = vshll.u32 %v4715_v36, 16  ;;  %v4376_v57 = vld [vmem:[%s4619_s29 + $0x38] ss:$0 sps:$4 sm:$0x11]  }
  0x28   : > { %584 = vrot.lane.b32.xlu1 %v413_v21, %s4552_s18  ;;  %v420_v44 = vor.u32 %v419_v35, %v415_v23  ;;  %v3807_v50 = vcombine.low %v3759_v43, %v4674_v58  ;;  %v436_v55 = vrot.slane %v434_v47, 1  ;;  %v4732_v56 = vcombine.low %v3715_v48, %v3716_v51  ;;  %v248_v58 = vld [vmem:[%s4619_s29 + $0x24] sm:$0xe]  ;;  %v3717_v63 = vld [vmem:[%s4619_s29 + $0x3c] sm:$0xf] }
  0x29   : > { %1209 = vrot.lane.b32.xlu0 %v1038_v34, %s4552_s18  ;;  %v1050_v49 = vsel %vm389_vm1, %v1045_v38, %v1049_v30  ;;  %v431_v54 = vrot.slane %v429_v46, 1  ;;  %v671_v59 = vsel %vm662_vm0, %v669_v40, %v670_v42  ;;  %v1294_v61 = vrot.slane %v4685_v4, 1  ;;  %v3718_v5 = vld [vmem:[%s4619_s29 + $0x40] sm:$0xf]  ;;  %v205_v4 = vld [vmem:[%s4619_s29 + $0x30] sm:$0xf] }
  0x2a   : > { %v425_v53 = vsel %vm389_vm1, %v420_v44, %v424_v39  ;;  %v1293_v60 = vrot.slane %v3807_v50, 1  ;;  %v3808_v62 = vcombine.low %v3760_v52, %v3716_v51  ;;  %v1052_v1 = vshrl.u32 %v4732_v56, 16  ;;  %v4750_v15 = vld [vmem:[%s4619_s29 + $0x44] ss:$0 sps:$4 sm:$0x11]  }
  0x2b   : > { %v432_v0 = vor.u32 %v431_v54, %v427_v45  ;;  %v1054_v2 = vshll.u32 %v4732_v56, 16  ;;  %v1059_v3 = vshll.u32 %v4376_v57, 16  ;;  %v3696_v7 = vcombine.low %v248_v58, %v204_v33  ;;  %v206_v19 = vld [vmem:[%s4619_s29 + $0x34] sm:$0xf]  ;;  %v249_v29 = vld [vmem:[%s4619_s29 + $0x30] sm:$0xe] }
  0x2c   : > { %1211 = vrot.lane.b32.xlu1 %v1050_v49, %s4552_s18  ;;  %v1296_v6 = vrot.slane %v3808_v62, 1  ;;  %v673_v9 = vrot.slane %v4718_v37, 1  ;;  %v4747_v13 = vcombine.low %v3717_v63, %v3718_v5  ;;  %v1295_v16 = vsel %vm662_vm0, %v1293_v60, %v1294_v61  ;;  %v4382_v24 = vld [vmem:[%s4619_s29 + $0x38] ss:$0 sps:$4 sm:$0x11]  }
  0x2d   : > { %586 = vrot.lane.b32.xlu0 %v425_v53, %s4552_s18  ;;  %v437_v10 = vsel %vm389_vm1, %v432_v0, %v436_v55  ;;  %v1056_v11 = vrot.slane %v1054_v2, 1  ;;  %v1061_v12 = vrot.slane %v1059_v3, 1  ;;  %v1297_v17 = vrot.slane %v4376_v57, 1  ;;  %v207_v30 = vld [vmem:[%s4619_s29 + $0x3c] sm:$0xf] }
  0x2e   : > { %v672_v18 = vrot.slane %v3696_v7, 1  ;;  %v1064_v21 = vshrl.u32 %v4747_v13, 16  ;;  %v1066_v22 = vshll.u32 %v4747_v13, 16  ;;  %v1071_v23 = vshll.u32 %v4750_v15, 16  ;;  %v4765_v31 = vld [vmem:[%s4619_s29 + $0x40] sm:$0xf] }
  0x2f   : > { %v1057_v20 = vor.u32 %v1056_v11, %v1052_v1  ;;  %v4760_v26 = vcombine.low %v205_v4, %v206_v19  ;;  %v446_v34 = vshll.u32 %v4382_v24, 16  ;;  %v3697_v38 = vcombine.low %v249_v29, %v206_v19  ;;  %v4772_v39 = vld [vmem:[%s4619_s29 + $0x44] ss:$0 sps:$4 sm:$0x11]   ;;  %v3761_v45 = vld [vmem:[%s4619_s29 + $0x3c] sm:$0xe] }
  0x30   : > { %715 = vrot.lane.b32.xlu1 %v671_v59, %s4551_s7  ;;  %v1068_v33 = vrot.slane %v1066_v22, 1  ;;  %v1298_v40 = vsel %vm662_vm0, %v1296_v6, %v1297_v17  ;;  %v1073_v43 = vrot.slane %v1071_v23, 1  ;;  %v4776_v44 = vcombine.low %v207_v30, %v4765_v31  ;;  %v3719_v46 = vld [vmem:[%s4619_s29 + $0x48] sm:$0xf]  ;;  %v3720_v51 = vld [vmem:[%s4619_s29 + $0x4c] sm:$0xf] }
  0x31   : > { %588 = vrot.lane.b32.xlu0 %v437_v10, %s4552_s18  ;;  %v1062_v32 = vsel %vm389_vm1, %v1057_v20, %v1061_v12  ;;  %v439_v35 = vshrl.u32 %v4760_v26, 16  ;;  %v441_v37 = vshll.u32 %v4760_v26, 16  ;;  %v674_v47 = vsel %vm662_vm0, %v672_v18, %v673_v9  ;;  %v4388_v62 = vld [vmem:[%s4619_s29 + $0x50] ss:$0 sps:$4 sm:$0x11]  }
  0x32   : > { %v1069_v42 = vor.u32 %v1068_v33, %v1064_v21  ;;  %v458_v49 = vshll.u32 %v4772_v39, 16  ;;  %v3809_v50 = vcombine.low %v3761_v45, %v3718_v5  ;;  %v448_v52 = vrot.slane %v446_v34, 1  ;;  %v3762_v2 = vld [vmem:[%s4619_s29 + $0x48] sm:$0xe]  ;;  %v3721_v6 = vld [vmem:[%s4619_s29 + $0x54] sm:$0xf] }
  0x33   : > { %v443_v48 = vrot.slane %v441_v37, 1  ;;  %v451_v53 = vshrl.u32 %v4776_v44, 16  ;;  %v453_v54 = vshll.u32 %v4776_v44, 16  ;;  %v4786_v55 = vcombine.low %v3719_v46, %v3720_v51  ;;  %v4798_v7 = vld [vmem:[%s4619_s29 + $0x58] sm:$0xf] }
  0x34   : > { %1339 = vrot.lane.b32.xlu1 %v1295_v16, %s4551_s7  ;;  %v675_v59 = vrot.slane %v3697_v38, 1  ;;  %v676_v60 = vrot.slane %v4382_v24, 1  ;;  %v1300_v61 = vrot.slane %v4750_v15, 1  ;;  %v1074_v58 = vsel %vm389_vm1, %v1069_v42, %v1073_v43  ;;  %v209_v12 = vld [vmem:[%s4619_s29 + $0x48] sm:$0xf] }
  0x35   : > { %1213 = vrot.lane.b32.xlu0 %v1062_v32, %s4552_s18  ;;  %v444_v57 = vor.u32 %v443_v48, %v439_v35  ;;  %v455_v63 = vrot.slane %v453_v54, 1  ;;  %v460_v0 = vrot.slane %v458_v49, 1  ;;  %v1078_v1 = vshll.u32 %v4786_v55, 16  ;;  %v250_v16 = vld [vmem:[%s4619_s29 + $0x3c] sm:$0xe] }
  0x36   : > { %v1299_v3 = vrot.slane %v3809_v50, 1  ;;  %v1076_v5 = vshrl.u32 %v4786_v55, 16  ;;  %v1083_v11 = vshll.u32 %v4388_v62, 16  ;;  %v3810_v15 = vcombine.low %v3762_v2, %v3720_v51  ;;  %v4808_v18 = vld [vmem:[%s4619_s29 + $0x5c] ss:$0 sps:$4 sm:$0x11]  }
  0x37   : > { %v449_v9 = vsel %vm389_vm1, %v444_v57, %v448_v52  ;;  %v456_v4 = vor.u32 %v455_v63, %v451_v53  ;;  %v1080_v10 = vrot.slane %v1078_v1, 1  ;;  %v4805_v17 = vcombine.low %v3721_v6, %v4798_v7  ;;  %v210_v20 = vld [vmem:[%s4619_s29 + $0x4c] sm:$0xf]  ;;  %v4818_v29 = vld [vmem:[%s4619_s29 + $0x50] ss:$0 sps:$4 sm:$0x11]  }
  0x38   : > { %1341 = vrot.lane.b32.xlu1 %v1298_v40, %s4551_s7  ;;  %v677_v19 = vsel %vm662_vm0, %v675_v59, %v676_v60  ;;  %v1301_v21 = vsel %vm662_vm0, %v1299_v3, %v1300_v61  ;;  %v1303_v22 = vrot.slane %v4388_v62, 1  ;;  %v4815_v24 = vcombine.low %v209_v12, %v210_v20  ;;  %v211_v35 = vld [vmem:[%s4619_s29 + $0x54] sm:$0xf]  ;;  %v4824_v37 = vld [vmem:[%s4619_s29 + $0x58] sm:$0xf] }
  0x39   : > { %717 = vrot.lane.b32.xlu0 %v674_v47, %s4551_s7  ;;  %v1090_v23 = vshll.u32 %v4805_v17, 16  ;;  %v461_v30 = vsel %vm389_vm1, %v456_v4, %v460_v0  ;;  %v1081_v32 = vor.u32 %v1080_v10, %v1076_v5  ;;  %v1085_v33 = vrot.slane %v1083_v11, 1  ;;  %v4838_v50 = vld [vmem:[%s4619_s29 + $0x5c] ss:$0 sps:$4 sm:$0x11]  }
  0x3a   : > { %v3698_v34 = vcombine.low %v250_v16, %v4765_v31  ;;  %v1302_v38 = vrot.slane %v3810_v15, 1  ;;  %v1088_v40 = vshrl.u32 %v4805_v17, 16  ;;  %v1095_v42 = vshll.u32 %v4808_v18, 16  ;;  %v251_v31 = vld [vmem:[%s4619_s29 + $0x48] sm:$0xe] }
  0x3b   : > { %v465_v43 = vshll.u32 %v4815_v24, 16  ;;  %v1092_v45 = vrot.slane %v1090_v23, 1  ;;  %v463_v46 = vshrl.u32 %v4815_v24, 16  ;;  %v470_v47 = vshll.u32 %v4818_v29, 16  ;;  %v3723_v51 = vld [vmem:[%s4619_s29 + $0x60] sm:$0xf] }
  0x3c   : > { %1215 = vrot.lane.b32.xlu1 %v1074_v58, %s4552_s18  ;;  %v4834_v48 = vcombine.low %v211_v35, %v4824_v37  ;;  %v1086_v52 = vsel %vm389_vm1, %v1081_v32, %v1085_v33  ;;  %v678_v53 = vrot.slane %v3698_v34, 1  ;;  %v679_v54 = vrot.slane %v4772_v39, 1  ;;  %v3724_v59 = vld [vmem:[%s4619_s29 + $0x64] sm:$0xf]  ;;  %v3763_v1 = vld [vmem:[%s4619_s29 + $0x54] sm:$0xe] }
  0x3d   : > { %590 = vrot.lane.b32.xlu0 %v449_v9, %s4552_s18  ;;  %v467_v49 = vrot.slane %v465_v43, 1  ;;  %v1304_v60 = vsel %vm662_vm0, %v1302_v38, %v1303_v22  ;;  %v1097_v61 = vrot.slane %v1095_v42, 1  ;;  %v3699_v62 = vcombine.low %v251_v31, %v210_v20  ;;  %v4854_v5 = vld [vmem:[%s4619_s29 + $0x68] ss:$0 sps:$4 sm:$0x11]  }
  0x3e   : > { %v477_v57 = vshll.u32 %v4834_v48, 16  ;;  %v1093_v58 = vor.u32 %v1092_v45, %v1088_v40  ;;  %v472_v63 = vrot.slane %v470_v47, 1  ;;  %v475_v0 = vshrl.u32 %v4834_v48, 16  ;;  %v3880_v6 = vld [vmem:[%s4619_s29 + $0x18] sm:$0xf] }
  0x3f   : > { %v4849_v2 = vcombine.low %v3723_v51, %v3724_v59  ;;  %v468_v39 = vor.u32 %v467_v49, %v463_v46  ;;  %v482_v3 = vshll.u32 %v4838_v50, 16  ;;  %v680_v9 = vsel %vm662_vm0, %v678_v53, %v679_v54  ;;  %v4860_v11 = vld [vmem:[%s4619_s29 + $0x1c] sm:$0xf]  ;;  %v3764_v16 = vld [vmem:[%s4619_s29 + $0x60] sm:$0xe] }
  0x40   : > { %719 = vrot.lane.b32.xlu1 %v677_v19, %s4551_s7  ;;  %v479_v4 = vrot.slane %v477_v57, 1  ;;  %v682_v12 = vrot.slane %v4818_v29, 1  ;;  %v3811_v15 = vcombine.low %v3763_v1, %v4798_v7  ;;  %v1098_v19 = vsel %vm389_vm1, %v1093_v58, %v1097_v61  ;;  %v3725_v23 = vld [vmem:[%s4619_s29 + $0x6c] sm:$0xf]  ;;  %v252_v33 = vld [vmem:[%s4619_s29 + $0x54] sm:$0xe] }
  0x41   : > { %592 = vrot.lane.b32.xlu0 %v461_v30, %s4552_s18  ;;  %v1102_v10 = vshll.u32 %v4849_v2, 16  ;;  %v681_v20 = vrot.slane %v3699_v62, 1  ;;  %v4869_v22 = vcombine.low %v3880_v6, %v4860_v11  ;;  %v4873_v30 = vld [vmem:[%s4619_s29 + $0x70] sm:$0xf]  ;;  %v473_v29 = vsel %vm389_vm1, %v468_v39, %v472_v63  ;;  %v3727_v46 = vld [vmem:[%s4619_s29 + $0x78] sm:$0xf] }
  0x42   : > { %v484_v7 = vrot.slane %v482_v3, 1  ;;  %v1107_v32 = vshll.u32 %v4854_v5, 16  ;;  %v4880_v34 = vcombine.low %v3725_v23, %v4873_v30  ;;  %v1100_v35 = vshrl.u32 %v4849_v2, 16  ;;  %v4884_v42 = vld [vmem:[%s4619_s29 + $0x20] ss:$0 sps:$4 sm:$0x11]  }
  0x43   : > { %v1104_v38 = vrot.slane %v1102_v10, 1  ;;  %v3812_v40 = vcombine.low %v3764_v16, %v3724_v59  ;;  %v1305_v43 = vrot.slane %v3811_v15, 1  ;;  %v4888_v45 = vld [vmem:[%s4619_s29 + $0x74] ss:$0 sps:$4 sm:$0x11]   ;;  %v683_v47 = vsel %vm662_vm0, %v681_v20, %v682_v12 }
  0x44   : > { %1343 = vrot.lane.b32.xlu1 %v1301_v21, %s4551_s7  ;;  %v1306_v21 = vrot.slane %v4808_v18, 1  ;;  %v480_v18 = vor.u32 %v479_v4, %v475_v0  ;;  %v2113_v31 = vshll.u32 %v4869_v22, 16  ;;  %v4894_v49 = vld [vmem:[%s4619_s29 + $0x7c] sm:$0xf]  ;;  %v1109_v51 = vrot.slane %v1107_v32, 1 }
  0x45   : > { %1217 = vrot.lane.b32.xlu0 %v1086_v52, %s4552_s18  ;;  %v1309_v52 = vrot.slane %v4854_v5, 1  ;;  %v3700_v53 = vcombine.low %v252_v33, %v4824_v37  ;;  %v1114_v54 = vshll.u32 %v4880_v34, 16  ;;  %v1105_v59 = vor.u32 %v1104_v38, %v1100_v35  ;;  %v3765_v58 = vld [vmem:[%s4619_s29 + $0x6c] sm:$0xe]  ;;  %v3882_v63 = vld [vmem:[%s4619_s29 + $0x24] sm:$0xf] }
  0x46   : > { %v485_v57 = vsel %vm389_vm1, %v480_v18, %v484_v7  ;;  %v4902_v61 = vcombine.low %v3727_v46, %v4894_v49  ;;  %v1307_v62 = vsel %vm662_vm0, %v1305_v43, %v1306_v21  ;;  %v4909_v0 = vld [vmem:[%s4619_s29 + $0x28] sm:$0xf]  ;;  %v2111_v37 = vshrl.u32 %v4869_v22, 16  ;;  %v4918_v4 = vld [vmem:[%s4619_s29 + $0x80] ss:$0 sps:$4 sm:$0x11]  }
  0x47   : > { %v2115_v1 = vrot.slane %v2113_v31, 1  ;;  %v2118_v39 = vshll.u32 %v4884_v42, 16  ;;  %v1119_v3 = vshll.u32 %v4888_v45, 16  ;;  %v685_v5 = vrot.slane %v4838_v50, 1  ;;  %v4930_v7 = vld [vmem:[%s4619_s29 + $0x34] sm:$0xf] }
  0x48   : > { %1345 = vrot.lane.b32.xlu1 %v1304_v60, %s4551_s7  ;;  %v1308_v60 = vrot.slane %v3812_v40, 1  ;;  %v1112_v6 = vshrl.u32 %v4880_v34, 16  ;;  %v1110_v10 = vsel %vm389_vm1, %v1105_v59, %v1109_v51  ;;  %v684_v12 = vrot.slane %v3700_v53, 1  ;;  %v3928_v18 = vld [vmem:[%s4619_s29 + $0x18] sm:$0xe] }
  0x49   : > { %721 = vrot.lane.b32.xlu0 %v680_v9, %s4551_s7  ;;  %v1116_v9 = vrot.slane %v1114_v54, 1  ;;  %v1126_v15 = vshll.u32 %v4902_v61, 16  ;;  %v4923_v16 = vcombine.low %v3882_v63, %v4909_v0  ;;  %v2116_v50 = vor.u32 %v2115_v1, %v2111_v37  ;;  %v4936_v35 = vld [vmem:[%s4619_s29 + $0x2c] ss:$0 sps:$4 sm:$0x11]  }
  0x4a   : > { %v2120_v20 = vrot.slane %v2118_v39, 1  ;;  %v1121_v21 = vrot.slane %v1119_v3, 1  ;;  %v3813_v23 = vcombine.low %v3765_v58, %v4873_v30  ;;  %v1131_v33 = vshll.u32 %v4918_v4, 16  ;;  %v4947_v31 = vld [vmem:[%s4619_s29 + $0x88] sm:$0xf] }
  0x4b   : > { %v1117_v32 = vor.u32 %v1116_v9, %v1112_v6  ;;  %v686_v38 = vsel %vm662_vm0, %v684_v12, %v685_v5  ;;  %v1124_v40 = vshrl.u32 %v4902_v61, 16  ;;  %v1128_v43 = vrot.slane %v1126_v15, 1  ;;  %v3766_v58 = vld [vmem:[%s4619_s29 + $0x78] sm:$0xe] }
  0x4c   : > { %1219 = vrot.lane.b32.xlu1 %v1098_v19, %s4552_s18  ;;  %v1310_v19 = vsel %vm662_vm0, %v1308_v60, %v1309_v52  ;;  %v2125_v30 = vshll.u32 %v4923_v16, 16  ;;  %v2121_v51 = vsel %vm389_vm1, %v2116_v50, %v2120_v20  ;;  %v1311_v52 = vrot.slane %v3813_v23, 1  ;;  %v4969_v6 = vld [vmem:[%s4619_s29 + $0x38] ss:$0 sps:$4 sm:$0x11]  }
  0x4d   : > { %594 = vrot.lane.b32.xlu0 %v473_v29, %s4552_s18  ;;  %v3884_v29 = vld [vmem:[%s4619_s29 + $0x30] sm:$0xf]  ;;  %v1312_v53 = vrot.slane %v4888_v45, 1  ;;  %v3976_v54 = vcombine.low %v3928_v18, %v4860_v11  ;;  %v1122_v59 = vsel %vm389_vm1, %v1117_v32, %v1121_v21  ;;  %v1133_v60 = vrot.slane %v1131_v33, 1  ;;  %v4963_v11 = vld [vmem:[%s4619_s29 + $0x94] sm:$0xf] }
  0x4e   : > { %v4943_v46 = vcombine.low %v3884_v29, %v4930_v7  ;;  %v1129_v63 = vor.u32 %v1128_v43, %v1124_v40  ;;  %v2127_v37 = vrot.slane %v2125_v30, 1  ;;  %v2130_v1 = vshll.u32 %v4936_v35, 16  ;;  %v3731_v45 = vld [vmem:[%s4619_s29 + $0x90] sm:$0xf]  ;;  %v3886_v29 = vld [vmem:[%s4619_s29 + $0x3c] sm:$0xf] }
  0x4f   : > { %v2383_v3 = vrot.slane %v4884_v42, 1  ;;  %v2382_v12 = vrot.slane %v3976_v54, 1  ;;  %v4974_v15 = vld [vmem:[%s4619_s29 + $0x8c] ss:$0 sps:$4 sm:$0x11]   ;;  %v3814_v50 = vcombine.low %v3766_v58, %v4894_v49  ;;  %v4980_v42 = vcombine.low %v3731_v45, %v4963_v11 }
  0x50   : > { %723 = vrot.lane.b32.xlu1 %v683_v47, %s4551_s7  ;;  %v3729_v47 = vld [vmem:[%s4619_s29 + $0x84] sm:$0xf]  ;;  %v2137_v9 = vshll.u32 %v4943_v46, 16  ;;  %v2132_v21 = vrot.slane %v2130_v1, 1  ;;  %v4986_v32 = vld [vmem:[%s4619_s29 + $0x40] sm:$0xf] }
  0x51   : > { %596 = vrot.lane.b32.xlu0 %v485_v57, %s4552_s18  ;;  %v3929_v57 = vld [vmem:[%s4619_s29 + $0x24] sm:$0xe]  ;;  %v4959_v39 = vcombine.low %v3729_v47, %v4947_v31  ;;  %6707 = vst [vmem:[#allocation2_spill] sm:$0xff] %v4980_v42  ;;  %v2135_v18 = vshrl.u32 %v4943_v46, 16  ;;  %v2384_v40 = vsel %vm662_vm0, %v2382_v12, %v2383_v3  ;;  %v1143_v43 = vshll.u32 %v4974_v15, 16 }
  0x52   : > { %v3977_v5 = vcombine.low %v3929_v57, %v4909_v0  ;;  %v1134_v0 = vsel %vm389_vm1, %v1129_v63, %v1133_v60  ;;  %v2139_v49 = vrot.slane %v2137_v9, 1  ;;  %v4995_v30 = vld [vmem:[%s4619_s29 + $0x98] ss:$0 sps:$4 sm:$0x11]   ;;  %v1315_v47 = vrot.slane %v4918_v4, 1 }
  0x53   : > { %v1138_v23 = vshll.u32 %v4959_v39, 16  ;;  %v1314_v57 = vrot.slane %v3814_v50, 1  ;;  %v1145_v1 = vrot.slane %v1143_v43, 1  ;;  %v1148_v45 = vshrl.u32 %v4980_v42, 16  ;;  %v3888_v9 = vld [vmem:[%s4619_s29 + $0x48] sm:$0xf] }
  0x54   : > { %1347 = vrot.lane.b32.xlu1 %v1307_v62, %s4551_s7  ;;  %v2123_v62 = vshrl.u32 %v4923_v16, 16  ;;  %v2385_v33 = vrot.slane %v3977_v5, 1  ;;  %v2140_v4 = vor.u32 %v2139_v49, %v2135_v18  ;;  %v1155_v3 = vshll.u32 %v4995_v30, 16 }
  0x55   : > { %1221 = vrot.lane.b32.xlu0 %v1110_v10, %s4552_s18  ;;  %v1313_v10 = vsel %vm662_vm0, %v1311_v52, %v1312_v53  ;;  %v3930_v52 = vld [vmem:[%s4619_s29 + $0x30] sm:$0xe]  ;;  %v5002_v53 = vcombine.low %v3886_v29, %v4986_v32  ;;  %v1140_v60 = vrot.slane %v1138_v23, 1 }
  0x56   : > { %v2128_v20 = vor.u32 %v2127_v37, %v2123_v62  ;;  %v5010_v37 = vld [vmem:[%s4619_s29 + $0x44] ss:$0 sps:$4 sm:$0x11]   ;;  %v3978_v5 = vcombine.low %v3930_v52, %v4930_v7  ;;  %v1318_v7 = vrot.slane %v4974_v15, 1 }
  0x57   : > { %6708 = vst [vmem:[#allocation3_spill] sm:$0xff] %v5002_v53  ;;  %v2149_v12 = vshll.u32 %v5002_v53, 16  ;;  %v2154_v29 = vshll.u32 %v5010_v37, 16  ;;  %v2147_v15 = vshrl.u32 %v5002_v53, 16  ;;  %v254_v53 = vld [vmem:[%s4619_s29 + $0x6c] sm:$0xe] }
  0x58   : > { %1349 = vrot.lane.b32.xlu1 %v1310_v19, %s4551_s7  ;;  %v2386_v19 = vrot.slane %v4936_v35, 1  ;;  %v2142_v35 = vshll.u32 %v4969_v6, 16  ;;  %v2133_v54 = vsel %vm389_vm1, %v2128_v20, %v2132_v21  ;;  %v3733_v20 = vld [vmem:[%s4619_s29 + $0x9c] sm:$0xf]  ;;  %v3734_v21 = vld [vmem:[%s4619_s29 + $0xa0] sm:$0xf] }
  0x59   : > { %725 = vrot.lane.b32.xlu0 %v686_v38, %s4551_s7  ;;  %v3767_v38 = vld [vmem:[%s4619_s29 + $0x84] sm:$0xe]  ;;  %v2388_v49 = vrot.slane %v3978_v5, 1  ;;  %v2151_v43 = vrot.slane %v2149_v12, 1  ;;  %v1321_v5 = vrot.slane %v4995_v30, 1 }
  0x5a   : > { %v2387_v62 = vsel %vm662_vm0, %v2385_v33, %v2386_v19  ;;  %v2144_v58 = vrot.slane %v2142_v35, 1  ;;  %v3815_v63 = vcombine.low %v3767_v38, %v4947_v31  ;;  %v5019_v19 = vld [vmem:[%s4619_s29 + $0x4c] sm:$0xf]  ;;  %v1316_v31 = vsel %vm662_vm0, %v1314_v57, %v1315_v47  ;;  %v3768_v33 = vld [vmem:[%s4619_s29 + $0x90] sm:$0xe] }
  0x5b   : > { %v2389_v35 = vrot.slane %v4969_v6, 1  ;;  %v5032_v38 = vcombine.low %v3888_v9, %v5019_v19  ;;  %v3816_v57 = vcombine.low %v3768_v33, %v4963_v11  ;;  %v3769_v11 = vld [vmem:[%s4619_s29 + $0x9c] sm:$0xe]  ;;  %v5061_v9 = vld [vmem:[%s4619_s29 + $0xb0] ss:$0 sps:$4 sm:$0x11]  }
  0x5c   : > { %2302 = vrot.lane.b32.xlu1 %v2121_v51, %s4552_s18  ;;  %v1150_v51 = vshll.u32 %v4980_v42, 16  ;;  %v1317_v23 = vrot.slane %v3815_v63, 1  ;;  %v2145_v18 = vsel %vm389_vm1, %v2140_v4, %v2144_v58  ;;  %v3735_v4 = vld [vmem:[%s4619_s29 + $0xa8] sm:$0xf]  ;;  %v5051_v58 = vld [vmem:[%s4619_s29 + $0xac] sm:$0xf]  ;;  %v3817_v30 = vcombine.low %v3769_v11, %v3734_v21 }
  0x5d   : > { %1223 = vrot.lane.b32.xlu0 %v1122_v59, %s4552_s18  ;;  %v1136_v59 = vshrl.u32 %v4959_v39, 16  ;;  %6709 = vst [vmem:[#allocation4_spill] sm:$0xff] %v5032_v38  ;;  %v2161_v63 = vshll.u32 %v5032_v38, 16  ;;  %v1320_v12 = vrot.slane %v3816_v57, 1  ;;  %v5278_v42 = vld [vmem:[%s4619_s29 + $0x94] sm:$0xf] }
  0x5f   : > { %v1141_v50 = vor.u32 %v1140_v60, %v1136_v59  ;;  %v5045_v59 = vld [vmem:[%s4619_s29 + $0xa4] ss:$0 sps:$4 sm:$0x11]   ;;  %v2156_v60 = vrot.slane %v2154_v29, 1  ;;  %v2159_v29 = vshrl.u32 %v5032_v38, 16  ;;  %v2163_v33 = vrot.slane %v2161_v63, 1 }
  0x60   : > { %1351 = vrot.lane.b32.xlu1 %v1313_v10, %s4551_s7  ;;  %v1152_v10 = vrot.slane %v1150_v51, 1  ;;  %v5040_v51 = vcombine.low %v3733_v20, %v3734_v21  ;;  %v3890_v20 = vld [vmem:[%s4619_s29 + $0x54] sm:$0xf]  ;;  %v5087_v63 = vld [vmem:[%s4619_s29 + $0x64] sm:$0xf] }
  0x61   : > { %1225 = vrot.lane.b32.xlu0 %v1134_v0, %s4552_s18  ;;  %v3931_v0 = vld [vmem:[%s4619_s29 + $0x3c] sm:$0xe]  ;;  %v1146_v52 = vsel %vm389_vm1, %v1141_v50, %v1145_v1  ;;  %v5066_v50 = vcombine.low %v3735_v4, %v5051_v58  ;;  %v1323_v4 = vrot.slane %v3817_v30, 1  ;;  %v3770_v30 = vld [vmem:[%s4619_s29 + $0xa8] sm:$0xe] }
  0x62   : > { %v3979_v47 = vcombine.low %v3931_v0, %v4986_v32  ;;  %6710 = vst [vmem:[#allocation5_spill] sm:$0xff] %v5040_v51  ;;  %v1153_v6 = vor.u32 %v1152_v10, %v1148_v45  ;;  %v1319_v32 = vsel %vm662_vm0, %v1317_v23, %v1318_v7  ;;  %v2152_v45 = vor.u32 %v2151_v43, %v2147_v15  ;;  %v3932_v0 = vld [vmem:[%s4619_s29 + $0x48] sm:$0xe]  ;;  %v3891_v7 = vld [vmem:[%s4619_s29 + $0x58] sm:$0xf] }
  0x63   : > { %6711 = vst [vmem:[#allocation6_spill] sm:$0xff] %v5066_v50  ;;  %v2390_v23 = vsel %vm662_vm0, %v2388_v49, %v2389_v35  ;;  %v1160_v15 = vshrl.u32 %v5040_v51, 16  ;;  %v1324_v49 = vrot.slane %v5045_v59, 1  ;;  %v1174_v21 = vshll.u32 %v5066_v50, 16 }
  0x64   : > { %2430 = vrot.lane.b32.xlu1 %v2384_v40, %s4551_s7  ;;  %v5035_v40 = vld [vmem:[%s4619_s29 + $0x50] ss:$0 sps:$4 sm:$0x11]   ;;  %v2157_v43 = vsel %vm389_vm1, %v2152_v45, %v2156_v60  ;;  %v3980_v35 = vcombine.low %v3932_v0, %v5019_v19  ;;  %v5093_v19 = vld [vmem:[%s4619_s29 + $0x5c] ss:$0 sps:$4 sm:$0x11]  }
  0x65   : > { %2304 = vrot.lane.b32.xlu0 %v2133_v54, %s4552_s18  ;;  %v1157_v54 = vrot.slane %v1155_v3, 1  ;;  %v2166_v1 = vshll.u32 %v5035_v40, 16  ;;  %v2391_v3 = vrot.slane %v3979_v47, 1  ;;  %v2395_v11 = vrot.slane %v5035_v40, 1  ;;  %v3737_v40 = vld [vmem:[%s4619_s29 + $0xb4] sm:$0xf] }
  0x66   : > { %v1176_v0 = vrot.slane %v1174_v21, 1 }
  0x67   : > { %v1158_v10 = vsel %vm389_vm1, %v1153_v6, %v1157_v54  ;;  %v5081_v6 = vcombine.low %v3890_v20, %v3891_v7  ;;  %v3933_v54 = vld [vmem:[%s4619_s29 + $0x54] sm:$0xe]  ;;  %v2394_v20 = vrot.slane %v3980_v35, 1  ;;  %v1325_v35 = vsel %vm662_vm0, %v1323_v4, %v1324_v49  ;;  %v5136_v4 = vld [vmem:[%s4619_s29 + $0xbc] ss:$0 sps:$4 sm:$0x11]  }
  0x68   : > { %2432 = vrot.lane.b32.xlu1 %v2387_v62, %s4551_s7  ;;  %v2392_v62 = vrot.slane %v5010_v37, 1  ;;  %v1162_v37 = vshll.u32 %v5040_v51, 16  ;;  %v3818_v49 = vcombine.low %v3770_v30, %v5051_v58  ;;  %v5160_v30 = vld [vmem:[%s4619_s29 + $0xc8] ss:$0 sps:$4 sm:$0x11]  }
  0x69   : > { %1353 = vrot.lane.b32.xlu0 %v1316_v31, %s4551_s7  ;;  %v1167_v31 = vshll.u32 %v5045_v59, 16  ;;  %6712 = vst [vmem:[#allocation7_spill] sm:$0xff] %v5081_v6  ;;  %v1322_v59 = vsel %vm662_vm0, %v1320_v12, %v1321_v5  ;;  %v5104_v5 = vld [vmem:[%s4619_s29 + $0xb8] sm:$0xf]  ;;  %v3900_v51 = vld [vmem:[%s4619_s29 + $0x90] sm:$0xf] }
  0x6a   : > { %v1164_v47 = vrot.slane %v1162_v37, 1  ;;  %v2393_v60 = vsel %vm662_vm0, %v2391_v3, %v2392_v62  ;;  %v1172_v37 = vshrl.u32 %v5066_v50, 16  ;;  %v2173_v62 = vshll.u32 %v5081_v6, 16  ;;  %v5199_v50 = vld [vmem:[%s4619_s29 + $0x7c] sm:$0xf] }
  0x6b   : > { %v1169_v57 = vrot.slane %v1167_v31, 1  ;;  %v3981_v31 = vcombine.low %v3933_v54, %v3891_v7  ;;  %v5110_v7 = vld [vmem:[%s4619_s29 + $0x68] ss:$0 sps:$4 sm:$0x11]   ;;  %v5118_v21 = vcombine.low %v3737_v40, %v5104_v5  ;;  %v3739_v54 = vld [vmem:[%s4619_s29 + $0xc0] sm:$0xf] }
  0x6c   : > { %2306 = vrot.lane.b32.xlu1 %v2145_v18, %s4552_s18  ;;  %v2168_v18 = vrot.slane %v2166_v1, 1  ;;  %v2164_v1 = vor.u32 %v2163_v33, %v2159_v29  ;;  %v1165_v45 = vor.u32 %v1164_v47, %v1160_v15  ;;  %v2171_v33 = vshrl.u32 %v5081_v6, 16  ;;  %v3894_v40 = vld [vmem:[%s4619_s29 + $0x6c] sm:$0xf]  ;;  %v5249_v6 = vld [vmem:[%s4619_s29 + $0x88] sm:$0xf] }
  0x6d   : > { %1227 = vrot.lane.b32.xlu0 %v1146_v52, %s4552_s18  ;;  %v1179_v52 = vshll.u32 %v5061_v9, 16  ;;  %v2397_v15 = vrot.slane %v3981_v31, 1  ;;  %v1177_v47 = vor.u32 %v1176_v0, %v1172_v37  ;;  %6714 = vst [vmem:[#allocation9_spill] sm:$0xff] %v5118_v21  ;;  %v1186_v31 = vshll.u32 %v5118_v21, 16 }
  0x6e   : > { %v2169_v12 = vsel %vm389_vm1, %v2164_v1, %v2168_v18  ;;  %v1170_v29 = vsel %vm389_vm1, %v1165_v45, %v1169_v57  ;;  %v5131_v1 = vld [vmem:[%s6691_s1 + $0x68] sm:$0xff]  }
  0x70   : > { %1355 = vrot.lane.b32.xlu1 %v1319_v32, %s4551_s7  ;;  %v3892_v32 = vld [vmem:[%s4619_s29 + $0x60] sm:$0xf] }
  0x71   : > { %1229 = vrot.lane.b32.xlu0 %v1158_v10, %s4552_s18  ;;  %v1181_v10 = vrot.slane %v1179_v52, 1  ;;  %v5099_v3 = vcombine.low %v3892_v32, %v5087_v63  ;;  %v2175_v52 = vrot.slane %v2173_v62, 1  ;;  %v5124_v32 = vld [vmem:[%s4619_s29 + $0xc4] sm:$0xf] }
  0x72   : > { %v5144_v0 = vcombine.low %v3739_v54, %v5124_v32  ;;  %v5149_v62 = vld [vmem:[%s6691_s1 + $0x30] ss:$0 sps:$4 sm:$0x77]  }
  0x73   : > { %6713 = vst [vmem:[#allocation8_spill] sm:$0xff] %v5099_v3  ;;  %v2185_v18 = vshll.u32 %v5099_v3, 16  ;;  %v1182_v45 = vsel %vm389_vm1, %v1177_v47, %v1181_v10  ;;  %v2176_v37 = vor.u32 %v2175_v52, %v2171_v33  ;;  %4317 = vmatprep.subr.msk.bf16.mxu0 %vm1517_vm2, %v5149_v62  ;;  %v1326_v33 = vrot.slane %v3818_v49, 1 }
  0x74   : > { %2434 = vrot.lane.b32.xlu1 %v2390_v23, %s4551_s7  ;;  %v2178_v23 = vshll.u32 %v5093_v19, 16  ;;  %6715 = vst [vmem:[#allocation10_spill] sm:$0xff] %v5144_v0  ;;  %v1327_v47 = vrot.slane %v5061_v9, 1  ;;  %v1184_v52 = vshrl.u32 %v5118_v21, 16  ;;  %v1198_v54 = vshll.u32 %v5144_v0, 16  ;;  %v5184_v9 = vld [vmem:[%s6691_s1] sm:$0xff]  }
  0x75   : > { %2308 = vrot.lane.b32.xlu0 %v2157_v43, %s4552_s18  ;;  %v2398_v43 = vrot.slane %v5093_v19, 1  ;;  %v4463_v19 = vld [vmem:[%s6691_s1 + $0x64] ss:$0 sps:$4 sm:$0x77]   ;;  %v2187_v58 = vrot.slane %v2185_v18, 1  ;;  %v1191_v18 = vshll.u32 %v5136_v4, 16 }
  0x76   : > { %v2180_v57 = vrot.slane %v2178_v23, 1  ;;  %4316 = vmatprep.subr.msk.bf16.mxu1 %vm1517_vm2, %v4463_v19  ;;  %v1519_v10 = vsel %vm1517_vm2, %v4463_v19, 0  ;;  %v2396_v23 = vsel %vm662_vm0, %v2394_v20, %v2395_v11  ;;  %v3771_v11 = vld [vmem:[%s4619_s29 + $0xb4] sm:$0xe]  ;;  %v3934_v19 = vld [vmem:[%s4619_s29 + $0x60] sm:$0xe] }
  0x77   : > { %4113 = vmatpush3.bf16.msra.mxu1 %v1519_v10  ;;  %v2399_v49 = vsel %vm662_vm0, %v2397_v15, %v2398_v43  ;;  %v5192_v10 = vld [vmem:[%s4619_s29 + $0x74] ss:$0 sps:$4 sm:$0x11]   ;;  %v1196_v21 = vshrl.u32 %v5144_v0, 16  ;;  %v1328_v15 = vsel %vm662_vm0, %v1326_v33, %v1327_v47  ;;  %v3935_v33 = vld [vmem:[%s4619_s29 + $0x6c] sm:$0xe] }
  0x78   : > { %2436 = vrot.lane.b32.xlu1 %v2393_v60, %s4551_s7  ;;  %v2183_v60 = vshrl.u32 %v5099_v3, 16  ;;  %v2181_v20 = vsel %vm389_vm1, %v2176_v37, %v2180_v57  ;;  %4238 = vmatprep.subr.bf16.mxu1 %v5184_v9  ;;  %v1193_v3 = vrot.slane %v1191_v18, 1  ;;  %v1330_v18 = vrot.slane %v5136_v4, 1 }
  0x79   : > { %1357 = vrot.lane.b32.xlu0 %v1322_v59, %s4551_s7  ;;  %v2190_v59 = vshll.u32 %v5110_v7, 16  ;;  %v2404_v38 = vrot.slane %v5192_v10, 1 }
  0x7a   : > { %v2188_v37 = vor.u32 %v2187_v58, %v2183_v60  ;;  %v1200_v60 = vrot.slane %v1198_v54, 1  ;;  %v213_v58 = vld [vmem:[%s4619_s29 + $0x60] sm:$0xf] }
  0x7b   : > { %v2192_v57 = vrot.slane %v2190_v59, 1  ;;  %v3896_v59 = vld [vmem:[%s4619_s29 + $0x78] sm:$0xf] }
  0x7c   : > { %2310 = vrot.lane.b32.xlu1 %v2169_v12, %s4552_s18  ;;  %v5154_v12 = vld [vmem:[%s4619_s29 + $0x70] sm:$0xf]  ;;  %v5213_v47 = vcombine.low %v3896_v59, %v5199_v50  ;;  %v215_v59 = vld [vmem:[%s4619_s29 + $0x6c] sm:$0xf] }
  0x7d   : > { %1231 = vrot.lane.b32.xlu0 %v1170_v29, %s4552_s18  ;;  %v5166_v29 = vsel %vm1517_vm2, %v5149_v62, 0 }
  0x7e   : > { %4159 = vmatpush3.bf16.msra.mxu0 %v5166_v29  ;;  %6717 = vst [vmem:[#allocation12_spill] sm:$0xff] %v5213_v47 }
  0x7f   : > { %4192 = vmatprep.subr.bf16.mxu0 %v5131_v1 }
  0x80   : > { %1359 = vrot.lane.b32.xlu1 %v1325_v35, %s4551_s7  ;;  %v1188_v35 = vrot.slane %v1186_v31, 1  ;;  %v3819_v31 = vcombine.low %v3771_v11, %v5104_v5  ;;  %v5205_v11 = vld [vmem:[%s4619_s29 + $0x64] sm:$0xf] }
  0x81   : > { %1233 = vrot.lane.b32.xlu0 %v1182_v45, %s4552_s18  ;;  %v5178_v45 = vcombine.low %v3894_v40, %v5154_v12  ;;  %v1203_v40 = vshll.u32 %v5160_v30, 16 }
  0x82   : > { %v1189_v43 = vor.u32 %v1188_v35, %v1184_v52  ;;  %v5219_v35 = vcombine.low %v213_v58, %v5205_v11 }
  0x83   : > { %6716 = vst [vmem:[#allocation11_spill] sm:$0xff] %v5178_v45  ;;  %v2197_v5 = vshll.u32 %v5178_v45, 16  ;;  %v1205_v0 = vrot.slane %v1203_v40, 1  ;;  %v2195_v4 = vshrl.u32 %v5178_v45, 16  ;;  %v3983_v40 = vcombine.low %v3935_v33, %v5154_v12 }
  0x84   : > { %2438 = vrot.lane.b32.xlu1 %v2396_v23, %s4551_s7  ;;  %v3982_v23 = vcombine.low %v3934_v19, %v5087_v63  ;;  %v2193_v63 = vsel %vm389_vm1, %v2188_v37, %v2192_v57  ;;  %v1329_v19 = vrot.slane %v3819_v31, 1  ;;  %6718 = vst [vmem:[#allocation13_spill] sm:$0xff] %v5219_v35  ;;  %v1194_v54 = vsel %vm389_vm1, %v1189_v43, %v1193_v3  ;;  %v3772_v37 = vld [vmem:[%s4619_s29 + $0xc0] sm:$0xe] }
  0x85   : > { %2312 = vrot.lane.b32.xlu0 %v2181_v20, %s4552_s18  ;;  %v2401_v20 = vrot.slane %v5110_v7, 1  ;;  %v2202_v7 = vshll.u32 %v5192_v10, 16  ;;  %v1201_v57 = vor.u32 %v1200_v60, %v1196_v21  ;;  %v5224_v31 = vld [vmem:[%s4619_s29 + $0x80] ss:$0 sps:$4 sm:$0x11]   ;;  %v2209_v45 = vshll.u32 %v5213_v47, 16 }
  0x86   : > { %v2400_v52 = vrot.slane %v3982_v23, 1  ;;  %v253_v23 = vld [vmem:[%s4619_s29 + $0x60] sm:$0xe]  ;;  %v1331_v58 = vsel %vm662_vm0, %v1329_v19, %v1330_v18  ;;  %v5236_v3 = vld [vmem:[%s4619_s29 + $0x68] ss:$0 sps:$4 sm:$0x11]   ;;  %v3820_v12 = vcombine.low %v3772_v37, %v5124_v32 }
  0x87   : > { %v2204_v60 = vrot.slane %v2202_v7, 1  ;;  %v3898_v19 = vld [vmem:[%s4619_s29 + $0x84] sm:$0xf]  ;;  %v2214_v7 = vshll.u32 %v5224_v31, 16  ;;  %v3701_v32 = vcombine.low %v253_v23, %v5205_v11  ;;  %v1333_v10 = vrot.slane %v5160_v30, 1 }
  0x88   : > { %2440 = vrot.lane.b32.xlu1 %v2399_v49, %s4551_s7  ;;  %v2199_v49 = vrot.slane %v2197_v5, 1  ;;  %v489_v5 = vshll.u32 %v5219_v35, 16  ;;  %v5256_v37 = vld [vmem:[%s4619_s29 + $0x74] ss:$0 sps:$4 sm:$0x11]  }
  0x89   : > { %1361 = vrot.lane.b32.xlu0 %v1328_v15, %s4551_s7  ;;  %v5231_v15 = vld [vmem:[%s4619_s29 + $0x70] sm:$0xf]  ;;  %v687_v30 = vrot.slane %v3701_v32, 1 }
  0x8a   : > { %v2200_v33 = vor.u32 %v2199_v49, %v2195_v4  ;;  %v5245_v18 = vcombine.low %v215_v59, %v5231_v15  ;;  %v2207_v4 = vshrl.u32 %v5213_v47, 16  ;;  %v494_v49 = vshll.u32 %v5236_v3, 16  ;;  %v3936_v47 = vld [vmem:[%s4619_s29 + $0x78] sm:$0xe] }
  0x8c   : > { %2314 = vrot.lane.b32.xlu1 %v2193_v63, %s4552_s18  ;;  %v5239_v21 = vpop.permute.xlu0 %713  ;;  %v1206_v63 = vsel %vm389_vm1, %v1201_v57, %v1205_v0  ;;  %6719 = vst [vmem:[#allocation14_spill] sm:$0xff] %v5245_v18  ;;  %v2402_v0 = vsel %vm662_vm0, %v2400_v52, %v2401_v20  ;;  %v2211_v57 = vrot.slane %v2209_v45, 1  ;;  %v2205_v11 = vsel %vm389_vm1, %v2200_v33, %v2204_v60 }
  0x8d   : > { %1235 = vrot.lane.b32.xlu0 %v1194_v54, %s4552_s18  ;;  %v2403_v54 = vrot.slane %v3983_v40, 1  ;;  %v1332_v40 = vrot.slane %v3820_v12, 1  ;;  %v487_v20 = vshrl.u32 %v5219_v35, 16  ;;  %v491_v45 = vrot.slane %v489_v5, 1 }
  0x8e   : > { %v712_v43 = vpop.permute.xlu1 %711  ;;  %v501_v52 = vshll.u32 %v5245_v18, 16  ;;  %v2212_v33 = vor.u32 %v2211_v57, %v2207_v4  ;;  %v496_v5 = vrot.slane %v494_v49, 1  ;;  %v688_v35 = vrot.slane %v5236_v3, 1  ;;  %v217_v57 = vld [vmem:[%s4619_s29 + $0x78] sm:$0xf] }
  0x8f   : > { %v2405_v12 = vsel %vm662_vm0, %v2403_v54, %v2404_v38  ;;  %v1334_v32 = vsel %vm662_vm0, %v1332_v40, %v1333_v10  ;;  %v499_v3 = vshrl.u32 %v5245_v18, 16  ;;  %v5291_v49 = vld [vmem:[%s4619_s29 + $0x7c] sm:$0xf]  ;;  %v5299_v40 = vcombine.low %v3900_v51, %v5278_v42 }
  0x90   : > { %1363 = vrot.lane.b32.xlu1 %v1331_v58, %s4551_s7  ;;  %v5264_v58 = vcombine.low %v3898_v19, %v5249_v6  ;;  %v506_v19 = vshll.u32 %v5256_v37, 16  ;;  %v503_v4 = vrot.slane %v501_v52, 1  ;;  %v5306_v52 = vld [vmem:[%s4619_s29 + $0x98] ss:$0 sps:$4 sm:$0x11]  }
  0x91   : > { %1237 = vrot.lane.b32.xlu0 %v1206_v63, %s4552_s18  ;;  %v2216_v63 = vrot.slane %v2214_v7, 1  ;;  %v5283_v7 = vld [vmem:[%s4619_s29 + $0x8c] ss:$0 sps:$4 sm:$0x11]  }
  0x92   : > { %v1336_v59 = vpop.permute.xlu1 %1335  ;;  %v2226_v51 = vshll.u32 %v5283_v7, 16 }
  0x93   : > { %v583_v23 = vpop.permute.xlu0 %582 }
  0x94   : > { %2442 = vrot.lane.b32.xlu1 %v2402_v0, %s4551_s7  ;;  %v745_v60 = vsel %vm743_vm3, %v4642_v25, %v583_v23  ;;  %v2221_v25 = vshll.u32 %v5264_v58, 16  ;;  %v492_v0 = vor.u32 %v491_v45, %v487_v20  ;;  %v3984_v23 = vcombine.low %v3936_v47, %v5199_v50 }
  0x95   : > { %2316 = vrot.lane.b32.xlu0 %v2205_v11, %s4552_s18  ;;  %v778_v38 = vsel %vm776_vm4, %v745_v60, %v712_v43  ;;  %v508_v11 = vrot.slane %v506_v19, 1  ;;  %v2407_v60 = vrot.slane %v5224_v31, 1  ;;  %v2217_v20 = vsel %vm389_vm1, %v2212_v33, %v2216_v63  ;;  %v4500_v63 = vld [vmem:[%s6691_s1 + $0x70] sm:$0xff]  }
  0x96   : > { %v1338_v54 = vpop.permute.xlu1 %1337  ;;  %4160 = vmatprep.mubr.msk.bf16.mxu0 %vm1484_vm5, %v778_v38  ;;  %v3937_v38 = vld [vmem:[%s4619_s29 + $0x84] sm:$0xe]  ;;  %v2219_v45 = vshrl.u32 %v5264_v58, 16  ;;  %v2223_v31 = vrot.slane %v2221_v25, 1  ;;  %v504_v33 = vor.u32 %v503_v4, %v499_v3  ;;  %v2406_v18 = vrot.slane %v3984_v23, 1 }
  0x97   : > { %v1208_v43 = vpop.permute.xlu0 %1207  ;;  %v219_v25 = vld [vmem:[%s4619_s29 + $0x84] sm:$0xf]  ;;  %v2238_v3 = vshll.u32 %v5306_v52, 16  ;;  %v5347_v23 = vld [vmem:[%s4619_s29 + $0x8c] ss:$0 sps:$4 sm:$0x11]  }
  0x98   : > { %2444 = vrot.lane.b32.xlu1 %v2405_v12, %s4551_s7  ;;  %v1368_v10 = vsel %vm743_vm3, %v4648_v28, %v1208_v43  ;;  %v5312_v12 = vcombine.low %v217_v57, %v5291_v49  ;;  %v5315_v28 = vld [vmem:[%s4619_s29 + $0x80] ss:$0 sps:$4 sm:$0x11]  }
  0x99   : > { %1365 = vrot.lane.b32.xlu0 %v1334_v32, %s4551_s7  ;;  %v1400_v50 = vsel %vm776_vm4, %v1368_v10, %v1336_v59  ;;  %v497_v59 = vsel %vm389_vm1, %v492_v0, %v496_v5  ;;  %v5326_v32 = vld [vmem:[%s4619_s29 + $0x88] sm:$0xf]  ;;  %v689_v10 = vsel %vm662_vm0, %v687_v30, %v688_v35  ;;  %v3985_v5 = vcombine.low %v3937_v38, %v5249_v6 }
  0x9a   : > { %v585_v47 = vpop.permute.xlu1 %584  ;;  %4114 = vmatprep.mubr.msk.bf16.mxu1 %vm1484_vm5, %v1400_v50  ;;  %v2233_v50 = vshll.u32 %v5299_v40, 16  ;;  %v3702_v0 = vcombine.low %v254_v53, %v5231_v15  ;;  %v691_v30 = vrot.slane %v5256_v37, 1  ;;  %v513_v4 = vshll.u32 %v5312_v12, 16  ;;  %v4503_v53 = vld [vmem:[%s6691_s1 + $0x78] sm:$0xff]  }
  0x9b   : > { %v747_v19 = vsel %vm743_vm3, %v4646_v27, %v585_v47  ;;  %v1210_v43 = vpop.permute.xlu0 %1209  ;;  %v509_v6 = vsel %vm389_vm1, %v504_v33, %v508_v11  ;;  %v2224_v15 = vor.u32 %v2223_v31, %v2219_v45  ;;  %v518_v38 = vshll.u32 %v5315_v28, 16  ;;  %v5358_v47 = vld [vmem:[%s4619_s29 + $0xa0] sm:$0xf]  ;;  %v255_v33 = vld [vmem:[%s4619_s29 + $0x78] sm:$0xe] }
  0x9c   : > { %2318 = vrot.lane.b32.xlu1 %v2217_v20, %s4552_s18  ;;  %v780_v57 = vsel %vm776_vm4, %v747_v19, %v5239_v21  ;;  %v1370_v27 = vsel %vm743_vm3, %v4658_v41, %v1210_v43  ;;  %v5344_v41 = vcombine.low %v219_v25, %v5326_v32  ;;  %v3902_v20 = vld [vmem:[%s4619_s29 + $0x9c] sm:$0xf]  ;;  %v2231_v25 = vshrl.u32 %v5299_v40, 16 }
  0x9d   : > { %4161 = vmatmul.mubr.msk.bf16.vlgmr.msra.gmra.mrb[0].mxu0 %vm1484_vm5, %v780_v57  ;;  %598 = vrot.lane.b32.xlu0 %v497_v59, %s4552_s18  ;;  %v1402_v35 = vsel %vm776_vm4, %v1370_v27, %v1338_v54  ;;  %v2228_v54 = vrot.slane %v2226_v51, 1  ;;  %v2410_v59 = vrot.slane %v5283_v7, 1  ;;  %v2235_v43 = vrot.slane %v2233_v50, 1  ;;  %v4521_v57 = vld [vmem:[%s6691_s1 + $0x8] sm:$0xff]   ;;  %v4508_v50 = vld [vmem:[%s6691_s1 + $0x80] sm:$0xff]  }
  0x9e   : > { %v1212_v21 = vpop.permute.xlu1 %1211  ;;  %4193 = vmatpush3.bf16.msra.mxu0 %v5131_v1  ;;  %4115 = vmatmul.mubr.msk.bf16.vlgmr.msra.gmra.mrb[0].mxu1 %vm1484_vm5, %v1402_v35  ;;  %v2408_v1 = vsel %vm662_vm0, %v2406_v18, %v2407_v60  ;;  %v2409_v11 = vrot.slane %v3985_v5, 1  ;;  %v690_v45 = vrot.slane %v3702_v0, 1  ;;  %v2240_v31 = vrot.slane %v2238_v3, 1  ;;  %v5384_v3 = vld [vmem:[%s4619_s29 + $0x90] sm:$0xe] }
  0x9f   : > { %4194 = vmatprep.subr.bf16.mxu0 %v4500_v63  ;;  %v587_v19 = vpop.permute.xlu0 %586  ;;  %4245 = vmatpush3.bf16.msra.mxu1 %v5184_v9  ;;  %v511_v51 = vshrl.u32 %v5312_v12, 16  ;;  %v515_v60 = vrot.slane %v513_v4, 1  ;;  %v525_v9 = vshll.u32 %v5344_v41, 16  ;;  %v520_v5 = vrot.slane %v518_v38, 1  ;;  %v3904_v38 = vld [vmem:[%s4619_s29 + $0xa8] sm:$0xf] }
  0xa0   : > { %727 = vrot.lane.b32.xlu1 %v689_v10, %s4551_s7  ;;  %4239 = vmatprep.subr.bf16.mxu1 %v4521_v57  ;;  %v749_v18 = vsel %vm743_vm3, %v4698_v14, %v587_v19  ;;  %v5375_v10 = vcombine.low %v3902_v20, %v5358_v47  ;;  %v2229_v14 = vsel %vm389_vm1, %v2224_v15, %v2228_v54  ;;  %v530_v0 = vshll.u32 %v5347_v23, 16  ;;  %v5391_v20 = vld [vmem:[%s4619_s29 + $0xa4] ss:$0 sps:$4 sm:$0x11]   ;;  %v5395_v54 = vld [vmem:[%s4619_s29 + $0x9c] sm:$0xe] }
  0xa1   : > { %600 = vrot.lane.b32.xlu0 %v509_v6, %s4552_s18  ;;  %v3703_v4 = vcombine.low %v255_v33, %v5291_v49  ;;  %v523_v6 = vshrl.u32 %v5344_v41, 16  ;;  %v2411_v15 = vsel %vm662_vm0, %v2409_v11, %v2410_v59  ;;  %v5401_v19 = vld [vmem:[%s6691_s1 + $0x88] sm:$0xff]   ;;  %v221_v33 = vld [vmem:[%s4619_s29 + $0x90] sm:$0xf] }
  0xa2   : > { %v716_v7 = vpop.permute.xlu1 %715  ;;  %4195 = vmatpush3.bf16.msra.mxu0 %v4500_v63  ;;  %v2236_v63 = vor.u32 %v2235_v43, %v2231_v25  ;;  %v516_v25 = vor.u32 %v515_v60, %v511_v51  ;;  %v527_v43 = vrot.slane %v525_v9, 1  ;;  %v2245_v59 = vshll.u32 %v5375_v10, 16  ;;  %v5408_v11 = vld [vmem:[%s4619_s29 + $0xac] sm:$0xf] }
  0xa3   : > { %v782_v27 = vsel %vm776_vm4, %v749_v18, %v716_v7  ;;  %4196 = vmatprep.subr.bf16.mxu0 %v4503_v53  ;;  %v589_v35 = vpop.permute.xlu0 %588  ;;  %4246 = vmatpush3.bf16.msra.mxu1 %v4521_v57  ;;  %v692_v57 = vsel %vm662_vm0, %v690_v45, %v691_v30  ;;  %v5416_v7 = vld [vmem:[%s4619_s29 + $0x94] sm:$0xf]  ;;  %v693_v37 = vrot.slane %v3703_v4, 1  ;;  %v694_v30 = vrot.slane %v5315_v28, 1 }
  0xa4   : > { %2446 = vrot.lane.b32.xlu1 %v2408_v1, %s4551_s7  ;;  %4164 = vmatprep.mubr.msk.bf16.mxu0 %vm1484_vm5, %v782_v27  ;;  %v1372_v1 = vsel %vm743_vm3, %v4690_v8, %v1212_v21  ;;  %v4522_v8 = vld [vmem:[%s6691_s1 + $0x10] sm:$0xff]   ;;  %v3986_v45 = vcombine.low %v5384_v3, %v5278_v42  ;;  %v532_v51 = vrot.slane %v530_v0, 1  ;;  %v2250_v60 = vshll.u32 %v5391_v20, 16  ;;  %v5447_v3 = vld [vmem:[%s4619_s29 + $0x98] ss:$0 sps:$4 sm:$0x11]  }
  0xa5   : > { %2320 = vrot.lane.b32.xlu0 %v2229_v14, %s4552_s18  ;;  %4240 = vmatprep.subr.bf16.mxu1 %v4522_v8  ;;  %v3987_v9 = vcombine.low %v5395_v54, %v5358_v47  ;;  %v5431_v27 = vcombine.low %v3904_v38, %v5408_v11  ;;  %v521_v42 = vsel %vm389_vm1, %v516_v25, %v520_v5  ;;  %v5438_v14 = vld [vmem:[%s4619_s29 + $0x84] sm:$0xe]  ;;  %v5441_v0 = vld [vmem:[%s4619_s29 + $0xb0] ss:$0 sps:$4 sm:$0x11]   ;;  %v2247_v5 = vrot.slane %v2245_v59, 1 }
  0xa6   : > { %v1340_v49 = vpop.permute.xlu1 %1339  ;;  %4197 = vmatpush3.bf16.msra.mxu0 %v4503_v53  ;;  %v2241_v53 = vsel %vm389_vm1, %v2236_v63, %v2240_v31  ;;  %v5444_v47 = vcombine.low %v221_v33, %v5416_v7  ;;  %v4516_v63 = vld [vmem:[%s6691_s1 + $0x90] sm:$0xff]   ;;  %v528_v4 = vor.u32 %v527_v43, %v523_v6  ;;  %v223_v54 = vld [vmem:[%s4619_s29 + $0x9c] sm:$0xf]  ;;  %v5456_v38 = vld [vmem:[%s4619_s29 + $0xa0] sm:$0xf]  ;;  %v2412_v6 = vrot.slane %v3986_v45, 1 }
  0xa7   : > { %v1404_v18 = vsel %vm776_vm4, %v1372_v1, %v1340_v49  ;;  %4198 = vmatprep.subr.bf16.mxu0 %v4508_v50  ;;  %v1214_v21 = vpop.permute.xlu0 %1213  ;;  %4247 = vmatpush3.bf16.msra.mxu1 %v4522_v8  ;;  %v4523_v1 = vld [vmem:[%s6691_s1 + $0x18] sm:$0xff]   ;;  %v2413_v25 = vrot.slane %v5306_v52, 1  ;;  %v695_v59 = vsel %vm662_vm0, %v693_v37, %v694_v30  ;;  %v2252_v33 = vrot.slane %v2250_v60, 1  ;;  %v257_v45 = vld [vmem:[%s4619_s29 + $0x90] sm:$0xe] }
  0xa8   : > { %2448 = vrot.lane.b32.xlu1 %v2411_v15, %s4551_s7  ;;  %4118 = vmatprep.mubr.msk.bf16.mxu1 %vm1484_vm5, %v1404_v18  ;;  %v1374_v31 = vsel %vm743_vm3, %v4732_v56, %v1214_v21  ;;  %v2243_v15 = vshrl.u32 %v5375_v10, 16  ;;  %v2257_v18 = vshll.u32 %v5431_v27, 16  ;;  %v537_v52 = vshll.u32 %v5444_v47, 16  ;;  %v3906_v60 = vld [vmem:[%s4619_s29 + $0xb4] sm:$0xf] }
  0xa9   : > { %729 = vrot.lane.b32.xlu0 %v692_v57, %s4551_s7  ;;  %4241 = vmatprep.subr.bf16.mxu1 %v4523_v1  ;;  %v2416_v57 = vrot.slane %v5391_v20, 1  ;;  %v5475_v8 = vcombine.low %v223_v54, %v5456_v38  ;;  %v533_v21 = vsel %vm389_vm1, %v528_v4, %v532_v51  ;;  %v3704_v37 = vcombine.low %v5438_v14, %v5326_v32  ;;  %v4524_v20 = vld [vmem:[%s6691_s1 + $0x20] sm:$0xff]  }
  0xaa   : > { %v1342_v28 = vpop.permute.xlu1 %1341  ;;  %4199 = vmatpush3.bf16.msra.mxu0 %v4508_v50  ;;  %v751_v50 = vsel %vm743_vm3, %v4715_v36, %v589_v35  ;;  %v2415_v35 = vrot.slane %v3987_v9, 1  ;;  %v2262_v30 = vshll.u32 %v5441_v0, 16  ;;  %v2414_v51 = vsel %vm662_vm0, %v2412_v6, %v2413_v25  ;;  %v3940_v25 = vld [vmem:[%s4619_s29 + $0xa8] sm:$0xe] }
  0xab   : > { %v1406_v56 = vsel %vm776_vm4, %v1374_v31, %v1342_v28  ;;  %4200 = vmatprep.subr.bf16.mxu0 %v5401_v19  ;;  %v718_v49 = vpop.permute.xlu0 %717  ;;  %4248 = vmatpush3.bf16.msra.mxu1 %v4523_v1  ;;  %v5484_v31 = vld [vmem:[%s4619_s29 + $0xb8] sm:$0xf]  ;;  %v542_v32 = vshll.u32 %v5447_v3, 16  ;;  %v5494_v28 = vld [vmem:[%s4619_s29 + $0xa4] ss:$0 sps:$4 sm:$0x11]  }
  0xac   : > { %2322 = vrot.lane.b32.xlu1 %v2241_v53, %s4552_s18  ;;  %4119 = vmatmul.mubr.msk.bf16.gmra.mrb[4].mxu1 %vm1484_vm5, %v1406_v56  ;;  %v784_v43 = vsel %vm776_vm4, %v751_v50, %v718_v49  ;;  %v2248_v53 = vor.u32 %v2247_v5, %v2243_v15  ;;  %v2255_v14 = vshrl.u32 %v5431_v27, 16  ;;  %v535_v56 = vshrl.u32 %v5444_v47, 16 }
  0xad   : > { %602 = vrot.lane.b32.xlu0 %v521_v42, %s4552_s18  ;;  %4165 = vmatmul.mubr.msk.bf16.gmra.mrb[4].mxu0 %vm1484_vm5, %v784_v43  ;;  %v697_v42 = vrot.slane %v5347_v23, 1  ;;  %v539_v5 = vrot.slane %v537_v52, 1  ;;  %v549_v54 = vshll.u32 %v5475_v8, 16  ;;  %v5504_v1 = vcombine.low %v3906_v60, %v5484_v31  ;;  %v4525_v23 = vld [vmem:[%s6691_s1 + $0x28] sm:$0xff]  }
  0xae   : > { %v1216_v36 = vpop.permute.xlu1 %1215  ;;  %4201 = vmatpush3.bf16.msra.mxu0 %v5401_v19  ;;  %4242 = vmatprep.subr.bf16.mxu1 %v4524_v20  ;;  %v2259_v19 = vrot.slane %v2257_v18, 1  ;;  %v2253_v49 = vsel %vm389_vm1, %v2248_v53, %v2252_v33  ;;  %v2264_v6 = vrot.slane %v2262_v30, 1  ;;  %v3705_v18 = vcombine.low %v257_v45, %v5416_v7  ;;  %v5516_v52 = vld [vmem:[%s4619_s29 + $0xbc] ss:$0 sps:$4 sm:$0x11]  }
  0xaf   : > { %v591_v9 = vpop.permute.xlu0 %590  ;;  %4202 = vmatprep.subr.bf16.mxu0 %v4516_v63  ;;  %4249 = vmatpush3.bf16.msra.mxu1 %v4524_v20  ;;  %v547_v53 = vshrl.u32 %v5475_v8, 16  ;;  %v540_v60 = vor.u32 %v539_v5, %v535_v56  ;;  %v551_v7 = vrot.slane %v549_v54, 1  ;;  %v2269_v45 = vshll.u32 %v5504_v1, 16  ;;  %v3908_v20 = vld [vmem:[%s4619_s29 + $0xc0] sm:$0xf] }
  0xb0   : > { %731 = vrot.lane.b32.xlu1 %v695_v59, %s4551_s7  ;;  %v753_v4 = vsel %vm743_vm3, %v4760_v26, %v591_v9  ;;  %4243 = vmatprep.subr.bf16.mxu1 %v4525_v23  ;;  %v696_v26 = vrot.slane %v3704_v37, 1  ;;  %v544_v59 = vrot.slane %v542_v32, 1  ;;  %v2260_v33 = vor.u32 %v2259_v19, %v2255_v14 }
  0xb1   : > { %604 = vrot.lane.b32.xlu0 %v533_v21, %s4552_s18  ;;  %v2417_v21 = vsel %vm662_vm0, %v2415_v35, %v2416_v57  ;;  %v1376_v37 = vsel %vm743_vm3, %v4747_v13, %v1216_v36  ;;  %v5527_v35 = vld [vmem:[%s4619_s29 + $0xc4] sm:$0xf]  ;;  %v5535_v13 = vld [vmem:[%s4619_s29 + $0xac] sm:$0xf]  ;;  %v699_v32 = vrot.slane %v3705_v18, 1  ;;  %v700_v14 = vrot.slane %v5447_v3, 1 }
  0xb2   : > { %v720_v15 = vpop.permute.xlu1 %719  ;;  %4203 = vmatpush3.bf16.msra.mxu0 %v4516_v63  ;;  %v554_v63 = vshll.u32 %v5494_v28, 16  ;;  %v698_v9 = vsel %vm662_vm0, %v696_v26, %v697_v42  ;;  %v3988_v19 = vcombine.low %v3940_v25, %v5408_v11  ;;  %v2265_v42 = vsel %vm389_vm1, %v2260_v33, %v2264_v6  ;;  %v5564_v25 = vld [vmem:[%s4619_s29 + $0xc8] ss:$0 sps:$4 sm:$0x11]  }
  0xb3   : > { %v786_v50 = vsel %vm776_vm4, %v753_v4, %v720_v15  ;;  %v593_v43 = vpop.permute.xlu0 %592  ;;  %4250 = vmatpush3.bf16.msra.mxu1 %v4525_v23  ;;  %v2274_v4 = vshll.u32 %v5516_v52, 16  ;;  %v3941_v15 = vld [vmem:[%s4619_s29 + $0xb4] sm:$0xe]  ;;  %v5548_v5 = vcombine.low %v3908_v20, %v5527_v35  ;;  %v545_v54 = vsel %vm389_vm1, %v540_v60, %v544_v59  ;;  %v258_v23 = vld [vmem:[%s4619_s29 + $0x9c] sm:$0xe] }
  0xb4   : > { %2450 = vrot.lane.b32.xlu1 %v2414_v51, %s4551_s7  ;;  %4168 = vmatprep.mubr.msk.bf16.mxu0 %vm1484_vm5, %v786_v50  ;;  %v225_v51 = vld [vmem:[%s4619_s29 + $0xa8] sm:$0xf]  ;;  %v556_v56 = vrot.slane %v554_v63, 1  ;;  %v552_v26 = vor.u32 %v551_v7, %v547_v53  ;;  %v2271_v6 = vrot.slane %v2269_v45, 1  ;;  %v755_v59 = vsel %vm743_vm3, %v4776_v44, %v593_v43  ;;  %v227_v63 = vld [vmem:[%s4619_s29 + $0xb4] sm:$0xf] }
  0xb5   : > { %2324 = vrot.lane.b32.xlu0 %v2253_v49, %s4552_s18  ;;  %4318 = vmatprep.subr.msk.bf16.mxu1 %vm1517_vm2, %v5149_v62  ;;  %v4519_v62 = vld [vmem:[%s6691_s1 + $0x98] ss:$0 sps:$4 sm:$0x77]   ;;  %v5557_v50 = vcombine.low %v225_v51, %v5535_v13  ;;  %v2419_v33 = vrot.slane %v5441_v0, 1  ;;  %v3989_v53 = vcombine.low %v3941_v15, %v5484_v31  ;;  %v701_v60 = vsel %vm662_vm0, %v699_v32, %v700_v14  ;;  %v259_v15 = vld [vmem:[%s4619_s29 + $0xa8] sm:$0xe] }
  0xb6   : > { %v1344_v30 = vpop.permute.xlu1 %1343  ;;  %4319 = vmatprep.subr.msk.bf16.mxu0 %vm1517_vm2, %v4519_v62  ;;  %v2612_v49 = vsel %vm1517_vm2, %v4519_v62, 0  ;;  %v2281_v7 = vshll.u32 %v5548_v5, 16  ;;  %v5580_v44 = vld [vmem:[%s4619_s29 + $0xb0] ss:$0 sps:$4 sm:$0x11]   ;;  %v2422_v31 = vrot.slane %v5516_v52, 1  ;;  %v3706_v43 = vcombine.low %v258_v23, %v5456_v38 }
  0xb7   : > { %v1408_v57 = vsel %vm776_vm4, %v1376_v37, %v1344_v30  ;;  %v1218_v36 = vpop.permute.xlu0 %1217  ;;  %4251 = vmatpush3.bf16.msra.mxu1 %v5166_v29  ;;  %4205 = vmatpush3.bf16.msra.mxu0 %v2612_v49  ;;  %v5574_v37 = vld [vmem:[%s4619_s29 + $0xb8] sm:$0xf]  ;;  %v561_v45 = vshll.u32 %v5557_v50, 16  ;;  %v557_v20 = vsel %vm389_vm1, %v552_v26, %v556_v56  ;;  %v2421_v14 = vrot.slane %v3989_v53, 1  ;;  %v3910_v38 = vld [vmem:[%s4619_s29 + $0xcc] sm:$0xf] }
  0xb8   : > { %2452 = vrot.lane.b32.xlu1 %v2417_v21, %s4551_s7  ;;  %4122 = vmatprep.mubr.msk.bf16.mxu1 %vm1484_vm5, %v1408_v57  ;;  %v1378_v3 = vsel %vm743_vm3, %v4786_v55, %v1218_v36  ;;  %v2267_v55 = vshrl.u32 %v5504_v1, 16  ;;  %v2418_v21 = vrot.slane %v3988_v19, 1  ;;  %v5589_v51 = vcombine.low %v227_v63, %v5574_v37  ;;  %v5596_v19 = vld [vmem:[%s4619_s29 + $0xd0] sm:$0xf] }
  0xb9   : > { %733 = vrot.lane.b32.xlu0 %v698_v9, %s4551_s7  ;;  %v2276_v9 = vrot.slane %v2274_v4, 1  ;;  %v703_v52 = vrot.slane %v5494_v28, 1  ;;  %v2279_v62 = vshrl.u32 %v5548_v5, 16  ;;  %v2286_v56 = vshll.u32 %v5564_v25, 16 }
  0xba   : > { %v1346_v11 = vpop.permute.xlu1 %1345  ;;  %v2272_v57 = vor.u32 %v2271_v6, %v2267_v55  ;;  %v2420_v32 = vsel %vm662_vm0, %v2418_v21, %v2419_v33  ;;  %v566_v4 = vshll.u32 %v5580_v44, 16  ;;  %v559_v28 = vshrl.u32 %v5557_v50, 16  ;;  %v5607_v49 = vld [vmem:[%s4619_s29 + $0xbc] ss:$0 sps:$4 sm:$0x11]  }
  0xbb   : > { %v1410_v29 = vsel %vm776_vm4, %v1378_v3, %v1346_v11  ;;  %v722_v18 = vpop.permute.xlu0 %721  ;;  %v563_v23 = vrot.slane %v561_v45, 1  ;;  %v573_v55 = vshll.u32 %v5589_v51, 16  ;;  %v5613_v6 = vcombine.low %v3910_v38, %v5596_v19  ;;  %v3942_v45 = vld [vmem:[%s4619_s29 + $0xc0] sm:$0xe] }
  0xbc   : > { %2326 = vrot.lane.b32.xlu1 %v2265_v42, %s4552_s18  ;;  %4123 = vmatmul.mubr.msk.bf16.gmra.mrb[8].mxu1 %vm1484_vm5, %v1410_v29  ;;  %v788_v30 = vsel %vm776_vm4, %v755_v59, %v722_v18  ;;  %v2283_v42 = vrot.slane %v2281_v7, 1  ;;  %v2277_v26 = vsel %vm389_vm1, %v2272_v57, %v2276_v9  ;;  %v2423_v59 = vsel %vm662_vm0, %v2421_v14, %v2422_v31 }
  0xbd   : > { %606 = vrot.lane.b32.xlu0 %v545_v54, %s4552_s18  ;;  %4169 = vmatmul.mubr.msk.bf16.gmra.mrb[8].mxu0 %vm1484_vm5, %v788_v30  ;;  %v702_v54 = vrot.slane %v3706_v43, 1  ;;  %v2288_v21 = vrot.slane %v2286_v56, 1  ;;  %v568_v33 = vrot.slane %v566_v4, 1  ;;  %v3707_v53 = vcombine.low %v259_v15, %v5535_v13  ;;  %v3943_v4 = vld [vmem:[%s4619_s29 + $0xcc] sm:$0xe] }
  0xbe   : > { %v1220_v0 = vpop.permute.xlu1 %1219  ;;  %v2284_v18 = vor.u32 %v2283_v42, %v2279_v62  ;;  %v564_v7 = vor.u32 %v563_v23, %v559_v28  ;;  %v578_v43 = vshll.u32 %v5607_v49, 16  ;;  %v571_v57 = vshrl.u32 %v5589_v51, 16  ;;  %v260_v28 = vld [vmem:[%s4619_s29 + $0xb4] sm:$0xe] }
  0xbf   : > { %v595_v36 = vpop.permute.xlu0 %594  ;;  %v1380_v63 = vsel %vm743_vm3, %v4805_v17, %v1220_v0  ;;  %v575_v9 = vrot.slane %v573_v55, 1  ;;  %v2293_v13 = vshll.u32 %v5613_v6, 16  ;;  %v705_v0 = vrot.slane %v3707_v53, 1 }
  0xc0   : > { %735 = vrot.lane.b32.xlu1 %v701_v60, %s4551_s7  ;;  %v757_v3 = vsel %vm743_vm3, %v4815_v24, %v595_v36  ;;  %v704_v60 = vsel %vm662_vm0, %v702_v54, %v703_v52  ;;  %v2289_v17 = vsel %vm389_vm1, %v2284_v18, %v2288_v21  ;;  %v3990_v14 = vcombine.low %v3942_v45, %v5527_v35 }
  0xc1   : > { %608 = vrot.lane.b32.xlu0 %v557_v20, %s4552_s18  ;;  %v4515_v20 = vld [vmem:[%s4619_s29 + $0xd4] ss:$0 sps:$4 sm:$0x11]   ;;  %v569_v62 = vsel %vm389_vm1, %v564_v7, %v568_v33  ;;  %v580_v42 = vrot.slane %v578_v43, 1  ;;  %v3991_v55 = vcombine.low %v3943_v4, %v5596_v19  ;;  %v3708_v21 = vcombine.low %v260_v28, %v5574_v37 }
  0xc2   : > { %v724_v11 = vpop.permute.xlu1 %723  ;;  %v2298_v56 = vshll.u32 %v4515_v20, 16  ;;  %v709_v37 = vrot.slane %v5607_v49, 1 }
  0xc3   : > { %v790_v29 = vsel %vm776_vm4, %v757_v3, %v724_v11  ;;  %v597_v24 = vpop.permute.xlu0 %596  ;;  %v576_v3 = vor.u32 %v575_v9, %v571_v57  ;;  %v2291_v11 = vshrl.u32 %v5613_v6, 16  ;;  %v2427_v53 = vrot.slane %v3991_v55, 1 }
  0xc4   : > { %2454 = vrot.lane.b32.xlu1 %v2420_v32, %s4551_s7  ;;  %4172 = vmatprep.mubr.msk.bf16.mxu0 %vm1484_vm5, %v790_v29  ;;  %v706_v32 = vrot.slane %v5580_v44, 1  ;;  %v2295_v44 = vrot.slane %v2293_v13, 1  ;;  %v759_v35 = vsel %vm743_vm3, %v4834_v48, %v597_v24  ;;  %v2300_v18 = vrot.slane %v2298_v56, 1 }
  0xc5   : > { %2328 = vrot.lane.b32.xlu0 %v2277_v26, %s4552_s18  ;;  %v2424_v26 = vrot.slane %v3990_v14, 1  ;;  %v581_v24 = vsel %vm389_vm1, %v576_v3, %v580_v42  ;;  %v708_v43 = vrot.slane %v3708_v21, 1  ;;  %v6720_v3 = vld [vmem:[#allocation3_spill] sm:$0xff] }
  0xc6   : > { %v1348_v30 = vpop.permute.xlu1 %1347  ;;  %v707_v29 = vsel %vm662_vm0, %v705_v0, %v706_v32 }
  0xc7   : > { %v1412_v31 = vsel %vm776_vm4, %v1380_v63, %v1348_v30  ;;  %v1222_v36 = vpop.permute.xlu0 %1221  ;;  %v2428_v63 = vrot.slane %v4515_v20, 1  ;;  %v710_v9 = vsel %vm662_vm0, %v708_v43, %v709_v37 }
  0xc8   : > { %2456 = vrot.lane.b32.xlu1 %v2423_v59, %s4551_s7  ;;  %4126 = vmatprep.mubr.msk.bf16.mxu1 %vm1484_vm5, %v1412_v31  ;;  %v1382_v52 = vsel %vm743_vm3, %v4849_v2, %v1222_v36  ;;  %v2425_v2 = vrot.slane %v5564_v25, 1  ;;  %v2296_v59 = vor.u32 %v2295_v44, %v2291_v11 }
  0xc9   : > { %737 = vrot.lane.b32.xlu0 %v704_v60, %s4551_s7  ;;  %v2429_v20 = vsel %vm662_vm0, %v2427_v53, %v2428_v63  ;;  %v6724_v53 = vld [vmem:[#allocation7_spill] sm:$0xff] }
  0xca   : > { %v1350_v38 = vpop.permute.xlu1 %1349  ;;  %v2426_v33 = vsel %vm662_vm0, %v2424_v26, %v2425_v2  ;;  %v2301_v7 = vsel %vm389_vm1, %v2296_v59, %v2300_v18  ;;  %v6723_v59 = vld [vmem:[#allocation4_spill] sm:$0xff]  ;;  %vm2965_vm0 = vcmask 1043459  }
  0xcb   : > { %v1414_v15 = vsel %vm776_vm4, %v1382_v52, %v1350_v38  ;;  %v726_v54 = vpop.permute.xlu0 %725 }
  0xcc   : > { %2330 = vrot.lane.b32.xlu1 %v2289_v17, %s4552_s18  ;;  %4127 = vmatmul.mubr.msk.bf16.gmra.mrb[12].mxu1 %vm1484_vm5, %v1414_v15  ;;  %v792_v23 = vsel %vm776_vm4, %v759_v35, %v726_v54  ;;  %v6721_v35 = vld [vmem:[#allocation2_spill] sm:$0xff] }
  0xcd   : > { %610 = vrot.lane.b32.xlu0 %v569_v62, %s4552_s18  ;;  %4173 = vmatmul.mubr.msk.bf16.gmra.mrb[12].mxu0 %vm1484_vm5, %v792_v23 }
  0xce   : > { %v2303_v48 = vpop.permute.xlu1 %2302 }
  0xcf   : > { %v1224_v25 = vpop.permute.xlu0 %1223 }
  0xd0   : > { %739 = vrot.lane.b32.xlu1 %v707_v29, %s4551_s7  ;;  %v1384_v19 = vsel %vm743_vm3, %v4880_v34, %v1224_v25  ;;  %v2463_v34 = vsel %vm743_vm3, %v4869_v22, %v2303_v48  ;;  %v6722_v29 = vld [vmem:[#allocation5_spill] sm:$0xff] }
  0xd1   : > { %612 = vrot.lane.b32.xlu0 %v581_v24, %s4552_s18 }
  0xd2   : > { %v1352_v30 = vpop.permute.xlu1 %1351 }
  0xd3   : > { %v1416_v60 = vsel %vm776_vm4, %v1384_v19, %v1352_v30  ;;  %v1226_v45 = vpop.permute.xlu0 %1225 }
  0xd4   : > { %2458 = vrot.lane.b32.xlu1 %v2426_v33, %s4551_s7  ;;  %4130 = vmatprep.mubr.msk.bf16.mxu1 %vm1484_vm5, %v1416_v60  ;;  %v1386_v17 = vsel %vm743_vm3, %v4902_v61, %v1226_v45  ;;  %v6725_v60 = vld [vmem:[#allocation6_spill] sm:$0xff] }
  0xd5   : > { %2332 = vrot.lane.b32.xlu0 %v2301_v7, %s4552_s18  ;;  %s4553_s18 = smov 32  }
  0xd6   : > { %v2431_v31 = vpop.permute.xlu1 %2430 }
  0xd7   : > { %v2495_v57 = vsel %vm776_vm4, %v2463_v34, %v2431_v31  ;;  %v2305_v13 = vpop.permute.xlu0 %2304  ;;  %v6726_v34 = vld [vmem:[#allocation9_spill] sm:$0xff] }
  0xd8   : > { %2460 = vrot.lane.b32.xlu1 %v2429_v20, %s4551_s7  ;;  %4206 = vmatprep.mubr.msk.bf16.mxu0 %vm1484_vm5, %v2495_v57  ;;  %v2465_v49 = vsel %vm743_vm3, %v4923_v16, %v2305_v13 }
  0xd9   : > { %741 = vrot.lane.b32.xlu0 %v710_v9, %s4551_s7 }
  0xda   : > { %v2433_v36 = vpop.permute.xlu1 %2432 }
  0xdb   : > { %v2497_v22 = vsel %vm776_vm4, %v2465_v49, %v2433_v36  ;;  %v1354_v0 = vpop.permute.xlu0 %1353  ;;  %v6727_v49 = vld [vmem:[#allocation8_spill] sm:$0xff] }
  0xdc   : > { %4207 = vmatmul.mubr.msk.bf16.vlgmr.msra.gmra.mrb[0].mxu0 %vm1484_vm5, %v2497_v22  ;;  %v1418_v32 = vsel %vm776_vm4, %v1386_v17, %v1354_v0 }
  0xdd   : > { %4131 = vmatmul.mubr.msk.bf16.gmra.mrb[16].mxu1 %vm1484_vm5, %v1418_v32  ;;  %v6728_v32 = vld [vmem:[#allocation11_spill] sm:$0xff] }
  0xde   : > { %v2307_v14 = vpop.permute.xlu1 %2306 }
  0xdf   : > { %v1228_v52 = vpop.permute.xlu0 %1227  ;;  %v2467_v61 = vsel %vm743_vm3, %v4943_v46, %v2307_v14 }
  0xe0   : > { %v1388_v16 = vsel %vm743_vm3, %v4959_v39, %v1228_v52 }
  0xe2   : > { %v1356_v38 = vpop.permute.xlu1 %1355 }
  0xe3   : > { %v1420_v62 = vsel %vm776_vm4, %v1388_v16, %v1356_v38  ;;  %v1230_v42 = vpop.permute.xlu0 %1229  ;;  %v6729_v38 = vld [vmem:[#allocation10_spill] sm:$0xff] }
  0xe4   : > { %4134 = vmatprep.mubr.msk.bf16.mxu1 %vm1484_vm5, %v1420_v62  ;;  %v1390_v54 = vsel %vm743_vm3, %v6721_v35, %v1230_v42  ;;  %v6731_v35 = vld [vmem:[#allocation12_spill] sm:$0xff] }
  0xe6   : > { %v2435_v56 = vpop.permute.xlu1 %2434 }
  0xe7   : > { %v2499_v4 = vsel %vm776_vm4, %v2467_v61, %v2435_v56  ;;  %v2309_v15 = vpop.permute.xlu0 %2308 }
  0xe8   : > { %4210 = vmatprep.mubr.msk.bf16.mxu0 %vm1484_vm5, %v2499_v4  ;;  %v2469_v11 = vsel %vm743_vm3, %v6720_v3, %v2309_v15  ;;  %v6730_v15 = vld [vmem:[#allocation13_spill] sm:$0xff] }
  0xea   : > { %v2437_v44 = vpop.permute.xlu1 %2436 }
  0xeb   : > { %v2501_v39 = vsel %vm776_vm4, %v2469_v11, %v2437_v44  ;;  %v1358_v2 = vpop.permute.xlu0 %1357 }
  0xec   : > { %4211 = vmatmul.mubr.msk.bf16.gmra.mrb[4].mxu0 %vm1484_vm5, %v2501_v39  ;;  %v1422_v46 = vsel %vm776_vm4, %v1390_v54, %v1358_v2 }
  0xed   : > { %4135 = vmatmul.mubr.msk.bf16.gmra.mrb[20].mxu1 %vm1484_vm5, %v1422_v46 }
  0xee   : > { %v2311_v28 = vpop.permute.xlu1 %2310 }
  0xef   : > { %v1232_v23 = vpop.permute.xlu0 %1231  ;;  %v2471_v18 = vsel %vm743_vm3, %v6723_v59, %v2311_v28 }
  0xf0   : > { %v1392_v26 = vsel %vm743_vm3, %v6722_v29, %v1232_v23 }
  0xf2   : > { %v1360_v55 = vpop.permute.xlu1 %1359 }
  0xf3   : > { %v1424_v48 = vsel %vm776_vm4, %v1392_v26, %v1360_v55  ;;  %v1234_v24 = vpop.permute.xlu0 %1233  ;;  %v6732_v55 = vld [vmem:[#allocation14_spill] sm:$0xff] }
  0xf4   : > { %4138 = vmatprep.mubr.msk.bf16.mxu1 %vm1484_vm5, %v1424_v48  ;;  %v1394_v7 = vsel %vm743_vm3, %v6725_v60, %v1234_v24 }
  0xf6   : > { %v2439_v21 = vpop.permute.xlu1 %2438 }
  0xf7   : > { %v2503_v25 = vsel %vm776_vm4, %v2471_v18, %v2439_v21  ;;  %v2313_v33 = vpop.permute.xlu0 %2312 }
  0xf8   : > { %4214 = vmatprep.mubr.msk.bf16.mxu0 %vm1484_vm5, %v2503_v25  ;;  %v2473_v63 = vsel %vm743_vm3, %v6724_v53, %v2313_v33 }
  0xfa   : > { %v2441_v19 = vpop.permute.xlu1 %2440 }
  0xfb   : > { %v2505_v30 = vsel %vm776_vm4, %v2473_v63, %v2441_v19  ;;  %v1362_v43 = vpop.permute.xlu0 %1361 }
  0xfc   : > { %4215 = vmatmul.mubr.msk.bf16.gmra.mrb[8].mxu0 %vm1484_vm5, %v2505_v30  ;;  %v1426_v37 = vsel %vm776_vm4, %v1394_v7, %v1362_v43 }
  0xfd   : > { %4139 = vmatmul.mubr.msk.bf16.gmra.mrb[24].mxu1 %vm1484_vm5, %v1426_v37 }
  0xfe   : > { %v2315_v45 = vpop.permute.xlu1 %2314 }
  0xff   : > { %v1236_v20 = vpop.permute.xlu0 %1235  ;;  %v2475_v36 = vsel %vm743_vm3, %v6727_v49, %v2315_v45 }
 0x100   : > { %v1396_v31 = vsel %vm743_vm3, %v6726_v34, %v1236_v20 }
 0x102   : > { %v1364_v57 = vpop.permute.xlu1 %1363 }
 0x103   : > { %v1428_v9 = vsel %vm776_vm4, %v1396_v31, %v1364_v57  ;;  %v1238_v13 = vpop.permute.xlu0 %1237 }
 0x104   : > { %4142 = vmatprep.mubr.msk.bf16.mxu1 %vm1484_vm5, %v1428_v9  ;;  %v1398_v62 = vsel %vm743_vm3, %v6729_v38, %v1238_v13 }
 0x106   : > { %v2443_v22 = vpop.permute.xlu1 %2442 }
 0x107   : > { %v2507_v17 = vsel %vm776_vm4, %v2475_v36, %v2443_v22  ;;  %v2317_v0 = vpop.permute.xlu0 %2316 }
 0x108   : > { %4218 = vmatprep.mubr.msk.bf16.mxu0 %vm1484_vm5, %v2507_v17  ;;  %v2477_v14 = vsel %vm743_vm3, %v6728_v32, %v2317_v0 }
 0x10a   : > { %v2445_v52 = vpop.permute.xlu1 %2444 }
 0x10b   : > { %v2509_v16 = vsel %vm776_vm4, %v2477_v14, %v2445_v52  ;;  %v1366_v42 = vpop.permute.xlu0 %1365 }
 0x10c   : > { %4219 = vmatmul.mubr.msk.bf16.gmra.mrb[12].mxu0 %vm1484_vm5, %v2509_v16  ;;  %v1430_v61 = vsel %vm776_vm4, %v1398_v62, %v1366_v42 }
 0x10d   : > { %4143 = vmatmul.mubr.msk.bf16.gmra.mrb[28].mxu1 %vm1484_vm5, %v1430_v61 }
 0x10e   : > { %v2319_v56 = vpop.permute.xlu1 %2318 }
 0x10f   : > { %v599_v4 = vpop.permute.xlu0 %598  ;;  %v2479_v54 = vsel %vm743_vm3, %v6731_v35, %v2319_v56 }
 0x110   : > { %v761_v3 = vsel %vm743_vm3, %v6730_v15, %v599_v4 }
 0x112   : > { %v728_v11 = vpop.permute.xlu1 %727 }
 0x113   : > { %v794_v44 = vsel %vm776_vm4, %v761_v3, %v728_v11  ;;  %v601_v39 = vpop.permute.xlu0 %600 }
 0x114   : > { %4176 = vmatprep.mubr.msk.bf16.mxu1 %vm1484_vm5, %v794_v44  ;;  %v763_v48 = vsel %vm743_vm3, %v6732_v55, %v601_v39 }
 0x116   : > { %v2447_v2 = vpop.permute.xlu1 %2446 }
 0x117   : > { %v2511_v46 = vsel %vm776_vm4, %v2479_v54, %v2447_v2  ;;  %v2321_v28 = vpop.permute.xlu0 %2320 }
 0x118   : > { %4222 = vmatprep.mubr.msk.bf16.mxu0 %vm1484_vm5, %v2511_v46  ;;  %v2481_v23 = vsel %vm743_vm3, %v5264_v58, %v2321_v28 }
 0x11a   : > { %v2449_v29 = vpop.permute.xlu1 %2448 }
 0x11b   : > { %v2513_v26 = vsel %vm776_vm4, %v2481_v23, %v2449_v29  ;;  %v730_v24 = vpop.permute.xlu0 %729 }
 0x11c   : > { %4223 = vmatmul.mubr.msk.bf16.gmra.mrb[16].mxu0 %vm1484_vm5, %v2513_v26  ;;  %v796_v59 = vsel %vm776_vm4, %v763_v48, %v730_v24 }
 0x11d   : > { %4177 = vmatmul.mubr.msk.bf16.vlgmr.msra.gmra.mrb[16].mxu1 %vm1484_vm5, %v796_v59 }
 0x11e   : > { %v2323_v18 = vpop.permute.xlu1 %2322 }
 0x11f   : > { %v603_v21 = vpop.permute.xlu0 %602  ;;  %v2483_v63 = vsel %vm743_vm3, %v5299_v40, %v2323_v18 }
 0x120   : > { %v765_v25 = vsel %vm743_vm3, %v5312_v12, %v603_v21  ;;  %v5820_v21 = vld [vmem:[%s6692_s2] ss:$0 sm:$0xff] }
 0x122   : > { %v732_v33 = vpop.permute.xlu1 %731 }
 0x123   : > { %v798_v58 = vsel %vm776_vm4, %v765_v25, %v732_v33  ;;  %v605_v53 = vpop.permute.xlu0 %604 }
 0x124   : > { %4180 = vmatprep.mubr.msk.bf16.mxu1 %vm1484_vm5, %v798_v58  ;;  %v767_v37 = vsel %vm743_vm3, %v5344_v41, %v605_v53 }
 0x126   : > { %v2451_v19 = vpop.permute.xlu1 %2450 }
 0x127   : > { %v2515_v30 = vsel %vm776_vm4, %v2483_v63, %v2451_v19  ;;  %v2325_v60 = vpop.permute.xlu0 %2324 }
 0x128   : > { %4226 = vmatprep.mubr.msk.bf16.mxu0 %vm1484_vm5, %v2515_v30  ;;  %v2485_v7 = vsel %vm743_vm3, %v5375_v10, %v2325_v60 }
 0x12a   : > { %v2453_v43 = vpop.permute.xlu1 %2452 }
 0x12b   : > { %v2517_v12 = vsel %vm776_vm4, %v2485_v7, %v2453_v43  ;;  %v734_v45 = vpop.permute.xlu0 %733 }
 0x12c   : > { %4227 = vmatmul.mubr.msk.bf16.gmra.mrb[20].mxu0 %vm1484_vm5, %v2517_v12  ;;  %v800_v40 = vsel %vm776_vm4, %v767_v37, %v734_v45 }
 0x12d   : > { %4181 = vmatmul.mubr.msk.bf16.gmra.mrb[20].mxu1 %vm1484_vm5, %v800_v40 }
 0x12e   : > { %v2327_v20 = vpop.permute.xlu1 %2326 }
 0x12f   : > { %v607_v34 = vpop.permute.xlu0 %606  ;;  %v2487_v41 = vsel %vm743_vm3, %v5431_v27, %v2327_v20 }
 0x130   : > { %v769_v31 = vsel %vm743_vm3, %v5444_v47, %v607_v34 }
 0x132   : > { %v736_v57 = vpop.permute.xlu1 %735 }
 0x133   : > { %v802_v10 = vsel %vm776_vm4, %v769_v31, %v736_v57  ;;  %v609_v9 = vpop.permute.xlu0 %608 }
 0x134   : > { %4184 = vmatprep.mubr.msk.bf16.mxu1 %vm1484_vm5, %v802_v10  ;;  %v771_v0 = vsel %vm743_vm3, %v5475_v8, %v609_v9 }
 0x136   : > { %v2455_v13 = vpop.permute.xlu1 %2454 }
 0x137   : > { %v2519_v49 = vsel %vm776_vm4, %v2487_v41, %v2455_v13  ;;  %v2329_v36 = vpop.permute.xlu0 %2328 }
 0x138   : > { %4230 = vmatprep.mubr.msk.bf16.mxu0 %vm1484_vm5, %v2519_v49  ;;  %v2489_v22 = vsel %vm743_vm3, %v5504_v1, %v2329_v36 }
 0x13a   : > { %v2457_v17 = vpop.permute.xlu1 %2456 }
 0x13b   : > { %v2521_v47 = vsel %vm776_vm4, %v2489_v22, %v2457_v17  ;;  %v738_v32 = vpop.permute.xlu0 %737 }
 0x13c   : > { %4231 = vmatmul.mubr.msk.bf16.gmra.mrb[24].mxu0 %vm1484_vm5, %v2521_v47  ;;  %v804_v27 = vsel %vm776_vm4, %v771_v0, %v738_v32 }
 0x13d   : > { %4185 = vmatmul.mubr.msk.bf16.gmra.mrb[24].mxu1 %vm1484_vm5, %v804_v27 }
 0x13e   : > { %v2331_v14 = vpop.permute.xlu1 %2330 }
 0x13f   : > { %v611_v52 = vpop.permute.xlu0 %610  ;;  %v2491_v8 = vsel %vm743_vm3, %v5548_v5, %v2331_v14 }
 0x140   : > { %v773_v16 = vsel %vm743_vm3, %v5557_v50, %v611_v52 }
 0x142   : > { %v740_v38 = vpop.permute.xlu1 %739 }
 0x143   : > { %v806_v1 = vsel %vm776_vm4, %v773_v16, %v740_v38  ;;  %v613_v62 = vpop.permute.xlu0 %612 }
 0x144   : > { %4188 = vmatprep.mubr.msk.bf16.mxu1 %vm1484_vm5, %v806_v1  ;;  %v775_v3 = vsel %vm743_vm3, %v5589_v51, %v613_v62 }
 0x146   : > { %v2459_v42 = vpop.permute.xlu1 %2458 }
 0x147   : > { %v2523_v61 = vsel %vm776_vm4, %v2491_v8, %v2459_v42  ;;  %v2333_v56 = vpop.permute.xlu0 %2332 }
 0x148   : > { %4234 = vmatprep.mubr.msk.bf16.mxu0 %vm1484_vm5, %v2523_v61  ;;  %v2493_v4 = vsel %vm743_vm3, %v5613_v6, %v2333_v56  ;;  %vm2968_vm3 = vcmask 1044484  }
 0x14a   : > { %v2461_v15 = vpop.permute.xlu1 %2460 }
 0x14b   : > { %v2525_v50 = vsel %vm776_vm4, %v2493_v4, %v2461_v15  ;;  %v742_v11 = vpop.permute.xlu0 %741 }
 0x14c   : > { %4235 = vmatmul.mubr.msk.bf16.gmra.mrb[28].mxu0 %vm1484_vm5, %v2525_v50  ;;  %v808_v5 = vsel %vm776_vm4, %v775_v3, %v742_v11  ;;  %vm2971_vm4 = vcmask 1045509  }
 0x14d   : > { %4189 = vmatmul.mubr.msk.bf16.gmra.mrb[28].mxu1 %vm1484_vm5, %v808_v5 }
 0x171   : > { %v4116_v44 = vpop.f32.mrb[0].mxu1 }
 0x172   : > { %v1555_v39 = vpop.f32.mrb[1].mxu1 }
 0x173   : > { %v4117_v35 = vpop.f32.mrb[2].mxu1 }
 0x174   : > { %v1558_v54 = vpop.f32.mrb[3].mxu1 }
 0x17f   : > { %v5793_v2 = vpop.f32.mrb[4].mxu1 }
 0x180   : > { %v5795_v6 = vpop.f32.mrb[5].mxu1 }
 0x181   : > { %v5797_v46 = vpop.f32.mrb[6].mxu1 }
 0x182   : > { %v5799_v28 = vpop.f32.mrb[7].mxu1 }
 0x18f   : > { %v5801_v51 = vpop.f32.mrb[8].mxu1 }
 0x190   : > { %v5803_v23 = vpop.f32.mrb[9].mxu1 }
 0x191   : > { %v5805_v29 = vpop.f32.mrb[10].mxu1 }
 0x192   : > { %v5807_v26 = vpop.f32.mrb[11].mxu1 }
 0x19f   : > { %v5809_v55 = vpop.f32.mrb[12].mxu1 }
 0x1a0   : > { %v5811_v48 = vpop.f32.mrb[13].mxu1 }
 0x1a1   : > { %v5813_v24 = vpop.f32.mrb[14].mxu1 }
 0x1a2   : > { %v5815_v59 = vpop.f32.mrb[15].mxu1 }
 0x1af   : > { %v4208_v18 = vpop.f32.mrb[0].mxu0 }
 0x1b0   : > { %v4252_v25 = vadd.f32 %v4208_v18, %v4116_v44  ;;  %v2648_v33 = vpop.f32.mrb[1].mxu0 }
 0x1b1   : > { %v4253_v58 = vadd.f32 %v2648_v33, %v1555_v39  ;;  %v4209_v53 = vpop.f32.mrb[2].mxu0 }
 0x1b2   : > { %v2816_v63 = vadd.f32 %v4252_v25, %v5820_v21  ;;  %v4254_v19 = vadd.f32 %v4209_v53, %v4117_v35  ;;  %v2651_v30 = vpop.f32.mrb[3].mxu0 }
 0x1b3   : > { %v2814_v60 = vadd.f32 %v4253_v58, %v5820_v21  ;;  %v4255_v7 = vadd.f32 %v2651_v30, %v1558_v54 }
 0x1b4   : > { %vm2848_vm6 = vcmp.ge.f32.partialorder %v2816_v63, 0.0  ;;  %v2880_v43 = vmul.f32 0.01, %v2816_v63  ;;  %v2817_v12 = vadd.f32 %v4254_v19, %v5820_v21 }
 0x1b5   : > { %vm2846_vm7 = vcmp.ge.f32.partialorder %v2814_v60, 0.0  ;;  %v2878_v37 = vmul.f32 0.01, %v2814_v60  ;;  %v2815_v45 = vadd.f32 %v4255_v7, %v5820_v21 }
 0x1b6   : > { %v2912_v40 = vsel %vm2848_vm6, %v2816_v63, %v2880_v43  ;;  %vm2849_vm9 = vcmp.ge.f32.partialorder %v2817_v12, 0.0  ;;  %v2881_v20 = vmul.f32 0.01, %v2817_v12 }
 0x1b7   : > { %v2958_v34 = vrot.slane %v2912_v40, 7  ;;  %v2910_v31 = vsel %vm2846_vm7, %v2814_v60, %v2878_v37  ;;  %vm2847_vm10 = vcmp.ge.f32.partialorder %v2815_v45, 0.0  ;;  %v2879_v57 = vmul.f32 0.01, %v2815_v45 }
 0x1b8   : > { %v5826_v10 = vsel %vm2849_vm9, %v2817_v12, %v2881_v20  ;;  %v3189_v9 = vrot.slane %v2910_v31, 6  ;;  %v3190_v41 = vrot.slane %v2912_v40, 5  ;;  %v3035_v13 = vrot.slane %v2910_v31, 2 }
 0x1b9   : > { %v5829_v49 = vsel %vm2959_vm8, %v2958_v34, %v2910_v31  ;;  %v3279_v36 = vrot.slane %v5826_v10, 7  ;;  %v5832_v22 = vsel %vm2847_vm10, %v2815_v45, %v2879_v57  ;;  %v3036_v17 = vrot.slane %v2912_v40, 1 }
 0x1ba   : > { %v5835_v47 = vsel %vm2959_vm8, %v3190_v41, %v3189_v9  ;;  %v3075_v0 = vrot.slane %v2910_v31, 3  ;;  %v3076_v32 = vrot.slane %v2912_v40, 2  ;;  %v3149_v27 = vrot.slane %v2910_v31, 5 }
 0x1bb   : > { %v5839_v14 = vsel %vm2959_vm8, %v3279_v36, %v5832_v22  ;;  %v3037_v52 = vsel %vm2959_vm8, %v3036_v17, %v3035_v13  ;;  %v3150_v16 = vrot.slane %v2912_v40, 4  ;;  %v2998_v38 = vrot.slane %v2910_v31, 1 }
 0x1bc   : > { %v5843_v1 = vsel %vm2959_vm8, %v3076_v32, %v3075_v0  ;;  %v3112_v62 = vrot.slane %v2910_v31, 4  ;;  %v3113_v8 = vrot.slane %v2912_v40, 3  ;;  %v3495_v42 = vrot.slane %v5832_v22, 6 }
 0x1bd   : > { %v3151_v61 = vsel %vm2959_vm8, %v3150_v16, %v3149_v27  ;;  %v5848_v56 = vsel %vm2959_vm8, %v2912_v40, %v2998_v38  ;;  %v3496_v4 = vrot.slane %v5826_v10, 5  ;;  %v3226_v15 = vrot.slane %v2910_v31, 7 }
 0x1be   : > { %v5852_v50 = vsel %vm2959_vm8, %v3113_v8, %v3112_v62  ;;  %v3227_v3 = vrot.slane %v2912_v40, 6  ;;  %v3347_v11 = vrot.slane %v5832_v22, 2  ;;  %v3348_v5 = vrot.slane %v5826_v10, 1 }
 0x1bf   : > { %v4212_v44 = vpop.f32.mrb[4].mxu0  ;;  %v5857_v39 = vsel %vm2959_vm8, %v3496_v4, %v3495_v42  ;;  %v3385_v35 = vrot.slane %v5832_v22, 3  ;;  %v3386_v54 = vrot.slane %v5826_v10, 2  ;;  %v3457_v18 = vrot.slane %v5832_v22, 5 }
 0x1c0   : > { %v4256_v25 = vadd.f32 %v4212_v44, %v5793_v2  ;;  %v2664_v33 = vpop.f32.mrb[5].mxu0  ;;  %v5864_v58 = vsel %vm2959_vm8, %v3227_v3, %v3226_v15  ;;  %v3349_v53 = vsel %vm2959_vm8, %v3348_v5, %v3347_v11  ;;  %v3458_v63 = vrot.slane %v5826_v10, 4 }
 0x1c1   : > { %v4257_v19 = vadd.f32 %v2664_v33, %v5795_v6  ;;  %v4213_v30 = vpop.f32.mrb[6].mxu0  ;;  %v5870_v60 = vsel %vm2959_vm8, %v3386_v54, %v3385_v35  ;;  %v3311_v7 = vrot.slane %v5832_v22, 1  ;;  %v3421_v43 = vrot.slane %v5832_v22, 4 }
 0x1c2   : > { %v2820_v2 = vadd.f32 %v4256_v25, %v5820_v21  ;;  %v4258_v12 = vadd.f32 %v4213_v30, %v5797_v46  ;;  %v2667_v37 = vpop.f32.mrb[7].mxu0  ;;  %v5877_v45 = vsel %vm2959_vm8, %v3458_v63, %v3457_v18  ;;  %v3422_v40 = vrot.slane %v5826_v10, 3 }
 0x1c3   : > { %v2818_v6 = vadd.f32 %v4257_v19, %v5820_v21  ;;  %v4259_v20 = vadd.f32 %v2667_v37, %v5799_v28  ;;  %v5884_v34 = vsel %vm2959_vm8, %v5826_v10, %v3311_v7  ;;  %vm2974_vm7 = vcmask 1046534  }
 0x1c4   : > { %vm2852_vm11 = vcmp.ge.f32.partialorder %v2820_v2, 0.0  ;;  %v2884_v31 = vmul.f32 0.01, %v2820_v2  ;;  %v2821_v57 = vadd.f32 %v4258_v12, %v5820_v21  ;;  %v5888_v46 = vsel %vm2959_vm8, %v3422_v40, %v3421_v43 }
 0x1c5   : > { %vm2850_vm12 = vcmp.ge.f32.partialorder %v2818_v6, 0.0  ;;  %v2882_v9 = vmul.f32 0.01, %v2818_v6  ;;  %v2819_v41 = vadd.f32 %v4259_v20, %v5820_v21  ;;  %vm2977_vm9 = vcmask 1047559  }
 0x1c6   : > { %v5891_v13 = vsel %vm2852_vm11, %v2820_v2, %v2884_v31  ;;  %vm2853_vm13 = vcmp.ge.f32.partialorder %v2821_v57, 0.0  ;;  %v2885_v36 = vmul.f32 0.01, %v2821_v57 }
 0x1c7   : > { %v5893_v28 = vsel %vm2850_vm12, %v2818_v6, %v2882_v9  ;;  %vm2851_vm15 = vcmp.ge.f32.partialorder %v2819_v41, 0.0  ;;  %v2883_v17 = vmul.f32 0.01, %v2819_v41  ;;  %v3194_v27 = vrot.slane %v5891_v13, 3 }
 0x1c8   : > { %v3192_v0 = vrot.slane %v5893_v28, 4  ;;  %v5896_v32 = vsel %vm2853_vm13, %v2821_v57, %v2885_v36  ;;  %v3038_v16 = vsel %vm2962_vm14, %v5893_v28, %v3037_v52  ;;  %v3039_v38 = vrot.slane %v5891_v13, 7 }
 0x1c9   : > { %v5902_v62 = vsel %vm2851_vm15, %v2819_v41, %v2883_v17  ;;  %v3078_v42 = vrot.slane %v5893_v28, 1  ;;  %v3152_v4 = vrot.slane %v5893_v28, 3  ;;  %v3154_v11 = vrot.slane %v5891_v13, 2 }
 0x1ca   : > { %v3193_v8 = vsel %vm2962_vm14, %v3192_v0, %v5835_v47  ;;  %v5912_v3 = vsel %vm2965_vm0, %v3039_v38, %v3038_v16  ;;  %v3000_v52 = vrot.slane %v5893_v28, 7  ;;  %v3002_v47 = vrot.slane %v5891_v13, 6 }
 0x1cb   : > { %v5909_v15 = vsel %vm2965_vm0, %v3194_v27, %v3193_v8  ;;  %v3079_v5 = vsel %vm2962_vm14, %v3078_v42, %v5843_v1  ;;  %v3153_v44 = vsel %vm2962_vm14, %v3152_v4, %v3151_v61  ;;  %v3115_v35 = vrot.slane %v5893_v28, 2 }
 0x1cc   : > { %v3080_v54 = vsel %vm2965_vm0, %v5891_v13, %v3079_v5  ;;  %v5924_v18 = vsel %vm2965_vm0, %v3154_v11, %v3153_v44  ;;  %v3001_v25 = vsel %vm2962_vm14, %v3000_v52, %v5848_v56  ;;  %v3117_v33 = vrot.slane %v5891_v13, 1 }
 0x1cd   : > { %v5930_v63 = vsel %vm2965_vm0, %v3002_v47, %v3001_v25  ;;  %v3116_v1 = vsel %vm2962_vm14, %v3115_v35, %v5852_v50  ;;  %v3498_v61 = vrot.slane %v5902_v62, 4  ;;  %v3500_v19 = vrot.slane %v5896_v32, 3 }
 0x1ce   : > { %v5937_v7 = vsel %vm2965_vm0, %v3117_v33, %v3116_v1  ;;  %v3229_v43 = vrot.slane %v5893_v28, 5  ;;  %v3231_v56 = vrot.slane %v5891_v13, 4  ;;  %v3350_v2 = vsel %vm2962_vm14, %v5902_v62, %v3349_v53 }
 0x1cf   : > { %v4216_v30 = vpop.f32.mrb[8].mxu0  ;;  %v3499_v50 = vsel %vm2962_vm14, %v3498_v61, %v5857_v39  ;;  %v3351_v40 = vrot.slane %v5896_v32, 7  ;;  %v3388_v6 = vrot.slane %v5902_v62, 1  ;;  %v3460_v53 = vrot.slane %v5902_v62, 3 }
 0x1d0   : > { %v4260_v12 = vadd.f32 %v4216_v30, %v5801_v51  ;;  %v2680_v37 = vpop.f32.mrb[9].mxu0  ;;  %v3501_v57 = vsel %vm2965_vm0, %v3500_v19, %v3499_v50  ;;  %v3230_v9 = vsel %vm2962_vm14, %v3229_v43, %v5864_v58  ;;  %v3462_v52 = vrot.slane %v5896_v32, 2 }
 0x1d1   : > { %v4261_v20 = vadd.f32 %v2680_v37, %v5803_v23  ;;  %v4217_v31 = vpop.f32.mrb[10].mxu0  ;;  %v3232_v39 = vsel %vm2965_vm0, %v3231_v56, %v3230_v9  ;;  %v5957_v17 = vsel %vm2965_vm0, %v3351_v40, %v3350_v2  ;;  %v3389_v27 = vsel %vm2962_vm14, %v3388_v6, %v5870_v60 }
 0x1d2   : > { %v2824_v51 = vadd.f32 %v4260_v12, %v5820_v21  ;;  %v4262_v41 = vadd.f32 %v4217_v31, %v5805_v29  ;;  %v2683_v36 = vpop.f32.mrb[11].mxu0  ;;  %v5965_v58 = vsel %vm2962_vm14, %v3460_v53, %v5877_v45  ;;  %v5970_v38 = vsel %vm2965_vm0, %v5896_v32, %v3389_v27 }
 0x1d3   : > { %v2822_v23 = vadd.f32 %v4261_v20, %v5820_v21  ;;  %v4263_v0 = vadd.f32 %v2683_v36, %v5807_v26  ;;  %v3531_v60 = vrot.slane %v5832_v22, 7  ;;  %v3532_v45 = vrot.slane %v5826_v10, 6 }
 0x1d4   : > { %vm2856_vm1 = vcmp.ge.f32.partialorder %v2824_v51, 0.0  ;;  %v2888_v16 = vmul.f32 0.01, %v2824_v51  ;;  %v2825_v29 = vadd.f32 %v4262_v41, %v5820_v21  ;;  %v3313_v1 = vrot.slane %v5902_v62, 7 }
 0x1d5   : > { %vm2854_vm2 = vcmp.ge.f32.partialorder %v2822_v23, 0.0  ;;  %v2886_v8 = vmul.f32 0.01, %v2822_v23  ;;  %v2823_v42 = vadd.f32 %v4263_v0, %v5820_v21 }
 0x1d6   : > { %v5973_v26 = vsel %vm2856_vm1, %v2824_v51, %v2888_v16  ;;  %vm2857_vm6 = vcmp.ge.f32.partialorder %v2825_v29, 0.0  ;;  %v2889_v5 = vmul.f32 0.01, %v2825_v29 }
 0x1d7   : > { %v5977_v4 = vsel %vm2854_vm2, %v2822_v23, %v2886_v8  ;;  %vm2855_vm5 = vcmp.ge.f32.partialorder %v2823_v42, 0.0  ;;  %v2887_v11 = vmul.f32 0.01, %v2823_v42  ;;  %v3198_v35 = vrot.slane %v5973_v26, 1 }
 0x1d8   : > { %v3196_v44 = vrot.slane %v5977_v4, 2  ;;  %v3041_v47 = vrot.slane %v5977_v4, 6  ;;  %v3081_v25 = vrot.slane %v5977_v4, 7  ;;  %v3156_v33 = vrot.slane %v5977_v4, 1 }
 0x1d9   : > { %v5986_v61 = vsel %vm2855_vm5, %v2823_v42, %v2887_v11  ;;  %v3004_v43 = vrot.slane %v5977_v4, 5  ;;  %v3043_v56 = vrot.slane %v5973_v26, 5  ;;  %v3083_v12 = vrot.slane %v5973_v26, 6 }
 0x1da   : > { %v3197_v19 = vsel %vm2968_vm3, %v3196_v44, %v5909_v15  ;;  %v3042_v30 = vsel %vm2968_vm3, %v3041_v47, %v5912_v3  ;;  %v3082_v2 = vsel %vm2968_vm3, %v3081_v25, %v3080_v54  ;;  %v3157_v37 = vsel %vm2968_vm3, %v3156_v33, %v5924_v18 }
 0x1db   : > { %v5999_v50 = vsel %vm2857_vm6, %v2825_v29, %v2889_v5  ;;  %v3199_v40 = vsel %vm2971_vm4, %v3198_v35, %v3197_v19  ;;  %v3005_v15 = vsel %vm2968_vm3, %v3004_v43, %v5930_v63  ;;  %v3006_v3 = vrot.slane %v5973_v26, 4 }
 0x1dc   : > { %v3044_v6 = vsel %vm2971_vm4, %v3043_v56, %v3042_v30  ;;  %v6007_v54 = vsel %vm2971_vm4, %v3083_v12, %v3082_v2  ;;  %v3120_v20 = vrot.slane %v5973_v26, 7  ;;  %v3502_v18 = vrot.slane %v5986_v61, 2 }
 0x1dd   : > { %v6013_v31 = vsel %vm2971_vm4, %v5973_v26, %v3157_v37  ;;  %v3119_v63 = vsel %vm2968_vm3, %v5977_v4, %v5937_v7  ;;  %v3233_v9 = vrot.slane %v5977_v4, 3  ;;  %v3353_v53 = vrot.slane %v5986_v61, 6 }
 0x1de   : > { %v6021_v41 = vsel %vm2971_vm4, %v3006_v3, %v3005_v15  ;;  %v3503_v36 = vsel %vm2968_vm3, %v3502_v18, %v3501_v57  ;;  %v3504_v23 = vrot.slane %v5999_v50, 1  ;;  %v3235_v0 = vrot.slane %v5973_v26, 2 }
 0x1df   : > { %v4220_v51 = vpop.f32.mrb[12].mxu0  ;;  %v3234_v29 = vsel %vm2968_vm3, %v3233_v9, %v3232_v39  ;;  %v3355_v7 = vrot.slane %v5999_v50, 5  ;;  %v3391_v8 = vrot.slane %v5986_v61, 7  ;;  %v3121_v5 = vsel %vm2971_vm4, %v3120_v20, %v3119_v63 }
 0x1e0   : > { %v4264_v27 = vadd.f32 %v4220_v51, %v5809_v55  ;;  %v2696_v16 = vpop.f32.mrb[13].mxu0  ;;  %v3505_v57 = vsel %vm2971_vm4, %v3504_v23, %v3503_v36  ;;  %v3393_v44 = vrot.slane %v5999_v50, 6  ;;  %v3354_v39 = vsel %vm2968_vm3, %v3353_v53, %v5957_v17 }
 0x1e1   : > { %v4265_v42 = vadd.f32 %v2696_v16, %v5811_v48  ;;  %v4221_v11 = vpop.f32.mrb[14].mxu0  ;;  %v3463_v25 = vsel %vm2965_vm0, %v3462_v52, %v5965_v58  ;;  %v3236_v19 = vsel %vm2971_vm4, %v3235_v0, %v3234_v29  ;;  %v6045_v30 = vsel %vm2962_vm14, %v3313_v1, %v5884_v34 }
 0x1e2   : > { %v2828_v47 = vadd.f32 %v4264_v27, %v5820_v21  ;;  %v4266_v55 = vadd.f32 %v4221_v11, %v5813_v24  ;;  %v2699_v35 = vpop.f32.mrb[15].mxu0  ;;  %v3392_v17 = vsel %vm2968_vm3, %v3391_v8, %v5970_v38  ;;  %v3464_v52 = vrot.slane %v5986_v61, 1 }
 0x1e3   : > { %v2826_v48 = vadd.f32 %v4265_v42, %v5820_v21  ;;  %v4267_v33 = vadd.f32 %v2699_v35, %v5815_v59  ;;  %v3356_v34 = vsel %vm2971_vm4, %v3355_v7, %v3354_v39  ;;  %v3394_v15 = vsel %vm2971_vm4, %v3393_v44, %v3392_v17 }
 0x1e4   : > { %vm2860_vm10 = vcmp.ge.f32.partialorder %v2828_v47, 0.0  ;;  %v2892_v43 = vmul.f32 0.01, %v2828_v47  ;;  %v2829_v24 = vadd.f32 %v4266_v55, %v5820_v21  ;;  %v3315_v20 = vrot.slane %v5896_v32, 6 }
 0x1e5   : > { %vm2858_vm11 = vcmp.ge.f32.partialorder %v2826_v48, 0.0  ;;  %v2890_v56 = vmul.f32 0.01, %v2826_v48  ;;  %v2827_v58 = vadd.f32 %v4267_v33, %v5820_v21  ;;  %v3465_v53 = vsel %vm2968_vm3, %v3464_v52, %v3463_v25 }
 0x1e6   : > { %v6052_v59 = vsel %vm2860_vm10, %v2828_v47, %v2892_v43  ;;  %vm2861_vm12 = vcmp.ge.f32.partialorder %v2829_v24, 0.0  ;;  %v2893_v2 = vmul.f32 0.01, %v2829_v24  ;;  %v3466_v42 = vsel %vm2971_vm4, %v5999_v50, %v3465_v53 }
 0x1e7   : > { %v6055_v1 = vsel %vm2858_vm11, %v2826_v48, %v2890_v56  ;;  %v2891_v12 = vmul.f32 0.01, %v2827_v58  ;;  %v3201_v37 = vrot.slane %v6052_v59, 7  ;;  %vm2859_vm13 = vcmp.ge.f32.partialorder %v2827_v58, 0.0 }
 0x1e8   : > { %v3200_v38 = vsel %vm2974_vm7, %v6055_v1, %v3199_v40  ;;  %v3045_v3 = vrot.slane %v6055_v1, 4  ;;  %v6063_v18 = vsel %vm2861_vm12, %v2829_v24, %v2893_v2  ;;  %v3085_v9 = vrot.slane %v6055_v1, 5 }
 0x1e9   : > { %v3202_v63 = vsel %vm2977_vm9, %v3201_v37, %v3200_v38  ;;  %v3047_v36 = vrot.slane %v6052_v59, 3  ;;  %v3159_v40 = vrot.slane %v6055_v1, 7  ;;  %v3008_v23 = vrot.slane %v6055_v1, 3 }
 0x1ea   : > { %3217 = vrot.lane.b32.xlu0 %v3202_v63, %s4553_s18  ;;  %v3046_v51 = vsel %vm2974_vm7, %v3045_v3, %v3044_v6  ;;  %v6073_v0 = vsel %vm2859_vm13, %v2827_v58, %v2891_v12  ;;  %v3086_v27 = vsel %vm2974_vm7, %v3085_v9, %v6007_v54  ;;  %v3087_v16 = vrot.slane %v6052_v59, 4 }
 0x1eb   : > { %v3122_v29 = vrot.slane %v6055_v1, 6  ;;  %v3048_v7 = vsel %vm2977_vm9, %v3047_v36, %v3046_v51  ;;  %v3160_v6 = vsel %vm2974_vm7, %v3159_v40, %v6013_v31  ;;  %v3161_v8 = vrot.slane %v6052_v59, 6 }
 0x1ec   : > { %v3088_v11 = vsel %vm2977_vm9, %v3087_v16, %v3086_v27  ;;  %v3009_v44 = vsel %vm2974_vm7, %v3008_v23, %v6021_v41  ;;  %v3010_v54 = vrot.slane %v6052_v59, 2  ;;  %v3124_v55 = vrot.slane %v6052_v59, 5 }
 0x1ed   : > { %v3123_v47 = vsel %vm2974_vm7, %v3122_v29, %v3121_v5  ;;  %v3507_v31 = vrot.slane %v6063_v18, 7  ;;  %v3237_v35 = vrot.slane %v6055_v1, 1  ;;  %v3357_v39 = vrot.slane %v6073_v0, 4 }
 0x1ee   : > { %3063 = vrot.lane.b32.xlu0 %v3048_v7, %s4554_s8  ;;  %v3162_v48 = vsel %vm2977_vm9, %v3161_v8, %v3160_v6  ;;  %v3506_v41 = vsel %vm2974_vm7, %v6073_v0, %v3505_v57  ;;  %v3395_v33 = vrot.slane %v6073_v0, 5  ;;  %v3467_v5 = vrot.slane %v6073_v0, 7 }
 0x1ef   : > { %v4224_v25 = vpop.f32.mrb[16].mxu0  ;;  %v3011_v24 = vsel %vm2977_vm9, %v3010_v54, %v3009_v44  ;;  %v6102_v17 = vsel %vm2977_vm9, %v3124_v55, %v3123_v47  ;;  %v3238_v56 = vsel %vm2974_vm7, %v3237_v35, %v3236_v19  ;;  %v3358_v58 = vsel %vm2974_vm7, %v3357_v39, %v3356_v34 }
 0x1f0   : > { %v2712_v43 = vpop.f32.mrb[17].mxu0  ;;  %v4178_v52 = vpop.f32.mrb[16].mxu1  ;;  %v3359_v12 = vrot.slane %v6063_v18, 3  ;;  %v3396_v57 = vsel %vm2974_vm7, %v3395_v33, %v3394_v15  ;;  %v3397_v37 = vrot.slane %v6063_v18, 4  ;;  %v3468_v38 = vsel %vm2974_vm7, %v3467_v5, %v3466_v42 }
 0x1f1   : > { %v4225_v2 = vpop.f32.mrb[18].mxu0  ;;  %v4268_v3 = vadd.f32 %v4224_v25, %v4178_v52  ;;  %v1854_v63 = vpop.f32.mrb[17].mxu1  ;;  %v6112_v19 = vsel %vm2977_vm9, %v3507_v31, %v3506_v41  ;;  %v3469_v34 = vrot.slane %v6063_v18, 6  ;;  %v3316_v53 = vsel %vm2965_vm0, %v3315_v20, %v6045_v30 }
 0x1f2   : > { %3103 = vrot.lane.b32.xlu0 %v3088_v11, %s4555_s9  ;;  %v2715_v9 = vpop.f32.mrb[19].mxu0  ;;  %v4269_v51 = vadd.f32 %v2712_v43, %v1854_v63  ;;  %v4179_v15 = vpop.f32.mrb[18].mxu1  ;;  %v6119_v36 = vsel %vm2977_vm9, %v6052_v59, %v3238_v56  ;;  %v6122_v40 = vsel %vm2977_vm9, %v3359_v12, %v3358_v58  ;;  %v3317_v23 = vrot.slane %v5986_v61, 5 }
 0x1f3   : > { %v2832_v27 = vadd.f32 %v4268_v3, %v5820_v21  ;;  %v4270_v16 = vadd.f32 %v4225_v2, %v4179_v15  ;;  %v1857_v29 = vpop.f32.mrb[19].mxu1  ;;  %v6127_v7 = vsel %vm2977_vm9, %v3397_v37, %v3396_v57  ;;  %v6130_v30 = vsel %vm2977_vm9, %v3469_v34, %v3468_v38 }
 0x1f4   : > { %v2830_v20 = vadd.f32 %v4269_v51, %v5820_v21  ;;  %v4271_v6 = vadd.f32 %v2715_v9, %v1857_v29  ;;  %v3319_v8 = vrot.slane %v5999_v50, 4  ;;  %v3321_v42 = vrot.slane %v6073_v0, 3 }
 0x1f5   : > { %vm2864_vm15 = vcmp.ge.f32.partialorder %v2832_v27, 0.0  ;;  %v2896_v11 = vmul.f32 0.01, %v2832_v27  ;;  %v2833_v44 = vadd.f32 %v4270_v16, %v5820_v21  ;;  %v3424_v54 = vrot.slane %v5902_v62, 2 }
 0x1f6   : > { %3177 = vrot.lane.b32.xlu0 %v3162_v48, %s4556_s10  ;;  %vm2862_vm1 = vcmp.ge.f32.partialorder %v2830_v20, 0.0  ;;  %v2894_v47 = vmul.f32 0.01, %v2830_v20  ;;  %v2831_v55 = vadd.f32 %v4271_v6, %v5820_v21  ;;  %v3318_v31 = vsel %vm2968_vm3, %v3317_v23, %v3316_v53 }
 0x1f7   : > { %v6140_v35 = vsel %vm2864_vm15, %v2832_v27, %v2896_v11  ;;  %vm2865_vm2 = vcmp.ge.f32.partialorder %v2833_v44, 0.0  ;;  %v2897_v39 = vmul.f32 0.01, %v2833_v44  ;;  %v3426_v25 = vrot.slane %v5896_v32, 1 }
 0x1f8   : > { %v2979_v41 = vrot.slane %v6140_v35, 7  ;;  %v6144_v33 = vsel %vm2862_vm1, %v2830_v20, %v2894_v47  ;;  %vm2863_vm5 = vcmp.ge.f32.partialorder %v2831_v55, 0.0  ;;  %v2895_v48 = vmul.f32 0.01, %v2831_v55 }
 0x1f9   : > { %v6146_v5 = vsel %vm2865_vm2, %v2833_v44, %v2897_v39  ;;  %v3425_v43 = vsel %vm2962_vm14, %v3424_v54, %v5888_v46  ;;  %v3429_v56 = vrot.slane %v5999_v50, 7  ;;  %v3431_v58 = vrot.slane %v6073_v0, 6 }
 0x1fa   : > { %3026 = vrot.lane.b32.xlu0 %v3011_v24, %s4557_s11  ;;  %v6155_v52 = vsel %vm2959_vm8, %v2979_v41, %v6144_v33  ;;  %v3293_v2 = vrot.slane %v6146_v5, 7  ;;  %v6158_v12 = vsel %vm2863_vm5, %v2831_v55, %v2895_v48  ;;  %v3427_v57 = vsel %vm2965_vm0, %v3426_v25, %v3425_v43 }
 0x1fb   : > { %v3323_v37 = vrot.slane %v6063_v18, 2  ;;  %v3428_v24 = vsel %vm2968_vm3, %v5986_v61, %v3427_v57  ;;  %v3533_v46 = vsel %vm2959_vm8, %v3532_v45, %v3531_v60  ;;  %v3534_v38 = vrot.slane %v5902_v62, 5 }
 0x1fc   : > { %v6172_v3 = vsel %vm2959_vm8, %v3293_v2, %v6158_v12  ;;  %v3320_v63 = vsel %vm2971_vm4, %v3319_v8, %v3318_v31  ;;  %v3536_v9 = vrot.slane %v5896_v32, 4  ;;  %v3538_v34 = vrot.slane %v5986_v61, 3 }
 0x1fd   : > { %v3322_v10 = vsel %vm2974_vm7, %v3321_v42, %v3320_v63  ;;  %v3430_v22 = vsel %vm2971_vm4, %v3429_v56, %v3428_v24  ;;  %v3433_v60 = vrot.slane %v6063_v18, 5  ;;  %v3535_v45 = vsel %vm2962_vm14, %v3534_v38, %v3533_v46 }
 0x1fe   : > { %3140 = vrot.lane.b32.xlu0 %v6102_v17, %s4558_s16  ;;  %v3432_v51 = vsel %vm2974_vm7, %v3431_v58, %v3430_v22  ;;  %v3537_v15 = vsel %vm2965_vm0, %v3536_v9, %v3535_v45  ;;  %v3203_v23 = vrot.slane %v6144_v33, 6  ;;  %v3204_v27 = vrot.slane %v6140_v35, 5 }
 0x1ff   : > { %v4228_v53 = vpop.f32.mrb[20].mxu0  ;;  %v3539_v17 = vsel %vm2968_vm3, %v3538_v34, %v3537_v15  ;;  %v3049_v29 = vrot.slane %v6144_v33, 2  ;;  %v3050_v20 = vrot.slane %v6140_v35, 1  ;;  %v3089_v6 = vrot.slane %v6144_v33, 3 }
 0x200   : > { %v2728_v16 = vpop.f32.mrb[21].mxu0  ;;  %v4182_v8 = vpop.f32.mrb[20].mxu1  ;;  %v3540_v11 = vrot.slane %v5999_v50, 2  ;;  %v3205_v44 = vsel %vm2959_vm8, %v3204_v27, %v3203_v23  ;;  %v3090_v54 = vrot.slane %v6140_v35, 2  ;;  %v3163_v47 = vrot.slane %v6144_v33, 5 }
 0x201   : > { %v4229_v42 = vpop.f32.mrb[22].mxu0  ;;  %v4272_v55 = vadd.f32 %v4228_v53, %v4182_v8  ;;  %v1870_v31 = vpop.f32.mrb[21].mxu1  ;;  %v3542_v25 = vrot.slane %v6073_v0, 1  ;;  %v3051_v41 = vsel %vm2959_vm8, %v3050_v20, %v3049_v29  ;;  %v3164_v48 = vrot.slane %v6140_v35, 4 }
 0x202   : > { %3523 = vrot.lane.b32.xlu0 %v6112_v19, %s4553_s18  ;;  %v2731_v39 = vpop.f32.mrb[23].mxu0  ;;  %v4273_v43 = vadd.f32 %v2728_v16, %v1870_v31  ;;  %v4183_v56 = vpop.f32.mrb[22].mxu1  ;;  %v3541_v58 = vsel %vm2971_vm4, %v3540_v11, %v3539_v17  ;;  %v3091_v2 = vsel %vm2959_vm8, %v3090_v54, %v3089_v6  ;;  %v3012_v57 = vrot.slane %v6144_v33, 1 }
 0x203   : > { %v2836_v24 = vadd.f32 %v4272_v55, %v5820_v21  ;;  %v4274_v46 = vadd.f32 %v4229_v42, %v4183_v56  ;;  %v1873_v38 = vpop.f32.mrb[23].mxu1  ;;  %v3165_v19 = vsel %vm2959_vm8, %v3164_v48, %v3163_v47  ;;  %v3126_v63 = vrot.slane %v6144_v33, 4 }
 0x204   : > { %v2834_v9 = vadd.f32 %v4273_v43, %v5820_v21  ;;  %v4275_v34 = vadd.f32 %v2731_v39, %v1873_v38  ;;  %v3013_v22 = vsel %vm2959_vm8, %v6140_v35, %v3012_v57  ;;  %v3127_v45 = vrot.slane %v6140_v35, 3 }
 0x205   : > { %vm2868_vm6 = vcmp.ge.f32.partialorder %v2836_v24, 0.0  ;;  %v2900_v53 = vmul.f32 0.01, %v2836_v24  ;;  %v2837_v15 = vadd.f32 %v4274_v46, %v5820_v21  ;;  %v3543_v23 = vsel %vm2974_vm7, %v3542_v25, %v3541_v58 }
 0x206   : > { %3254 = vrot.lane.b32.xlu0 %v6119_v36, %s4559_s17  ;;  %vm2866_vm10 = vcmp.ge.f32.partialorder %v2834_v9, 0.0  ;;  %v2898_v27 = vmul.f32 0.01, %v2834_v9  ;;  %v2835_v16 = vadd.f32 %v4275_v34, %v5820_v21  ;;  %v3128_v17 = vsel %vm2959_vm8, %v3127_v45, %v3126_v63 }
 0x207   : > { %v6216_v29 = vsel %vm2868_vm6, %v2836_v24, %v2900_v53  ;;  %vm2869_vm11 = vcmp.ge.f32.partialorder %v2837_v15, 0.0  ;;  %v2901_v20 = vmul.f32 0.01, %v2837_v15  ;;  %v6221_v6 = vsel %vm2977_vm9, %v3323_v37, %v3322_v10 }
 0x208   : > { %v6223_v8 = vsel %vm2866_vm10, %v2834_v9, %v2898_v27  ;;  %vm2867_vm12 = vcmp.ge.f32.partialorder %v2835_v16, 0.0  ;;  %v2899_v36 = vmul.f32 0.01, %v2835_v16  ;;  %v6226_v42 = vsel %vm2977_vm9, %v3433_v60, %v3432_v51 }
 0x209   : > { %v6232_v11 = vsel %vm2977_vm9, %v6063_v18, %v3543_v23  ;;  %v3206_v54 = vrot.slane %v6223_v8, 4  ;;  %v3509_v47 = vrot.slane %v6158_v12, 6  ;;  %v3510_v37 = vrot.slane %v6146_v5, 5 }
 0x20a   : > { %3375 = vrot.lane.b32.xlu0 %v6122_v40, %s4554_s8  ;;  %v6237_v10 = vsel %vm2869_vm11, %v2837_v15, %v2901_v20  ;;  %v3208_v55 = vrot.slane %v6216_v29, 3  ;;  %v3052_v60 = vsel %vm2962_vm14, %v6223_v8, %v3051_v41  ;;  %v3053_v51 = vrot.slane %v6216_v29, 7 }
 0x20b   : > { %v6243_v40 = vsel %vm2867_vm12, %v2835_v16, %v2899_v36  ;;  %v3207_v31 = vsel %vm2962_vm14, %v3206_v54, %v3205_v44  ;;  %v3092_v39 = vrot.slane %v6223_v8, 1  ;;  %v3166_v25 = vrot.slane %v6223_v8, 3 }
 0x20c   : > { %v6249_v48 = vsel %vm2965_vm0, %v3208_v55, %v3207_v31  ;;  %v6252_v43 = vsel %vm2965_vm0, %v3053_v51, %v3052_v60  ;;  %v3168_v56 = vrot.slane %v6216_v29, 2  ;;  %v3014_v41 = vrot.slane %v6223_v8, 7 }
 0x20d   : > { %v3093_v58 = vsel %vm2962_vm14, %v3092_v39, %v3091_v2  ;;  %v3167_v44 = vsel %vm2962_vm14, %v3166_v25, %v3165_v19  ;;  %v3016_v57 = vrot.slane %v6216_v29, 6  ;;  %v3129_v24 = vrot.slane %v6223_v8, 2 }
 0x20e   : > { %3413 = vrot.lane.b32.xlu0 %v6127_v7, %s4555_s9  ;;  %v6264_v38 = vsel %vm2965_vm0, %v6216_v29, %v3093_v58  ;;  %v6267_v63 = vsel %vm2965_vm0, %v3168_v56, %v3167_v44  ;;  %v3015_v9 = vsel %vm2962_vm14, %v3014_v41, %v3013_v22  ;;  %v3131_v7 = vrot.slane %v6216_v29, 1 }
 0x20f   : > { %v4232_v46 = vpop.f32.mrb[24].mxu0  ;;  %v6272_v2 = vsel %vm2965_vm0, %v3016_v57, %v3015_v9  ;;  %v3130_v19 = vsel %vm2962_vm14, %v3129_v24, %v3128_v17  ;;  %v3511_v45 = vsel %vm2959_vm8, %v3510_v37, %v3509_v47  ;;  %v3512_v53 = vrot.slane %v6243_v40, 4 }
 0x210   : > { %v2744_v34 = vpop.f32.mrb[25].mxu0  ;;  %v4186_v15 = vpop.f32.mrb[24].mxu1  ;;  %v6278_v27 = vsel %vm2965_vm0, %v3131_v7, %v3130_v19  ;;  %v3514_v16 = vrot.slane %v6237_v10, 3  ;;  %v3240_v22 = vrot.slane %v6144_v33, 7  ;;  %v3241_v20 = vrot.slane %v6140_v35, 6 }
 0x211   : > { %v4233_v23 = vpop.f32.mrb[26].mxu0  ;;  %v4276_v36 = vadd.f32 %v4232_v46, %v4186_v15  ;;  %v1886_v54 = vpop.f32.mrb[25].mxu1  ;;  %v3513_v47 = vsel %vm2962_vm14, %v3512_v53, %v3511_v45  ;;  %v3243_v37 = vrot.slane %v6223_v8, 5  ;;  %v3245_v55 = vrot.slane %v6216_v29, 4 }
 0x212   : > { %3485 = vrot.lane.b32.xlu0 %v6130_v30, %s4556_s10  ;;  %v2747_v17 = vpop.f32.mrb[27].mxu0  ;;  %v4277_v60 = vadd.f32 %v2744_v34, %v1886_v54  ;;  %v4187_v51 = vpop.f32.mrb[26].mxu1  ;;  %v6289_v31 = vsel %vm2965_vm0, %v3514_v16, %v3513_v47  ;;  %v3242_v33 = vsel %vm2959_vm8, %v3241_v20, %v3240_v22  ;;  %v3361_v35 = vrot.slane %v6158_v12, 2 }
 0x213   : > { %v2840_v39 = vadd.f32 %v4276_v36, %v5820_v21  ;;  %v4278_v25 = vadd.f32 %v4233_v23, %v4187_v51  ;;  %v1889_v30 = vpop.f32.mrb[27].mxu1  ;;  %v3244_v56 = vsel %vm2962_vm14, %v3243_v37, %v3242_v33  ;;  %v3362_v41 = vrot.slane %v6146_v5, 1 }
 0x214   : > { %v2838_v58 = vadd.f32 %v4277_v60, %v5820_v21  ;;  %v4279_v44 = vadd.f32 %v2747_v17, %v1889_v30  ;;  %v3246_v57 = vsel %vm2965_vm0, %v3245_v55, %v3244_v56  ;;  %v3365_v24 = vrot.slane %v6237_v10, 7 }
 0x215   : > { %vm2872_vm13 = vcmp.ge.f32.partialorder %v2840_v39, 0.0  ;;  %v2904_v46 = vmul.f32 0.01, %v2840_v39  ;;  %v2841_v9 = vadd.f32 %v4278_v25, %v5820_v21  ;;  %v3363_v7 = vsel %vm2959_vm8, %v3362_v41, %v3361_v35 }
 0x216   : > { %3339 = vrot.lane.b32.xlu0 %v6221_v6, %s4557_s11  ;;  %vm2870_vm15 = vcmp.ge.f32.partialorder %v2838_v58, 0.0  ;;  %v2902_v34 = vmul.f32 0.01, %v2838_v58  ;;  %v2839_v19 = vadd.f32 %v4279_v44, %v5820_v21  ;;  %v3364_v45 = vsel %vm2962_vm14, %v6243_v40, %v3363_v7 }
 0x217   : > { %v6306_v53 = vsel %vm2872_vm13, %v2840_v39, %v2904_v46  ;;  %vm2873_vm1 = vcmp.ge.f32.partialorder %v2841_v9, 0.0  ;;  %v2905_v15 = vmul.f32 0.01, %v2841_v9  ;;  %v3366_v23 = vsel %vm2965_vm0, %v3365_v24, %v3364_v45 }
 0x218   : > { %v6309_v16 = vsel %vm2870_vm15, %v2838_v58, %v2902_v34  ;;  %vm2871_vm2 = vcmp.ge.f32.partialorder %v2839_v19, 0.0  ;;  %v2903_v22 = vmul.f32 0.01, %v2839_v19  ;;  %v3212_v6 = vrot.slane %v6306_v53, 1 }
 0x219   : > { %v6312_v20 = vsel %vm2873_vm1, %v2841_v9, %v2905_v15  ;;  %v3210_v21 = vrot.slane %v6309_v16, 2  ;;  %v3055_v36 = vrot.slane %v6309_v16, 6  ;;  %v3057_v54 = vrot.slane %v6306_v53, 5 }
 0x21a   : > { %3449 = vrot.lane.b32.xlu0 %v6226_v42, %s4558_s16  ;;  %v6319_v17 = vsel %vm2871_vm2, %v2839_v19, %v2903_v22  ;;  %v3095_v47 = vrot.slane %v6309_v16, 7  ;;  %v3097_v37 = vrot.slane %v6306_v53, 6  ;;  %v3170_v55 = vrot.slane %v6309_v16, 1 }
 0x21b   : > { %v3211_v60 = vsel %vm2968_vm3, %v3210_v21, %v6249_v48  ;;  %v3056_v42 = vsel %vm2968_vm3, %v3055_v36, %v6252_v43  ;;  %v3018_v51 = vrot.slane %v6309_v16, 5  ;;  %v3020_v33 = vrot.slane %v6306_v53, 4 }
 0x21c   : > { %v6331_v35 = vsel %vm2971_vm4, %v3212_v6, %v3211_v60  ;;  %v6334_v39 = vsel %vm2971_vm4, %v3057_v54, %v3056_v42  ;;  %v3096_v25 = vsel %vm2968_vm3, %v3095_v47, %v6264_v38  ;;  %v3171_v30 = vsel %vm2968_vm3, %v3170_v55, %v6267_v63 }
 0x21d   : > { %v6343_v48 = vsel %vm2971_vm4, %v3097_v37, %v3096_v25  ;;  %v6347_v43 = vsel %vm2971_vm4, %v6306_v53, %v3171_v30  ;;  %v3019_v56 = vsel %vm2968_vm3, %v3018_v51, %v6272_v2  ;;  %v3133_v38 = vsel %vm2968_vm3, %v6309_v16, %v6278_v27 }
 0x21e   : > { %3559 = vrot.lane.b32.xlu0 %v6232_v11, %s4559_s17  ;;  %v6355_v63 = vsel %vm2971_vm4, %v3020_v33, %v3019_v56  ;;  %v3134_v11 = vrot.slane %v6306_v53, 7  ;;  %v3516_v58 = vrot.slane %v6319_v17, 2  ;;  %v3518_v44 = vrot.slane %v6312_v20, 1  ;;  %v4526_v33 = vld [vmem:[%s6692_s2] ss:$0 sm:$0xff] }
 0x21f   : > { %v4236_v41 = vpop.f32.mrb[28].mxu0  ;;  %v3247_v46 = vrot.slane %v6309_v16, 3  ;;  %v3249_v9 = vrot.slane %v6306_v53, 2  ;;  %v3367_v2 = vrot.slane %v6319_v17, 6  ;;  %v3369_v7 = vrot.slane %v6312_v20, 5 }
 0x220   : > { %v2760_v24 = vpop.f32.mrb[29].mxu0  ;;  %v4190_v27 = vpop.f32.mrb[28].mxu1  ;;  %v6365_v19 = vsel %vm2971_vm4, %v3134_v11, %v3133_v38  ;;  %v3517_v45 = vsel %vm2968_vm3, %v3516_v58, %v6289_v31  ;;  %v3399_v15 = vrot.slane %v6158_v12, 3  ;;  %v3400_v22 = vrot.slane %v6146_v5, 2 }
 0x221   : > { %v4237_v34 = vpop.f32.mrb[30].mxu0  ;;  %v4280_v6 = vadd.f32 %v4236_v41, %v4190_v27  ;;  %v1902_v21 = vpop.f32.mrb[29].mxu1  ;;  %v3519_v54 = vsel %vm2971_vm4, %v3518_v44, %v3517_v45  ;;  %v3248_v47 = vsel %vm2968_vm3, %v3247_v46, %v3246_v57  ;;  %v3368_v37 = vsel %vm2968_vm3, %v3367_v2, %v3366_v23 }
 0x222   : > { %v2763_v36 = vpop.f32.mrb[31].mxu0  ;;  %v4281_v55 = vadd.f32 %v2760_v24, %v1902_v21  ;;  %v4191_v60 = vpop.f32.mrb[30].mxu1  ;;  %v6375_v42 = vsel %vm2971_vm4, %v3249_v9, %v3248_v47  ;;  %v6378_v31 = vsel %vm2971_vm4, %v3369_v7, %v3368_v37  ;;  %v3401_v51 = vsel %vm2959_vm8, %v3400_v22, %v3399_v15 }
 0x223   : > { %v2844_v25 = vadd.f32 %v4526_v33, %v4280_v6  ;;  %v4282_v30 = vadd.f32 %v4237_v34, %v4191_v60  ;;  %v1905_v56 = vpop.f32.mrb[31].mxu1  ;;  %v3402_v57 = vrot.slane %v6243_v40, 1  ;;  %v3405_v23 = vrot.slane %v6319_v17, 7 }
 0x224   : > { %v2842_v38 = vadd.f32 %v4526_v33, %v4281_v55  ;;  %v4283_v41 = vadd.f32 %v2763_v36, %v1905_v56  ;;  %v3407_v11 = vrot.slane %v6312_v20, 6  ;;  %v3471_v58 = vrot.slane %v6158_v12, 5 }
 0x225   : > { %vm2876_vm5 = vcmp.ge.f32.partialorder %v2844_v25, 0.0  ;;  %v2908_v44 = vmul.f32 0.01, %v2844_v25  ;;  %v2845_v24 = vadd.f32 %v4526_v33, %v4282_v30  ;;  %v3403_v46 = vsel %vm2962_vm14, %v3402_v57, %v3401_v51 }
 0x226   : > { %vm2874_vm6 = vcmp.ge.f32.partialorder %v2842_v38, 0.0  ;;  %v2906_v9 = vmul.f32 0.01, %v2842_v38  ;;  %v2843_v2 = vadd.f32 %v4526_v33, %v4283_v41  ;;  %v3404_v7 = vsel %vm2965_vm0, %v6237_v10, %v3403_v46 }
 0x227   : > { %v6391_v27 = vsel %vm2876_vm5, %v2844_v25, %v2908_v44  ;;  %vm2877_vm10 = vcmp.ge.f32.partialorder %v2845_v24, 0.0  ;;  %v2909_v34 = vmul.f32 0.01, %v2845_v24  ;;  %v3406_v45 = vsel %vm2968_vm3, %v3405_v23, %v3404_v7 }
 0x228   : > { %v6394_v15 = vsel %vm2874_vm6, %v2842_v38, %v2906_v9  ;;  %vm2875_vm11 = vcmp.ge.f32.partialorder %v2843_v2, 0.0  ;;  %v2907_v22 = vmul.f32 0.01, %v2843_v2  ;;  %v3215_v6 = vrot.slane %v6391_v27, 7 }
 0x229   : > { %v6397_v21 = vsel %vm2877_vm10, %v2845_v24, %v2909_v34  ;;  %v3214_v36 = vsel %vm2974_vm7, %v6394_v15, %v6331_v35  ;;  %v3059_v47 = vrot.slane %v6394_v15, 4  ;;  %v3061_v37 = vrot.slane %v6391_v27, 3 }
 0x22a   : > { %v6404_v55 = vsel %vm2875_vm11, %v2843_v2, %v2907_v22  ;;  %v3216_v60 = vsel %vm2977_vm9, %v3215_v6, %v3214_v36  ;;  %v3099_v51 = vrot.slane %v6394_v15, 5  ;;  %v3101_v33 = vrot.slane %v6391_v27, 4 }
 0x22b   : > { %3219 = vrot.lane.b32.xlu1 %v3216_v60, %s4553_s18  ;;  %v3060_v25 = vsel %vm2974_vm7, %v3059_v47, %v6334_v39  ;;  %v3173_v30 = vrot.slane %v6394_v15, 7  ;;  %v3175_v35 = vrot.slane %v6391_v27, 6  ;;  %v3022_v56 = vrot.slane %v6394_v15, 3 }
 0x22c   : > { %v3062_v57 = vsel %vm2977_vm9, %v3061_v37, %v3060_v25  ;;  %v3100_v23 = vsel %vm2974_vm7, %v3099_v51, %v6343_v48  ;;  %v3024_v38 = vrot.slane %v6391_v27, 2  ;;  %v3136_v41 = vrot.slane %v6394_v15, 6 }
 0x22d   : > { %v3102_v44 = vsel %vm2977_vm9, %v3101_v33, %v3100_v23  ;;  %v3174_v39 = vsel %vm2974_vm7, %v3173_v30, %v6347_v43  ;;  %v3023_v24 = vsel %vm2974_vm7, %v3022_v56, %v6355_v63  ;;  %v3138_v46 = vrot.slane %v6391_v27, 5 }
 0x22e   : > { %v3176_v9 = vsel %vm2977_vm9, %v3175_v35, %v3174_v39  ;;  %v3025_v2 = vsel %vm2977_vm9, %v3024_v38, %v3023_v24  ;;  %v3137_v48 = vsel %vm2974_vm7, %v3136_v41, %v6365_v19  ;;  %v3520_v7 = vsel %vm2974_vm7, %v6404_v55, %v3519_v54 }
 0x22f   : > { %3065 = vrot.lane.b32.xlu1 %v3062_v57, %s4554_s8  ;;  %v6434_v34 = vsel %vm2977_vm9, %v3138_v46, %v3137_v48  ;;  %v3521_v43 = vrot.slane %v6397_v21, 7  ;;  %v3251_v63 = vrot.slane %v6394_v15, 1  ;;  %v3371_v22 = vrot.slane %v6404_v55, 4 }
 0x230   : > { %v3373_v6 = vrot.slane %v6397_v21, 3  ;;  %v3408_v36 = vsel %vm2971_vm4, %v3407_v11, %v3406_v45  ;;  %v3409_v19 = vrot.slane %v6404_v55, 5  ;;  %v3411_v47 = vrot.slane %v6397_v21, 4 }
 0x231   : > { %v6444_v54 = vsel %vm2977_vm9, %v3521_v43, %v3520_v7  ;;  %v3252_v37 = vsel %vm2974_vm7, %v3251_v63, %v6375_v42  ;;  %v3372_v60 = vsel %vm2974_vm7, %v3371_v22, %v6378_v31  ;;  %v3472_v51 = vrot.slane %v6146_v5, 4 }
 0x232   : > { %v6453_v33 = vsel %vm2977_vm9, %v6391_v27, %v3252_v37  ;;  %v6456_v11 = vsel %vm2977_vm9, %v3373_v6, %v3372_v60  ;;  %v3410_v45 = vsel %vm2974_vm7, %v3409_v19, %v3408_v36  ;;  %v3474_v25 = vrot.slane %v6243_v40, 3 }
 0x233   : > { %3105 = vrot.lane.b32.xlu1 %v3102_v44, %s4555_s9  ;;  %v6462_v42 = vsel %vm2977_vm9, %v3411_v47, %v3410_v45  ;;  %v3473_v31 = vsel %vm2959_vm8, %v3472_v51, %v3471_v58  ;;  %v3476_v30 = vrot.slane %v6237_v10, 2  ;;  %v3478_v35 = vrot.slane %v6319_v17, 1 }
 0x234   : > { %v3475_v56 = vsel %vm2962_vm14, %v3474_v25, %v3473_v31  ;;  %v3481_v57 = vrot.slane %v6404_v55, 7  ;;  %v3325_v23 = vrot.slane %v6158_v12, 1  ;;  %v3483_v41 = vrot.slane %v6397_v21, 6 }
 0x235   : > { %v3477_v38 = vsel %vm2965_vm0, %v3476_v30, %v3475_v56  ;;  %v3327_v44 = vrot.slane %v6243_v40, 7  ;;  %v3331_v39 = vrot.slane %v6319_v17, 5  ;;  %v3329_v46 = vrot.slane %v6237_v10, 6 }
 0x236   : > { %v3479_v58 = vsel %vm2968_vm3, %v3478_v35, %v3477_v38  ;;  %v3326_v24 = vsel %vm2959_vm8, %v6146_v5, %v3325_v23  ;;  %v3333_v48 = vrot.slane %v6312_v20, 4  ;;  %v3335_v63 = vrot.slane %v6404_v55, 3 }
 0x237   : > { %3179 = vrot.lane.b32.xlu1 %v3176_v9, %s4556_s10  ;;  %v3480_v7 = vsel %vm2971_vm4, %v6312_v20, %v3479_v58  ;;  %v3328_v43 = vsel %vm2962_vm14, %v3327_v44, %v3326_v24  ;;  %v3435_v22 = vrot.slane %v6158_v12, 4  ;;  %v3436_v19 = vrot.slane %v6146_v5, 3 }
 0x238   : > { %v3482_v6 = vsel %vm2974_vm7, %v3481_v57, %v3480_v7  ;;  %v3330_v36 = vsel %vm2965_vm0, %v3329_v46, %v3328_v43  ;;  %v3438_v47 = vrot.slane %v6243_v40, 2  ;;  %v3337_v60 = vrot.slane %v6397_v21, 2 }
 0x239   : > { %v6490_v37 = vsel %vm2977_vm9, %v3483_v41, %v3482_v6  ;;  %v3332_v9 = vsel %vm2968_vm3, %v3331_v39, %v3330_v36  ;;  %v3440_v51 = vrot.slane %v6237_v10, 1  ;;  %v3437_v25 = vsel %vm2959_vm8, %v3436_v19, %v3435_v22 }
 0x23a   : > { %v3334_v45 = vsel %vm2971_vm4, %v3333_v48, %v3332_v9  ;;  %v3443_v31 = vrot.slane %v6312_v20, 7  ;;  %v3445_v30 = vrot.slane %v6404_v55, 6  ;;  %v3439_v56 = vsel %vm2962_vm14, %v3438_v47, %v3437_v25 }
 0x23b   : > { %3028 = vrot.lane.b32.xlu1 %v3025_v2, %s4557_s11  ;;  %v3336_v35 = vsel %vm2974_vm7, %v3335_v63, %v3334_v45  ;;  %v3545_v57 = vrot.slane %v6158_v12, 7  ;;  %v3546_v23 = vrot.slane %v6146_v5, 6  ;;  %v2961_v38 = vrot.slane %v5893_v28, 6 }
 0x23c   : > { %v6506_v41 = vsel %vm2977_vm9, %v3337_v60, %v3336_v35  ;;  %v3441_v44 = vsel %vm2965_vm0, %v3440_v51, %v3439_v56  ;;  %v3548_v39 = vrot.slane %v6243_v40, 5  ;;  %v3550_v24 = vrot.slane %v6237_v10, 4 }
 0x23d   : > { %v3442_v2 = vsel %vm2968_vm3, %v6319_v17, %v3441_v44  ;;  %v3547_v58 = vsel %vm2959_vm8, %v3546_v23, %v3545_v57  ;;  %v3552_v12 = vrot.slane %v6319_v17, 3  ;;  %v3447_v28 = vrot.slane %v6397_v21, 5 }
 0x23e   : > { %v3444_v5 = vsel %vm2971_vm4, %v3443_v31, %v3442_v2  ;;  %v3549_v46 = vsel %vm2962_vm14, %v3548_v39, %v3547_v58  ;;  %v3556_v48 = vrot.slane %v6404_v55, 1  ;;  %v2964_v7 = vrot.slane %v5891_v13, 5 }
 0x23f   : > { %3142 = vrot.lane.b32.xlu1 %v6434_v34, %s4558_s16  ;;  %v3446_v43 = vsel %vm2974_vm7, %v3445_v30, %v3444_v5  ;;  %v3551_v63 = vsel %vm2965_vm0, %v3550_v24, %v3549_v46  ;;  %v3554_v22 = vrot.slane %v6312_v20, 2  ;;  %v3283_v6 = vrot.slane %v5896_v32, 5 }
 0x240   : > { %v3448_v36 = vsel %vm2977_vm9, %v3447_v28, %v3446_v43  ;;  %v3553_v19 = vsel %vm2968_vm3, %v3552_v12, %v3551_v63  ;;  %v2963_v47 = vsel %vm2962_vm14, %v2961_v38, %v5829_v49  ;;  %v3281_v13 = vrot.slane %v5902_v62, 6 }
 0x241   : > { %v3555_v34 = vsel %vm2971_vm4, %v3554_v22, %v3553_v19  ;;  %v2966_v9 = vsel %vm2965_vm0, %v2964_v7, %v2963_v47  ;;  %v2967_v60 = vrot.slane %v5977_v4, 4  ;;  %v2983_v51 = vrot.slane %v6216_v29, 5 }
 0x242   : > { %v3557_v32 = vsel %vm2974_vm7, %v3556_v48, %v3555_v34  ;;  %v2970_v45 = vrot.slane %v5973_v26, 3  ;;  %v2973_v25 = vrot.slane %v6055_v1, 2  ;;  %v2981_v31 = vrot.slane %v6223_v8, 6 }
 0x243   : > { %v3297_v49 = vrot.slane %v6237_v10, 5  ;;  %3525 = vrot.lane.b32.xlu1 %v6444_v54, %s4553_s18  ;;  %v3558_v62 = vsel %vm2977_vm9, %v6397_v21, %v3557_v32  ;;  %v2969_v4 = vsel %vm2968_vm3, %v2967_v60, %v2966_v9  ;;  %v3295_v29 = vrot.slane %v6243_v40, 6 }
 0x244   : > { %v2972_v26 = vsel %vm2971_vm4, %v2970_v45, %v2969_v4  ;;  %v2976_v1 = vrot.slane %v6052_v59, 1  ;;  %vm2995_vm8 = vcmask 392192   ;;  %v3282_v10 = vsel %vm2962_vm14, %v3281_v13, %v5839_v14 }
 0x245   : > { %v2975_v8 = vsel %vm2974_vm7, %v2973_v25, %v2972_v26  ;;  %v3285_v54 = vrot.slane %v5986_v61, 4  ;;  %v3287_v40 = vrot.slane %v5999_v50, 3  ;;  %v3284_v35 = vsel %vm2965_vm0, %v3283_v6, %v3282_v10 }
 0x246   : > { %v2978_v30 = vsel %vm2977_vm9, %v2976_v1, %v2975_v8  ;;  %v3289_v56 = vrot.slane %v6073_v0, 2  ;;  %v3291_v57 = vrot.slane %v6063_v18, 1  ;;  %v2982_v14 = vsel %vm2962_vm14, %v2981_v31, %v6155_v52 }
 0x247   : > { %3256 = vrot.lane.b32.xlu1 %v6453_v33, %s4559_s17  ;;  %2996 = vst.msk [vmem:[%s6550_s23] sm:$0xff] %vm2995_vm8, %v2978_v30  ;;  %v3286_v59 = vsel %vm2968_vm3, %v3285_v54, %v3284_v35  ;;  %v2985_v61 = vrot.slane %v6309_v16, 4  ;;  %v2987_v50 = vrot.slane %v6306_v53, 3  ;;  %v2984_v0 = vsel %vm2965_vm0, %v2983_v51, %v2982_v14 }
 0x248   : > { %v3288_v23 = vsel %vm2971_vm4, %v3287_v40, %v3286_v59  ;;  %v2991_v18 = vrot.slane %v6391_v27, 1  ;;  %v2989_v33 = vrot.slane %v6394_v15, 2  ;;  %v3296_v52 = vsel %vm2962_vm14, %v3295_v29, %v6172_v3 }
 0x249   : > { %v3290_v38 = vsel %vm2974_vm7, %v3289_v56, %v3288_v23  ;;  %v2986_v44 = vsel %vm2968_vm3, %v2985_v61, %v2984_v0  ;;  %v3299_v16 = vrot.slane %v6319_v17, 4  ;;  %v3298_v2 = vsel %vm2965_vm0, %v3297_v49, %v3296_v52 }
 0x24a   : > { %v3292_v53 = vsel %vm2977_vm9, %v3291_v57, %v3290_v38  ;;  %v2988_v39 = vsel %vm2971_vm4, %v2987_v50, %v2986_v44  ;;  %v3301_v27 = vrot.slane %v6312_v20, 3  ;;  %v3303_v17 = vrot.slane %v6404_v55, 2 }
 0x24b   : > { %3377 = vrot.lane.b32.xlu1 %v6456_v11, %s4554_s8  ;;  %3309 = vst.msk [vmem:[%s6550_s23 + $0x18] sm:$0xff] %vm2995_vm8, %v3292_v53  ;;  %v2990_v15 = vsel %vm2974_vm7, %v2989_v33, %v2988_v39  ;;  %v3300_v3 = vsel %vm2968_vm3, %v3299_v16, %v3298_v2  ;;  %v3305_v12 = vrot.slane %v6397_v21, 1  ;;  %vm3071_vm14 = vcmask 130048  }
 0x24c   : > { %v2992_v58 = vsel %vm2977_vm9, %v2991_v18, %v2990_v15  ;;  %v3302_v24 = vsel %vm2971_vm4, %v3301_v27, %v3300_v3  ;;  %vm3109_vm0 = vcmask 523392   ;;  %vm3185_vm3 = vcmask 261120  }
 0x24d   : > { %2997 = vst.msk [vmem:[%s6550_s23 + $0x30] sm:$0xff] %vm2995_vm8, %v2992_v58  ;;  %v3304_v20 = vsel %vm2974_vm7, %v3303_v17, %v3302_v24  ;;  %vm3223_vm4 = vcmask 654592   ;;  %vm3032_vm7 = vcmask 785792   ;;  %vm3146_vm12 = vcmask 916992  }
 0x24e   : > { %v3306_v11 = vsel %vm2977_vm9, %v3305_v12, %v3304_v20  ;;  %vm3069_vm9 = vcmask 1048320   ;;  %vm3183_vm13 = vcmask 1048448   ;;  %vm3260_vm15 = vcmask 1048192  }
 0x24f   : > { %3415 = vrot.lane.b32.xlu1 %v6462_v42, %s4555_s9  ;;  %3310 = vst.msk [vmem:[%s6550_s23 + $0x48] sm:$0xff] %vm2995_vm8, %v3306_v11 }
 0x253   : > { %3487 = vrot.lane.b32.xlu1 %v6490_v37, %s4556_s10 }
 0x257   : > { %3341 = vrot.lane.b32.xlu1 %v6506_v41, %s4557_s11 }
 0x25b   : > { %3451 = vrot.lane.b32.xlu1 %v3448_v36, %s4558_s16 }
 0x25c   : > { %v3218_v21 = vpop.permute.xlu0 %3217 }
 0x25f   : > { %3561 = vrot.lane.b32.xlu1 %v3558_v62, %s4559_s17 }
 0x260   : > { %v3064_v55 = vpop.permute.xlu0 %3063 }
 0x261   : > { %3072 = vst.msk [vmem:[%s6550_s23 + $0x8] sm:$0xff] %vm3071_vm14, %v3064_v55 }
 0x264   : > { %v3104_v42 = vpop.permute.xlu0 %3103 }
 0x265   : > { %3110 = vst.msk [vmem:[%s6550_s23 + $0x8] sm:$0xff] %vm3109_vm0, %v3104_v42 }
 0x268   : > { %v3178_v37 = vpop.permute.xlu0 %3177 }
 0x269   : > { %3186 = vst.msk [vmem:[%s6550_s23 + $0x10] sm:$0xff] %vm3185_vm3, %v3178_v37 }
 0x26a   : > { %3224 = vst.msk [vmem:[%s6550_s23 + $0x10] sm:$0xff] %vm3223_vm4, %v3218_v21 }
 0x26c   : > { %v3027_v41 = vpop.permute.xlu0 %3026 }
 0x26d   : > { %3033 = vst.msk [vmem:[%s6550_s23] sm:$0xff] %vm3032_vm7, %v3027_v41 }
 0x26e   : > { %3070 = vst.msk [vmem:[%s6550_s23] sm:$0xff] %vm3069_vm9, %v3064_v55 }
 0x270   : > { %v3141_v5 = vpop.permute.xlu0 %3140 }
 0x271   : > { %3147 = vst.msk [vmem:[%s6550_s23 + $0x8] sm:$0xff] %vm3146_vm12, %v3141_v5 }
 0x272   : > { %3184 = vst.msk [vmem:[%s6550_s23 + $0x8] sm:$0xff] %vm3183_vm13, %v3178_v37 }
 0x274   : > { %v3524_v28 = vpop.permute.xlu0 %3523 }
 0x278   : > { %v3255_v46 = vpop.permute.xlu0 %3254 }
 0x279   : > { %3261 = vst.msk [vmem:[%s6550_s23 + $0x10] sm:$0xff] %vm3260_vm15, %v3255_v46 }
 0x27c   : > { %v3376_v48 = vpop.permute.xlu0 %3375 }
 0x27d   : > { %3382 = vst.msk [vmem:[%s6550_s23 + $0x20] sm:$0xff] %vm3071_vm14, %v3376_v48 }
 0x280   : > { %v3414_v7 = vpop.permute.xlu0 %3413 }
 0x281   : > { %3419 = vst.msk [vmem:[%s6550_s23 + $0x20] sm:$0xff] %vm3109_vm0, %v3414_v7 }
 0x284   : > { %v3486_v43 = vpop.permute.xlu0 %3485 }
 0x285   : > { %3492 = vst.msk [vmem:[%s6550_s23 + $0x28] sm:$0xff] %vm3185_vm3, %v3486_v43 }
 0x286   : > { %3529 = vst.msk [vmem:[%s6550_s23 + $0x28] sm:$0xff] %vm3223_vm4, %v3524_v28 }
 0x288   : > { %v3340_v63 = vpop.permute.xlu0 %3339 }
 0x289   : > { %3345 = vst.msk [vmem:[%s6550_s23 + $0x18] sm:$0xff] %vm3032_vm7, %v3340_v63 }
 0x28a   : > { %3381 = vst.msk [vmem:[%s6550_s23 + $0x18] sm:$0xff] %vm3069_vm9, %v3376_v48 }
 0x28c   : > { %v3450_v22 = vpop.permute.xlu0 %3449 }
 0x28d   : > { %3455 = vst.msk [vmem:[%s6550_s23 + $0x20] sm:$0xff] %vm3146_vm12, %v3450_v22 }
 0x28e   : > { %3491 = vst.msk [vmem:[%s6550_s23 + $0x20] sm:$0xff] %vm3183_vm13, %v3486_v43 }
 0x290   : > { %v3560_v6 = vpop.permute.xlu0 %3559 }
 0x291   : > { %3565 = vst.msk [vmem:[%s6550_s23 + $0x28] sm:$0xff] %vm3260_vm15, %v3560_v6 }
 0x29d   : > { %v3220_v36 = vpop.permute.xlu1 %3219 }
 0x2a1   : > { %v3066_v19 = vpop.permute.xlu1 %3065 }
 0x2a2   : > { %3074 = vst.msk [vmem:[%s6550_s23 + $0x38] sm:$0xff] %vm3071_vm14, %v3066_v19 }
 0x2a5   : > { %v3106_v47 = vpop.permute.xlu1 %3105 }
 0x2a6   : > { %3111 = vst.msk [vmem:[%s6550_s23 + $0x38] sm:$0xff] %vm3109_vm0, %v3106_v47 }
 0x2a9   : > { %v3180_v13 = vpop.permute.xlu1 %3179 }
 0x2aa   : > { %3188 = vst.msk [vmem:[%s6550_s23 + $0x40] sm:$0xff] %vm3185_vm3, %v3180_v13 }
 0x2ab   : > { %3225 = vst.msk [vmem:[%s6550_s23 + $0x40] sm:$0xff] %vm3223_vm4, %v3220_v36 }
 0x2ad   : > { %v3029_v34 = vpop.permute.xlu1 %3028 }
 0x2ae   : > { %3034 = vst.msk [vmem:[%s6550_s23 + $0x30] sm:$0xff] %vm3032_vm7, %v3029_v34 }
 0x2af   : > { %3073 = vst.msk [vmem:[%s6550_s23 + $0x30] sm:$0xff] %vm3069_vm9, %v3066_v19 }
 0x2b1   : > { %v3143_v9 = vpop.permute.xlu1 %3142 }
 0x2b2   : > { %3148 = vst.msk [vmem:[%s6550_s23 + $0x38] sm:$0xff] %vm3146_vm12, %v3143_v9 }
 0x2b3   : > { %3187 = vst.msk [vmem:[%s6550_s23 + $0x38] sm:$0xff] %vm3183_vm13, %v3180_v13 }
 0x2b5   : > { %v3526_v60 = vpop.permute.xlu1 %3525 }
 0x2b9   : > { %v3257_v51 = vpop.permute.xlu1 %3256 }
 0x2ba   : > { %3262 = vst.msk [vmem:[%s6550_s23 + $0x40] sm:$0xff] %vm3260_vm15, %v3257_v51 }
 0x2bd   : > { %v3378_v32 = vpop.permute.xlu1 %3377 }
 0x2be   : > { %3384 = vst.msk [vmem:[%s6550_s23 + $0x50] sm:$0xff] %vm3071_vm14, %v3378_v32 }
 0x2c1   : > { %v3416_v45 = vpop.permute.xlu1 %3415 }
 0x2c2   : > { %3420 = vst.msk [vmem:[%s6550_s23 + $0x50] sm:$0xff] %vm3109_vm0, %v3416_v45 }
 0x2c5   : > { %v3488_v25 = vpop.permute.xlu1 %3487 }
 0x2c6   : > { %3494 = vst.msk [vmem:[%s6550_s23 + $0x58] sm:$0xff] %vm3185_vm3, %v3488_v25 }
 0x2c7   : > { %3530 = vst.msk [vmem:[%s6550_s23 + $0x58] sm:$0xff] %vm3223_vm4, %v3526_v60 }
 0x2c9   : > { %v3342_v31 = vpop.permute.xlu1 %3341 }
 0x2ca   : > { %3346 = vst.msk [vmem:[%s6550_s23 + $0x48] sm:$0xff] %vm3032_vm7, %v3342_v31 }
 0x2cb   : > { %3383 = vst.msk [vmem:[%s6550_s23 + $0x48] sm:$0xff] %vm3069_vm9, %v3378_v32 }
 0x2cd   : > { %v3452_v49 = vpop.permute.xlu1 %3451 }
 0x2ce   : > { %3456 = vst.msk [vmem:[%s6550_s23 + $0x50] sm:$0xff] %vm3146_vm12, %v3452_v49 }
 0x2cf   : > { %3493 = vst.msk [vmem:[%s6550_s23 + $0x50] sm:$0xff] %vm3183_vm13, %v3488_v25 }
 0x2d1   : > { %v3562_v62 = vpop.permute.xlu1 %3561 }
 0x2d2   : > { %3566 = vst.msk [vmem:[%s6550_s23 + $0x58] sm:$0xff] %vm3260_vm15, %v3562_v62 }
 0x2d3 PF: > { %s13_s14 = sadd.s32 1, %s4549_s14   ;;  %s6733_s12 = smov %s4545_s13 }
 0x2d4   : > { %p10_p5 = scmp.ge.s32.totalorder %s13_s14, 4   ;;  %s6734_s13 = smov %s6736_s15 }
 0x2d6   :  { %12 = sbr.rel (!%p10_p5) target bundleno = 2 (0x2), region = 66 }

</bundles_post_ra>
